<compile_context>
chip_gen: v6e
topology: v6e:2x2x1
jax: 0.10.0
libtpu: 0.0.40
codegen_flags: <defaults>
</compile_context>

<pallas_src>
import functools

import jax
import jax.numpy as jnp
from jax import lax
from jax.experimental import pallas as pl
from jax.experimental.pallas import tpu as pltpu


def proposal_conv_kernel(x_ref, w1f_ref, b1_ref, gamma_ref, beta_ref,
                         mask_ref, maskT_ref, w2t_ref, b2_ref, out_ref,
                         xrow_ref, hrow_ref, *, H, W, eps):
    Cin = x_ref.shape[-1]
    Cmid = w1f_ref.shape[-1]
    Cout = w2t_ref.shape[1]
    HW = H * W
    cg = Cmid // mask_ref.shape[-1]
    f32 = jnp.float32
    bf16 = jnp.bfloat16

    # Width index of every flattened spatial position, for edge masking of the W halo.
    wcol = lax.broadcasted_iota(jnp.int32, (HW, 1), 0) % W

    # ---- zero only the top/bottom halo rows of the im2col scratches (tiny; done every
    #      step so correctness never depends on how the grid axis is split across cores).
    xrow_ref[0:W, :] = jnp.zeros((W, 3 * Cin), bf16)
    xrow_ref[(H + 1) * W:(H + 2) * W, :] = jnp.zeros((W, 3 * Cin), bf16)
    hrow_ref[0:W, :] = jnp.zeros((W, 3 * Cmid), bf16)
    hrow_ref[(H + 1) * W:(H + 2) * W, :] = jnp.zeros((W, 3 * Cmid), bf16)

    # ---- width-im2col for conv #1 ----
    # main row p = h*W + w of xrow holds [x(h, w-1), x(h, w), x(h, w+1)] (0 outside).
    xv = x_ref[0]                                                          # (H*W, Cin) f32
    left = jnp.where(wcol >= 1, pltpu.roll(xv, 1, axis=0), 0.0)            # x[h, w-1]
    right = jnp.where(wcol <= W - 2, pltpu.roll(xv, HW - 1, axis=0), 0.0)  # x[h, w+1]
    xrow_ref[W:(H + 1) * W, 0:Cin] = left.astype(bf16)
    xrow_ref[W:(H + 1) * W, Cin:2 * Cin] = xv.astype(bf16)
    xrow_ref[W:(H + 1) * W, 2 * Cin:3 * Cin] = right.astype(bf16)

    # ---- conv #1: 3 matmuls with K = 3*Cin (bf16 x bf16 -> f32); bias folded into init ----
    acc = jnp.broadcast_to(b1_ref[...], (HW, Cmid)).astype(f32)
    for kh in range(3):
        patch = xrow_ref[kh * W:kh * W + HW, :]                            # aligned overlapping view
        acc = acc + jnp.dot(patch, w1f_ref[kh], preferred_element_type=f32)

    # ---- GroupNorm over (channels-in-group x H x W), per sample (f32 stats) ----
    count = jnp.float32(HW * cg)
    sum_c = jnp.sum(acc, axis=0, keepdims=True)                            # (1, Cmid)
    sumsq_c = jnp.sum(acc * acc, axis=0, keepdims=True)                    # (1, Cmid)
    gsum = jnp.dot(sum_c, mask_ref[...], preferred_element_type=f32)       # (1, G)
    gsumsq = jnp.dot(sumsq_c, mask_ref[...], preferred_element_type=f32)   # (1, G)
    gmean = gsum / count
    gvar = gsumsq / count - gmean * gmean
    ginv = lax.rsqrt(gvar + eps)
    mean_c = jnp.dot(gmean, maskT_ref[...], preferred_element_type=f32)    # (1, Cmid)
    inv_c = jnp.dot(ginv, maskT_ref[...], preferred_element_type=f32)      # (1, Cmid)
    # Fold (x - mean) * inv * gamma + beta into one per-channel scale/shift.
    scale_c = inv_c * gamma_ref[...]                                       # (1, Cmid)
    shift_c = beta_ref[...] - mean_c * scale_c                             # (1, Cmid)
    h = jnp.maximum(acc * scale_c + shift_c, 0.0)                          # GN + ReLU, f32

    # ---- width-im2col for conv #2 ----
    left_h = jnp.where(wcol >= 1, pltpu.roll(h, 1, axis=0), 0.0)
    right_h = jnp.where(wcol <= W - 2, pltpu.roll(h, HW - 1, axis=0), 0.0)
    hrow_ref[W:(H + 1) * W, 0:Cmid] = left_h.astype(bf16)
    hrow_ref[W:(H + 1) * W, Cmid:2 * Cmid] = h.astype(bf16)
    hrow_ref[W:(H + 1) * W, 2 * Cmid:3 * Cmid] = right_h.astype(bf16)

    # ---- conv #2 (proposal): computed transposed -> lane-dense (Cout, H*W) output ----
    acc2 = jnp.broadcast_to(b2_ref[...], (Cout, HW)).astype(f32)
    for kh in range(3):
        patch = hrow_ref[kh * W:kh * W + HW, :]                            # (H*W, 3*Cmid)
        acc2 = acc2 + lax.dot_general(
            w2t_ref[kh], patch,
            dimension_numbers=(((1,), (1,)), ((), ())),                    # (Cout,K) x (HW,K)^T
            preferred_element_type=f32)
    out_ref[0] = acc2.astype(out_ref.dtype)


def proposal_conv_module(x_nchw, w1, b1, gamma, beta, w2, b2, *, num_groups, eps=1e-5):
    """Forward pass of ProposalConvModule. x_nchw: (N, Cin, H, W) float32, weights in HWIO."""
    N, Cin, H, W = x_nchw.shape
    Cmid = w1.shape[-1]
    Cout = w2.shape[-1]
    G = num_groups
    assert Cmid % G == 0
    assert w1.shape[:2] == (3, 3) and w2.shape[:2] == (3, 3)
    assert W % 8 == 0, "W must be a multiple of 8 for aligned sublane tiling"
    cg = Cmid // G

    # Boundary glue (layout-only where possible; no jnp.pad, no output transpose).
    x_flat = jnp.transpose(x_nchw, (0, 2, 3, 1)).reshape(N, H * W, Cin)
    w1f = w1.reshape(3, 3 * Cin, Cmid).astype(jnp.bfloat16)                   # [kh, kw*Cin+ci, co]
    w2t = jnp.transpose(w2.reshape(3, 3 * Cmid, Cout), (0, 2, 1)).astype(jnp.bfloat16)
    b1_2d = b1.reshape(1, Cmid)
    gamma_2d = gamma.reshape(1, Cmid)
    beta_2d = beta.reshape(1, Cmid)
    b2_col = b2.reshape(Cout, 1)
    mask = (jnp.arange(Cmid)[:, None] // cg == jnp.arange(G)[None, :]).astype(jnp.float32)
    maskT = mask.T

    kernel = functools.partial(proposal_conv_kernel, H=H, W=W, eps=eps)

    out_flat = pl.pallas_call(
        kernel,
        out_shape=jax.ShapeDtypeStruct((N, Cout, H * W), jnp.float32),
        grid_spec=pltpu.PrefetchScalarGridSpec(
            num_scalar_prefetch=0,
            grid=(N,),
            in_specs=[
                pl.BlockSpec((1, H * W, Cin), lambda n: (n, 0, 0)),
                pl.BlockSpec((3, 3 * Cin, Cmid), lambda n: (0, 0, 0)),
                pl.BlockSpec((1, Cmid), lambda n: (0, 0)),
                pl.BlockSpec((1, Cmid), lambda n: (0, 0)),
                pl.BlockSpec((1, Cmid), lambda n: (0, 0)),
                pl.BlockSpec((Cmid, G), lambda n: (0, 0)),
                pl.BlockSpec((G, Cmid), lambda n: (0, 0)),
                pl.BlockSpec((3, Cout, 3 * Cmid), lambda n: (0, 0, 0)),
                pl.BlockSpec((Cout, 1), lambda n: (0, 0)),
            ],
            out_specs=pl.BlockSpec((1, Cout, H * W), lambda n: (n, 0, 0)),
            scratch_shapes=[
                pltpu.VMEM(((H + 2) * W, 3 * Cin), jnp.bfloat16),
                pltpu.VMEM(((H + 2) * W, 3 * Cmid), jnp.bfloat16),
            ],
        ),
        compiler_params=pltpu.CompilerParams(
            dimension_semantics=("parallel",),
            vmem_limit_bytes=32 * 1024 * 1024,
        ),
    )(x_flat, w1f, b1_2d, gamma_2d, beta_2d, mask, maskT, w2t, b2_col)

    # Output already in NCHW order; this reshape is metadata-only.
    return out_flat.reshape(N, Cout, H, W)


def reference_forward(x_nchw, w1, b1, gamma, beta, w2, b2, *, num_groups, eps=1e-5):
    """Pure-JAX f32 reference (matches PyTorch semantics)."""
    x = jnp.transpose(x_nchw, (0, 2, 3, 1))
    dn = ('NHWC', 'HWIO', 'NHWC')
    y = jax.lax.conv_general_dilated(x, w1, (1, 1), 'SAME', dimension_numbers=dn) + b1
    N, H, W, C = y.shape
    g = y.reshape(N, H, W, num_groups, C // num_groups)
    mean = g.mean(axis=(1, 2, 4), keepdims=True)
    var = g.var(axis=(1, 2, 4), keepdims=True)
    g = (g - mean) * jax.lax.rsqrt(var + eps)
    y = g.reshape(N, H, W, C) * gamma + beta
    y = jnp.maximum(y, 0.0)
    out = jax.lax.conv_general_dilated(y, w2, (1, 1), 'SAME', dimension_numbers=dn) + b2
    return jnp.transpose(out, (0, 3, 1, 2))


if __name__ == "__main__":
    # Small shapes consistent with the module (scaled-down channel counts).
    N, Cin, H, W = 2, 32, 16, 16
    Cmid, Cout, G = 32, 18, 8

    key = jax.random.PRNGKey(0)
    kx, kw1, kw2 = jax.random.split(key, 3)

    x = jax.random.normal(kx, (N, Cin, H, W), jnp.float32)

    # normal_init(std=0.01, bias=0) + GroupNorm default affine (weight=1, bias=0).
    w1 = 0.01 * jax.random.normal(kw1, (3, 3, Cin, Cmid), jnp.float32)   # HWIO
    b1 = jnp.zeros((Cmid,), jnp.float32)
    gamma = jnp.ones((Cmid,), jnp.float32)
    beta = jnp.zeros((Cmid,), jnp.float32)
    w2 = 0.01 * jax.random.normal(kw2, (3, 3, Cmid, Cout), jnp.float32)  # HWIO
    b2 = jnp.zeros((Cout,), jnp.float32)

    out = proposal_conv_module(x, w1, b1, gamma, beta, w2, b2, num_groups=G)
    out = jax.block_until_ready(out)

    ref = reference_forward(x, w1, b1, gamma, beta, w2, b2, num_groups=G)
    assert out.shape == (N, Cout, H, W), out.shape
    # bf16 MXU operands vs. f32 reference -> relaxed tolerance (error analysis: ~2e-3 max).
    assert jnp.allclose(out, ref, rtol=5e-2, atol=1e-2), float(jnp.max(jnp.abs(out - ref)))

    print("KERNEL_OK")
</pallas_src>

<mosaic_0001>
module attributes {stable_mosaic.version = 11 : i64} {
  func.func @proposal_conv_kernel(%arg0: i32, %arg1: memref<1x256x32xf32, #tpu.memory_space<vmem>>, %arg2: memref<3x96x32xbf16, #tpu.memory_space<vmem>>, %arg3: memref<1x32xf32, #tpu.memory_space<vmem>>, %arg4: memref<1x32xf32, #tpu.memory_space<vmem>>, %arg5: memref<1x32xf32, #tpu.memory_space<vmem>>, %arg6: memref<32x8xf32, #tpu.memory_space<vmem>>, %arg7: memref<8x32xf32, #tpu.memory_space<vmem>>, %arg8: memref<3x18x96xbf16, #tpu.memory_space<vmem>>, %arg9: memref<18x1xf32, #tpu.memory_space<vmem>>, %arg10: memref<1x18x256xf32, #tpu.memory_space<vmem>>, %arg11: memref<288x96xbf16, #tpu.memory_space<vmem>>, %arg12: memref<288x96xbf16, #tpu.memory_space<vmem>>) attributes {dimension_semantics = [#tpu.dimension_semantics<parallel>], iteration_bounds = array<i64: 2>, scalar_prefetch = 0 : i64, scratch_operands = 2 : i64, tpu.core_type = #tpu.core_type<tc>, window_params = [{transform_indices = @transform_0, window_bounds = array<i64: 1, 256, 32>}, {pipeline_mode = #tpu.pipeline_mode<synchronous>, transform_indices = @transform_1, window_bounds = array<i64: 3, 96, 32>}, {pipeline_mode = #tpu.pipeline_mode<synchronous>, transform_indices = @transform_2, window_bounds = array<i64: 1, 32>}, {pipeline_mode = #tpu.pipeline_mode<synchronous>, transform_indices = @transform_3, window_bounds = array<i64: 1, 32>}, {pipeline_mode = #tpu.pipeline_mode<synchronous>, transform_indices = @transform_4, window_bounds = array<i64: 1, 32>}, {pipeline_mode = #tpu.pipeline_mode<synchronous>, transform_indices = @transform_5, window_bounds = array<i64: 32, 8>}, {pipeline_mode = #tpu.pipeline_mode<synchronous>, transform_indices = @transform_6, window_bounds = array<i64: 8, 32>}, {pipeline_mode = #tpu.pipeline_mode<synchronous>, transform_indices = @transform_7, window_bounds = array<i64: 3, 18, 96>}, {pipeline_mode = #tpu.pipeline_mode<synchronous>, transform_indices = @transform_8, window_bounds = array<i64: 18, 1>}, {transform_indices = @transform_9, window_bounds = array<i64: 1, 18, 256>}]} {
    %0 = tpu.iota {dimensions = array<i32: 0>} : vector<256x1xi32>
    %c16_i32 = arith.constant 16 : i32
    %c0_i32 = arith.constant 0 : i32
    %1 = arith.cmpi eq, %c16_i32, %c0_i32 : i32
    %c1_i32 = arith.constant 1 : i32
    %2 = arith.select %1, %c1_i32, %c16_i32 : i32
    %3 = vector.broadcast %2 : i32 to vector<256x1xi32>
    %4 = arith.remsi %0, %3 : vector<256x1xi32>
    %c0_i32_0 = arith.constant 0 : i32
    %5 = vector.broadcast %c0_i32_0 : i32 to vector<256x1xi32>
    %6 = arith.cmpi ne, %4, %5 : vector<256x1xi32>
    %c0_i32_1 = arith.constant 0 : i32
    %7 = vector.broadcast %c0_i32_1 : i32 to vector<256x1xi32>
    %8 = arith.cmpi slt, %4, %7 : vector<256x1xi32>
    %c0_i32_2 = arith.constant 0 : i32
    %9 = arith.cmpi slt, %2, %c0_i32_2 : i32
    %10 = vector.broadcast %9 : i1 to vector<256x1xi1>
    %11 = vector.broadcast %10 : vector<256x1xi1> to vector<256x1xi1>
    %12 = arith.xori %8, %11 : vector<256x1xi1>
    %13 = arith.andi %12, %6 : vector<256x1xi1>
    %14 = vector.broadcast %2 : i32 to vector<256x1xi32>
    %15 = arith.addi %4, %14 : vector<256x1xi32>
    %16 = arith.select %13, %15, %4 : vector<256x1xi1>, vector<256x1xi32>
    %cst = arith.constant 0.000000e+00 : bf16
    %17 = vector.broadcast %cst : bf16 to vector<16x96xbf16>
    %c0 = arith.constant 0 : index
    %c0_3 = arith.constant 0 : index
    %18 = vector.load %arg11[%c0, %c0_3] : memref<288x96xbf16, #tpu.memory_space<vmem>>, vector<16x96xbf16>
    tpu.vector_store %arg11[%c0, %c0_3], %17 {strides = array<i32>} : memref<288x96xbf16, #tpu.memory_space<vmem>>, vector<16x96xbf16>,
    %cst_4 = arith.constant 0.000000e+00 : bf16
    %19 = vector.broadcast %cst_4 : bf16 to vector<16x96xbf16>
    %c272 = arith.constant 272 : index
    %c0_5 = arith.constant 0 : index
    %20 = vector.load %arg11[%c272, %c0_5] : memref<288x96xbf16, #tpu.memory_space<vmem>>, vector<16x96xbf16>
    tpu.vector_store %arg11[%c272, %c0_5], %19 {strides = array<i32>} : memref<288x96xbf16, #tpu.memory_space<vmem>>, vector<16x96xbf16>,
    %cst_6 = arith.constant 0.000000e+00 : bf16
    %21 = vector.broadcast %cst_6 : bf16 to vector<16x96xbf16>
    %c0_7 = arith.constant 0 : index
    %c0_8 = arith.constant 0 : index
    %22 = vector.load %arg12[%c0_7, %c0_8] : memref<288x96xbf16, #tpu.memory_space<vmem>>, vector<16x96xbf16>
    tpu.vector_store %arg12[%c0_7, %c0_8], %21 {strides = array<i32>} : memref<288x96xbf16, #tpu.memory_space<vmem>>, vector<16x96xbf16>,
    %cst_9 = arith.constant 0.000000e+00 : bf16
    %23 = vector.broadcast %cst_9 : bf16 to vector<16x96xbf16>
    %c272_10 = arith.constant 272 : index
    %c0_11 = arith.constant 0 : index
    %24 = vector.load %arg12[%c272_10, %c0_11] : memref<288x96xbf16, #tpu.memory_space<vmem>>, vector<16x96xbf16>
    tpu.vector_store %arg12[%c272_10, %c0_11], %23 {strides = array<i32>} : memref<288x96xbf16, #tpu.memory_space<vmem>>, vector<16x96xbf16>,
    %c0_12 = arith.constant 0 : index
    %c0_13 = arith.constant 0 : index
    %c0_14 = arith.constant 0 : index
    %25 = vector.load %arg1[%c0_12, %c0_13, %c0_14] : memref<1x256x32xf32, #tpu.memory_space<vmem>>, vector<1x256x32xf32>
    %26 = vector.shape_cast %25 : vector<1x256x32xf32> to vector<256x32xf32>
    %c1_i32_15 = arith.constant 1 : i32
    %27 = vector.broadcast %c1_i32_15 : i32 to vector<256x1xi32>
    %28 = arith.cmpi sge, %16, %27 : vector<256x1xi32>
    %c1_i32_16 = arith.constant 1 : i32
    %29 = tpu.dynamic_rotate %26 by %c1_i32_16 dim 0 : vector<256x32xf32>, i32 -> vector<256x32xf32>
    %cst_17 = arith.constant 0.000000e+00 : f32
    %30 = vector.shape_cast %28 : vector<256x1xi1> to vector<256x1xi1>
    %31 = vector.broadcast %30 : vector<256x1xi1> to vector<256x32xi1>
    %32 = vector.broadcast %cst_17 : f32 to vector<256x32xf32>
    %33 = arith.select %31, %29, %32 : vector<256x32xi1>, vector<256x32xf32>
    %c14_i32 = arith.constant 14 : i32
    %34 = vector.broadcast %c14_i32 : i32 to vector<256x1xi32>
    %35 = arith.cmpi sle, %16, %34 : vector<256x1xi32>
    %c255_i32 = arith.constant 255 : i32
    %36 = tpu.dynamic_rotate %26 by %c255_i32 dim 0 : vector<256x32xf32>, i32 -> vector<256x32xf32>
    %cst_18 = arith.constant 0.000000e+00 : f32
    %37 = vector.shape_cast %35 : vector<256x1xi1> to vector<256x1xi1>
    %38 = vector.broadcast %37 : vector<256x1xi1> to vector<256x32xi1>
    %39 = vector.broadcast %cst_18 : f32 to vector<256x32xf32>
    %40 = arith.select %38, %36, %39 : vector<256x32xi1>, vector<256x32xf32>
    %41 = arith.truncf %33 : vector<256x32xf32> to vector<256x32xbf16>
    %c16 = arith.constant 16 : index
    %c0_19 = arith.constant 0 : index
    %42 = vector.load %arg11[%c16, %c0_19] : memref<288x96xbf16, #tpu.memory_space<vmem>>, vector<256x32xbf16>
    tpu.vector_store %arg11[%c16, %c0_19], %41 {strides = array<i32>} : memref<288x96xbf16, #tpu.memory_space<vmem>>, vector<256x32xbf16>,
    %43 = arith.truncf %26 : vector<256x32xf32> to vector<256x32xbf16>
    %c16_20 = arith.constant 16 : index
    %c32 = arith.constant 32 : index
    %44 = vector.load %arg11[%c16_20, %c32] : memref<288x96xbf16, #tpu.memory_space<vmem>>, vector<256x32xbf16>
    tpu.vector_store %arg11[%c16_20, %c32], %43 {strides = array<i32>} : memref<288x96xbf16, #tpu.memory_space<vmem>>, vector<256x32xbf16>,
    %45 = arith.truncf %40 : vector<256x32xf32> to vector<256x32xbf16>
    %c16_21 = arith.constant 16 : index
    %c64 = arith.constant 64 : index
    %46 = vector.load %arg11[%c16_21, %c64] : memref<288x96xbf16, #tpu.memory_space<vmem>>, vector<256x32xbf16>
    tpu.vector_store %arg11[%c16_21, %c64], %45 {strides = array<i32>} : memref<288x96xbf16, #tpu.memory_space<vmem>>, vector<256x32xbf16>,
    %c0_22 = arith.constant 0 : index
    %c0_23 = arith.constant 0 : index
    %47 = vector.load %arg3[%c0_22, %c0_23] : memref<1x32xf32, #tpu.memory_space<vmem>>, vector<1x32xf32>
    %48 = vector.shape_cast %47 : vector<1x32xf32> to vector<1x32xf32>
    %49 = vector.broadcast %48 : vector<1x32xf32> to vector<256x32xf32>
    %c0_24 = arith.constant 0 : index
    %c0_25 = arith.constant 0 : index
    %50 = vector.load %arg11[%c0_24, %c0_25] : memref<288x96xbf16, #tpu.memory_space<vmem>>, vector<256x96xbf16>
    %c0_26 = arith.constant 0 : index
    %c0_27 = arith.constant 0 : index
    %c0_28 = arith.constant 0 : index
    %51 = vector.load %arg2[%c0_26, %c0_27, %c0_28] : memref<3x96x32xbf16, #tpu.memory_space<vmem>>, vector<1x96x32xbf16>
    %52 = vector.shape_cast %51 : vector<1x96x32xbf16> to vector<96x32xbf16>
    %cst_29 = arith.constant dense<0.000000e+00> : vector<256x32xf32>
    %53 = tpu.matmul %50, %52, %cst_29 {dimension_numbers = #tpu.dot_dimension_numbers<[1], [0], [0], [1], [0, 0, 1, 1], [], []>} : vector<256x96xbf16>, vector<96x32xbf16>, vector<256x32xf32> -> vector<256x32xf32>
    %54 = arith.addf %49, %53 : vector<256x32xf32>
    %c16_30 = arith.constant 16 : index
    %c0_31 = arith.constant 0 : index
    %55 = vector.load %arg11[%c16_30, %c0_31] : memref<288x96xbf16, #tpu.memory_space<vmem>>, vector<256x96xbf16>
    %c1 = arith.constant 1 : index
    %c0_32 = arith.constant 0 : index
    %c0_33 = arith.constant 0 : index
    %56 = vector.load %arg2[%c1, %c0_32, %c0_33] : memref<3x96x32xbf16, #tpu.memory_space<vmem>>, vector<1x96x32xbf16>
    %57 = vector.shape_cast %56 : vector<1x96x32xbf16> to vector<96x32xbf16>
    %cst_34 = arith.constant dense<0.000000e+00> : vector<256x32xf32>
    %58 = tpu.matmul %55, %57, %cst_34 {dimension_numbers = #tpu.dot_dimension_numbers<[1], [0], [0], [1], [0, 0, 1, 1], [], []>} : vector<256x96xbf16>, vector<96x32xbf16>, vector<256x32xf32> -> vector<256x32xf32>
    %59 = arith.addf %54, %58 : vector<256x32xf32>
    %c32_35 = arith.constant 32 : index
    %c0_36 = arith.constant 0 : index
    %60 = vector.load %arg11[%c32_35, %c0_36] : memref<288x96xbf16, #tpu.memory_space<vmem>>, vector<256x96xbf16>
    %c2 = arith.constant 2 : index
    %c0_37 = arith.constant 0 : index
    %c0_38 = arith.constant 0 : index
    %61 = vector.load %arg2[%c2, %c0_37, %c0_38] : memref<3x96x32xbf16, #tpu.memory_space<vmem>>, vector<1x96x32xbf16>
    %62 = vector.shape_cast %61 : vector<1x96x32xbf16> to vector<96x32xbf16>
    %cst_39 = arith.constant dense<0.000000e+00> : vector<256x32xf32>
    %63 = tpu.matmul %60, %62, %cst_39 {dimension_numbers = #tpu.dot_dimension_numbers<[1], [0], [0], [1], [0, 0, 1, 1], [], []>} : vector<256x96xbf16>, vector<96x32xbf16>, vector<256x32xf32> -> vector<256x32xf32>
    %64 = arith.addf %59, %63 : vector<256x32xf32>
    %cst_40 = arith.constant dense<0.000000e+00> : vector<32xf32>
    %65 = vector.multi_reduction <add>, %64, %cst_40 [0] : vector<256x32xf32> to vector<32xf32>
    %66 = vector.shape_cast %65 : vector<32xf32> to vector<1x32xf32>
    %67 = arith.mulf %64, %64 : vector<256x32xf32>
    %cst_41 = arith.constant dense<0.000000e+00> : vector<32xf32>
    %68 = vector.multi_reduction <add>, %67, %cst_41 [0] : vector<256x32xf32> to vector<32xf32>
    %69 = vector.shape_cast %68 : vector<32xf32> to vector<1x32xf32>
    %c0_42 = arith.constant 0 : index
    %c0_43 = arith.constant 0 : index
    %70 = vector.load %arg6[%c0_42, %c0_43] : memref<32x8xf32, #tpu.memory_space<vmem>>, vector<32x8xf32>
    %cst_44 = arith.constant dense<0.000000e+00> : vector<1x8xf32>
    %71 = tpu.matmul %66, %70, %cst_44 {dimension_numbers = #tpu.dot_dimension_numbers<[1], [0], [0], [1], [0, 0, 1, 1], [], []>} : vector<1x32xf32>, vector<32x8xf32>, vector<1x8xf32> -> vector<1x8xf32>
    %c0_45 = arith.constant 0 : index
    %c0_46 = arith.constant 0 : index
    %72 = vector.load %arg6[%c0_45, %c0_46] : memref<32x8xf32, #tpu.memory_space<vmem>>, vector<32x8xf32>
    %cst_47 = arith.constant dense<0.000000e+00> : vector<1x8xf32>
    %73 = tpu.matmul %69, %72, %cst_47 {dimension_numbers = #tpu.dot_dimension_numbers<[1], [0], [0], [1], [0, 0, 1, 1], [], []>} : vector<1x32xf32>, vector<32x8xf32>, vector<1x8xf32> -> vector<1x8xf32>
    %cst_48 = arith.constant 1.024000e+03 : f32
    %74 = vector.broadcast %cst_48 : f32 to vector<1x8xf32>
    %75 = arith.divf %71, %74 : vector<1x8xf32>
    %cst_49 = arith.constant 1.024000e+03 : f32
    %76 = vector.broadcast %cst_49 : f32 to vector<1x8xf32>
    %77 = arith.divf %73, %76 : vector<1x8xf32>
    %78 = arith.mulf %75, %75 : vector<1x8xf32>
    %79 = arith.subf %77, %78 : vector<1x8xf32>
    %cst_50 = arith.constant 9.99999974E-6 : f32
    %80 = vector.broadcast %cst_50 : f32 to vector<1x8xf32>
    %81 = arith.addf %79, %80 : vector<1x8xf32>
    %82 = math.rsqrt %81 : vector<1x8xf32>
    %c0_51 = arith.constant 0 : index
    %c0_52 = arith.constant 0 : index
    %83 = vector.load %arg7[%c0_51, %c0_52] : memref<8x32xf32, #tpu.memory_space<vmem>>, vector<8x32xf32>
    %cst_53 = arith.constant dense<0.000000e+00> : vector<1x32xf32>
    %84 = tpu.matmul %75, %83, %cst_53 {dimension_numbers = #tpu.dot_dimension_numbers<[1], [0], [0], [1], [0, 0, 1, 1], [], []>} : vector<1x8xf32>, vector<8x32xf32>, vector<1x32xf32> -> vector<1x32xf32>
    %c0_54 = arith.constant 0 : index
    %c0_55 = arith.constant 0 : index
    %85 = vector.load %arg7[%c0_54, %c0_55] : memref<8x32xf32, #tpu.memory_space<vmem>>, vector<8x32xf32>
    %cst_56 = arith.constant dense<0.000000e+00> : vector<1x32xf32>
    %86 = tpu.matmul %82, %85, %cst_56 {dimension_numbers = #tpu.dot_dimension_numbers<[1], [0], [0], [1], [0, 0, 1, 1], [], []>} : vector<1x8xf32>, vector<8x32xf32>, vector<1x32xf32> -> vector<1x32xf32>
    %c0_57 = arith.constant 0 : index
    %c0_58 = arith.constant 0 : index
    %87 = vector.load %arg4[%c0_57, %c0_58] : memref<1x32xf32, #tpu.memory_space<vmem>>, vector<1x32xf32>
    %88 = arith.mulf %86, %87 : vector<1x32xf32>
    %c0_59 = arith.constant 0 : index
    %c0_60 = arith.constant 0 : index
    %89 = vector.load %arg5[%c0_59, %c0_60] : memref<1x32xf32, #tpu.memory_space<vmem>>, vector<1x32xf32>
    %90 = arith.mulf %84, %88 : vector<1x32xf32>
    %91 = arith.subf %89, %90 : vector<1x32xf32>
    %92 = vector.broadcast %88 : vector<1x32xf32> to vector<256x32xf32>
    %93 = arith.mulf %64, %92 : vector<256x32xf32>
    %94 = vector.broadcast %91 : vector<1x32xf32> to vector<256x32xf32>
    %95 = arith.addf %93, %94 : vector<256x32xf32>
    %cst_61 = arith.constant 0.000000e+00 : f32
    %96 = vector.broadcast %cst_61 : f32 to vector<256x32xf32>
    %97 = arith.maximumf %95, %96 : vector<256x32xf32>
    %c1_i32_62 = arith.constant 1 : i32
    %98 = vector.broadcast %c1_i32_62 : i32 to vector<256x1xi32>
    %99 = arith.cmpi sge, %16, %98 : vector<256x1xi32>
    %c1_i32_63 = arith.constant 1 : i32
    %100 = tpu.dynamic_rotate %97 by %c1_i32_63 dim 0 : vector<256x32xf32>, i32 -> vector<256x32xf32>
    %cst_64 = arith.constant 0.000000e+00 : f32
    %101 = vector.shape_cast %99 : vector<256x1xi1> to vector<256x1xi1>
    %102 = vector.broadcast %101 : vector<256x1xi1> to vector<256x32xi1>
    %103 = vector.broadcast %cst_64 : f32 to vector<256x32xf32>
    %104 = arith.select %102, %100, %103 : vector<256x32xi1>, vector<256x32xf32>
    %c14_i32_65 = arith.constant 14 : i32
    %105 = vector.broadcast %c14_i32_65 : i32 to vector<256x1xi32>
    %106 = arith.cmpi sle, %16, %105 : vector<256x1xi32>
    %c255_i32_66 = arith.constant 255 : i32
    %107 = tpu.dynamic_rotate %97 by %c255_i32_66 dim 0 : vector<256x32xf32>, i32 -> vector<256x32xf32>
    %cst_67 = arith.constant 0.000000e+00 : f32
    %108 = vector.shape_cast %106 : vector<256x1xi1> to vector<256x1xi1>
    %109 = vector.broadcast %108 : vector<256x1xi1> to vector<256x32xi1>
    %110 = vector.broadcast %cst_67 : f32 to vector<256x32xf32>
    %111 = arith.select %109, %107, %110 : vector<256x32xi1>, vector<256x32xf32>
    %112 = arith.truncf %104 : vector<256x32xf32> to vector<256x32xbf16>
    %c16_68 = arith.constant 16 : index
    %c0_69 = arith.constant 0 : index
    %113 = vector.load %arg12[%c16_68, %c0_69] : memref<288x96xbf16, #tpu.memory_space<vmem>>, vector<256x32xbf16>
    tpu.vector_store %arg12[%c16_68, %c0_69], %112 {strides = array<i32>} : memref<288x96xbf16, #tpu.memory_space<vmem>>, vector<256x32xbf16>,
    %114 = arith.truncf %97 : vector<256x32xf32> to vector<256x32xbf16>
    %c16_70 = arith.constant 16 : index
    %c32_71 = arith.constant 32 : index
    %115 = vector.load %arg12[%c16_70, %c32_71] : memref<288x96xbf16, #tpu.memory_space<vmem>>, vector<256x32xbf16>
    tpu.vector_store %arg12[%c16_70, %c32_71], %114 {strides = array<i32>} : memref<288x96xbf16, #tpu.memory_space<vmem>>, vector<256x32xbf16>,
    %116 = arith.truncf %111 : vector<256x32xf32> to vector<256x32xbf16>
    %c16_72 = arith.constant 16 : index
    %c64_73 = arith.constant 64 : index
    %117 = vector.load %arg12[%c16_72, %c64_73] : memref<288x96xbf16, #tpu.memory_space<vmem>>, vector<256x32xbf16>
    tpu.vector_store %arg12[%c16_72, %c64_73], %116 {strides = array<i32>} : memref<288x96xbf16, #tpu.memory_space<vmem>>, vector<256x32xbf16>,
    %c0_74 = arith.constant 0 : index
    %c0_75 = arith.constant 0 : index
    %118 = vector.load %arg9[%c0_74, %c0_75] : memref<18x1xf32, #tpu.memory_space<vmem>>, vector<18x1xf32>
    %119 = vector.shape_cast %118 : vector<18x1xf32> to vector<18x1xf32>
    %120 = vector.broadcast %119 : vector<18x1xf32> to vector<18x256xf32>
    %c0_76 = arith.constant 0 : index
    %c0_77 = arith.constant 0 : index
    %121 = vector.load %arg12[%c0_76, %c0_77] : memref<288x96xbf16, #tpu.memory_space<vmem>>, vector<256x96xbf16>
    %c0_78 = arith.constant 0 : index
    %c0_79 = arith.constant 0 : index
    %c0_80 = arith.constant 0 : index
    %122 = vector.load %arg8[%c0_78, %c0_79, %c0_80] : memref<3x18x96xbf16, #tpu.memory_space<vmem>>, vector<1x18x96xbf16>
    %123 = vector.shape_cast %122 : vector<1x18x96xbf16> to vector<18x96xbf16>
    %cst_81 = arith.constant dense<0.000000e+00> : vector<18x256xf32>
    %124 = tpu.matmul %123, %121, %cst_81 {dimension_numbers = #tpu.dot_dimension_numbers<[1], [1], [0], [0], [0, 0, 1, 0], [], []>} : vector<18x96xbf16>, vector<256x96xbf16>, vector<18x256xf32> -> vector<18x256xf32>
    %125 = arith.addf %120, %124 : vector<18x256xf32>
    %c16_82 = arith.constant 16 : index
    %c0_83 = arith.constant 0 : index
    %126 = vector.load %arg12[%c16_82, %c0_83] : memref<288x96xbf16, #tpu.memory_space<vmem>>, vector<256x96xbf16>
    %c1_84 = arith.constant 1 : index
    %c0_85 = arith.constant 0 : index
    %c0_86 = arith.constant 0 : index
    %127 = vector.load %arg8[%c1_84, %c0_85, %c0_86] : memref<3x18x96xbf16, #tpu.memory_space<vmem>>, vector<1x18x96xbf16>
    %128 = vector.shape_cast %127 : vector<1x18x96xbf16> to vector<18x96xbf16>
    %cst_87 = arith.constant dense<0.000000e+00> : vector<18x256xf32>
    %129 = tpu.matmul %128, %126, %cst_87 {dimension_numbers = #tpu.dot_dimension_numbers<[1], [1], [0], [0], [0, 0, 1, 0], [], []>} : vector<18x96xbf16>, vector<256x96xbf16>, vector<18x256xf32> -> vector<18x256xf32>
    %130 = arith.addf %125, %129 : vector<18x256xf32>
    %c32_88 = arith.constant 32 : index
    %c0_89 = arith.constant 0 : index
    %131 = vector.load %arg12[%c32_88, %c0_89] : memref<288x96xbf16, #tpu.memory_space<vmem>>, vector<256x96xbf16>
    %c2_90 = arith.constant 2 : index
    %c0_91 = arith.constant 0 : index
    %c0_92 = arith.constant 0 : index
    %132 = vector.load %arg8[%c2_90, %c0_91, %c0_92] : memref<3x18x96xbf16, #tpu.memory_space<vmem>>, vector<1x18x96xbf16>
    %133 = vector.shape_cast %132 : vector<1x18x96xbf16> to vector<18x96xbf16>
    %cst_93 = arith.constant dense<0.000000e+00> : vector<18x256xf32>
    %134 = tpu.matmul %133, %131, %cst_93 {dimension_numbers = #tpu.dot_dimension_numbers<[1], [1], [0], [0], [0, 0, 1, 0], [], []>} : vector<18x96xbf16>, vector<256x96xbf16>, vector<18x256xf32> -> vector<18x256xf32>
    %135 = arith.addf %130, %134 : vector<18x256xf32>
    %c0_94 = arith.constant 0 : index
    %c0_95 = arith.constant 0 : index
    %c0_96 = arith.constant 0 : index
    %136 = vector.load %arg10[%c0_94, %c0_95, %c0_96] : memref<1x18x256xf32, #tpu.memory_space<vmem>>, vector<1x18x256xf32>
    %137 = vector.shape_cast %136 : vector<1x18x256xf32> to vector<18x256xf32>
    %138 = vector.shape_cast %135 : vector<18x256xf32> to vector<1x18x256xf32>
    tpu.vector_store %arg10[%c0_94, %c0_95, %c0_96], %138 {strides = array<i32>} : memref<1x18x256xf32, #tpu.memory_space<vmem>>, vector<1x18x256xf32>,
    return
  }
  func.func @transform_0(%arg0: i32) -> (i32, i32, i32) {
    %c0_i32 = arith.constant 0 : i32
    %c0_i32_0 = arith.constant 0 : i32
    %c0_i32_1 = arith.constant 0 : i32
    return %arg0, %c0_i32, %c0_i32_0 : i32, i32, i32
  }
  func.func @transform_1(%arg0: i32) -> (i32, i32, i32) {
    %c0_i32 = arith.constant 0 : i32
    %c0_i32_0 = arith.constant 0 : i32
    %c0_i32_1 = arith.constant 0 : i32
    %c0_i32_2 = arith.constant 0 : i32
    return %c0_i32, %c0_i32_0, %c0_i32_1 : i32, i32, i32
  }
  func.func @transform_2(%arg0: i32) -> (i32, i32) {
    %c0_i32 = arith.constant 0 : i32
    %c0_i32_0 = arith.constant 0 : i32
    %c0_i32_1 = arith.constant 0 : i32
    return %c0_i32, %c0_i32_0 : i32, i32
  }
  func.func @transform_3(%arg0: i32) -> (i32, i32) {
    %c0_i32 = arith.constant 0 : i32
    %c0_i32_0 = arith.constant 0 : i32
    %c0_i32_1 = arith.constant 0 : i32
    return %c0_i32, %c0_i32_0 : i32, i32
  }
  func.func @transform_4(%arg0: i32) -> (i32, i32) {
    %c0_i32 = arith.constant 0 : i32
    %c0_i32_0 = arith.constant 0 : i32
    %c0_i32_1 = arith.constant 0 : i32
    return %c0_i32, %c0_i32_0 : i32, i32
  }
  func.func @transform_5(%arg0: i32) -> (i32, i32) {
    %c0_i32 = arith.constant 0 : i32
    %c0_i32_0 = arith.constant 0 : i32
    %c0_i32_1 = arith.constant 0 : i32
    return %c0_i32, %c0_i32_0 : i32, i32
  }
  func.func @transform_6(%arg0: i32) -> (i32, i32) {
    %c0_i32 = arith.constant 0 : i32
    %c0_i32_0 = arith.constant 0 : i32
    %c0_i32_1 = arith.constant 0 : i32
    return %c0_i32, %c0_i32_0 : i32, i32
  }
  func.func @transform_7(%arg0: i32) -> (i32, i32, i32) {
    %c0_i32 = arith.constant 0 : i32
    %c0_i32_0 = arith.constant 0 : i32
    %c0_i32_1 = arith.constant 0 : i32
    %c0_i32_2 = arith.constant 0 : i32
    return %c0_i32, %c0_i32_0, %c0_i32_1 : i32, i32, i32
  }
  func.func @transform_8(%arg0: i32) -> (i32, i32) {
    %c0_i32 = arith.constant 0 : i32
    %c0_i32_0 = arith.constant 0 : i32
    %c0_i32_1 = arith.constant 0 : i32
    return %c0_i32, %c0_i32_0 : i32, i32
  }
  func.func @transform_9(%arg0: i32) -> (i32, i32, i32) {
    %c0_i32 = arith.constant 0 : i32
    %c0_i32_0 = arith.constant 0 : i32
    %c0_i32_1 = arith.constant 0 : i32
    return %arg0, %c0_i32, %c0_i32_0 : i32, i32, i32
  }
}

</mosaic_0001>

<bundles_post_ra>
// kernel: tpu_custom_call.1
= control target key start
LH: loop header
LB: loop body
LE: loop exit
PB: predicated region body
PF: predicated region fallthrough
CT: control target
= control target key end

     0   :  { %s6317_s30 = smov 0   ;;  %s8673_s0 = inlined_call_operand.vmem [shape: f32[2,256,32], index: 0, kind: input, shape index: {}]   ;;  %s8674_s1 = inlined_call_operand.vmem [shape: bf16[3,96,32], index: 1, kind: input, shape index: {}]   ;;  %s8675_s2 = inlined_call_operand.vmem [shape: f32[1,32], index: 2, kind: input, shape index: {}]   ;;  %s8676_s3 = inlined_call_operand.vmem [shape: f32[1,32], index: 3, kind: input, shape index: {}]   ;;  %s8677_s4 = inlined_call_operand.vmem [shape: f32[1,32], index: 4, kind: input, shape index: {}]   ;;  %s8678_s5 = inlined_call_operand.vmem [shape: f32[32,8], index: 5, kind: input, shape index: {}]   ;;  %s8679_s6 = inlined_call_operand.vmem [shape: f32[8,32], index: 6, kind: input, shape index: {}]   ;;  %s8680_s7 = inlined_call_operand.vmem [shape: bf16[3,18,96], index: 7, kind: input, shape index: {}]   ;;  %s8681_s8 = inlined_call_operand.vmem [shape: f32[18,1], index: 8, kind: input, shape index: {}]   ;;  %s8682_s9 = inlined_call_operand.vmem [shape: f32[2,18,256], index: 9, kind: output, shape index: {}]  }
   0x1 LB: > { %s5172_s10 = sadd.s32 4294967295, %s6260_s30   ;;  %p5176_p0 = scmp.ge.s32.totalorder %s6260_s30, 1  ;;  %s6260_s30 = sphi %s6317_s30, %s19_s30  }
   0x2   : > { %p287_p1 = scmp.lt.s32.totalorder %s6260_s30, 3 }
   0x4   : > { %p288_p2 = pnand %p5176_p0, %p287_p1 }
   0x6   : > { %291 = sbr.rel (%p288_p2) target bundleno = 1520 (0x5f0), region = 56 }
   0xb   : > { %p323_p3 = scmp.lt.s32.totalorder %s5172_s10, 1  ;;  %v334_v0 = vlaneseq  ;;  %v6132_v1 = vld [vmem:[%s8674_s1 + $0x28] sm:$0xff]   ;;  %v6133_v3 = vld [vmem:[%s8674_s1 + $0x20] sm:$0xff]   ;;  %v6134_v5 = vld [vmem:[%s8674_s1 + $0x18] sm:$0xff]   ;;  %s6262_s21 = smov 32   ;;  %v8761_v27 = vmov 0 }
   0xc   : > { %5916 = vmatprep.subr.bf16.mxu0 %v6132_v1  ;;  %6080 = vmatprep.subr.bf16.mxu1 %v6132_v1  ;;  %v6135_v23 = vld [vmem:[%s8674_s1 + $0x10] sm:$0xff]   ;;  %v8764_v35 = vmov 0  ;;  %s6263_s24 = smov 64   ;;  %v6136_v42 = vld [vmem:[%s8674_s1 + $0x8] sm:$0xff]   ;;  %v8767_v43 = vmov 0  ;;  %v6137_v45 = vld [vmem:[%s8674_s1] sm:$0xff]  }
   0xd   : > { %s9321_s10 = smov (!%p323_p3, %s5172_s10), 1  ;;  %v6330_v2 = vshrl.u32 %v334_v0, 7  ;;  %5917 = vmatpush3.bf16.msra.mxu0 %v6132_v1  ;;  %6086 = vmatpush3.bf16.msra.mxu1 %v6132_v1  ;;  %vm8697_vm8 = vcmask 257024   ;;  %vm751_vm13 = vcmask 781312  }
   0xe   : > { %s5583_s15 = sshll.u32 %s9321_s10, 8  ;;  %5918 = vmatprep.subr.bf16.mxu0 %v6133_v3  ;;  %6081 = vmatprep.subr.bf16.mxu1 %v6133_v3 }
   0xf   : > { %v336_v4 = vadd.s32 8, %v6330_v2  ;;  %s6340_s18 = scalar_lea.vmem %s8673_s0, %s5583_s15  ;;  %v338_v9 = vadd.s32 24, %v6330_v2  ;;  %vm8689_vm0 = vcmp.lt.s32.totalorder %v6330_v2, 7  ;;  %v340_v22 = vadd.s32 40, %v6330_v2  ;;  %s6116_s15 = smul.u32 48, %s9321_s10 }
  0x10   : > { %v6346_v6 = vld [vmem:[%s6340_s18 + $0x18] sm:$0xff]  ;;  %v6349_v7 = vld [vmem:[%s6340_s18] sm:$0xff]  ;;  %v6352_v8 = vld [vmem:[%s6340_s18 + $0x28] sm:$0xff]  ;;  %v354_v51 = vadd.s32 152, %v6330_v2  ;;  %v356_v59 = vadd.s32 168, %v6330_v2  ;;  %v342_v60 = vadd.s32 56, %v6330_v2 }
  0x11   : > { %v5619_v10 = vpack.c.bf16 %v6346_v6, %v6346_v6  ;;  %v5616_v11 = vpack.c.bf16 %v6349_v7, %v6349_v7  ;;  %v6360_v12 = vld [vmem:[%s6340_s18 + $0x8] sm:$0xff]  ;;  %v6363_v13 = vld [vmem:[%s6340_s18 + $0x10] sm:$0xff]  ;;  %v378_v14 = vand.u32 15, %v336_v4  ;;  %v8684_v15 = vrot.slane %v6349_v7, 1  ;;  %v6368_v16 = vld [vmem:[%s6340_s18 + $0x20] sm:$0xff]  ;;  %5919 = vmatpush3.bf16.msra.mxu0 %v6133_v3  ;;  %6087 = vmatpush3.bf16.msra.mxu1 %v6133_v3 }
  0x12   : > { %v5621_v17 = vpack.c.bf16 %v6352_v8, %v6352_v8  ;;  %v1018_v18 = vrot.slane %v6360_v12, 1  ;;  %v5617_v19 = vpack.c.bf16 %v6360_v12, %v6360_v12  ;;  %v1019_v20 = vrot.slane %v6363_v13, 1  ;;  %5920 = vmatprep.subr.bf16.mxu0 %v6134_v5  ;;  %6082 = vmatprep.subr.bf16.mxu1 %v6134_v5  ;;  %v6395_v29 = vld [vmem:[%s6340_s18 + $0x30] sm:$0xff]  ;;  %v6440_v50 = vld [vmem:[%s6340_s18 + $0x98] sm:$0xff]  ;;  %v6444_v52 = vld [vmem:[%s6340_s18 + $0xa0] sm:$0xff] }
  0x13   : > { %1441 = vrot.lane.b32.xlu1 %v5619_v10, %s6262_s21  ;;  %1435 = vrot.lane.b32.xlu0 %v5616_v11, %s6262_s21  ;;  %v392_v21 = vand.u32 15, %v338_v9  ;;  %v1020_v24 = vrot.slane %v6346_v6, 1  ;;  %v1021_v26 = vrot.slane %v6368_v16, 1  ;;  %vm6388_vm1 = vcmp.le.s32.totalorder %v378_v14, 14  ;;  %v6449_v55 = vld [vmem:[%s6340_s18 + $0x90] sm:$0xff] }
  0x14   : > { %v1080_v25 = vsel %vm8689_vm0, %v8684_v15, %v1018_v18  ;;  %v8762_v27 = vsel %vm6388_vm1, 4294967295, %v8761_v27  ;;  %v1079_v28 = vsel %vm8689_vm0, %v1018_v18, %v1019_v20  ;;  %v5618_v30 = vpack.c.bf16 %v6363_v13, %v6363_v13  ;;  %v6476_v11 = vld [vmem:[%s6340_s18 + $0xb0] sm:$0xff]  ;;  %v6482_v18 = vld [vmem:[%s6340_s18 + $0x40] sm:$0xff] }
  0x15   : > { %8763 = vst [vmem:[#allocation4_spill] sm:$0xff] %v8762_v27  ;;  %5921 = vmatpush3.bf16.msra.mxu0 %v6134_v5  ;;  %6088 = vmatpush3.bf16.msra.mxu1 %v6134_v5  ;;  %v5648_v31 = vpack.c.bf16 %v1080_v25, %v1080_v25  ;;  %v1147_v32 = vsel %vm6388_vm1, %v1079_v28, 0.0  ;;  %v406_v33 = vand.u32 15, %v340_v22  ;;  %v1022_v34 = vrot.slane %v6352_v8, 1  ;;  %v6467_v5 = vld [vmem:[%s6340_s18 + $0xa8] sm:$0xff] }
  0x16   : > { %5922 = vmatprep.subr.bf16.mxu0 %v6135_v23  ;;  %6083 = vmatprep.subr.bf16.mxu1 %v6135_v23  ;;  %vm6404_vm2 = vcmp.le.s32.totalorder %v392_v21, 14  ;;  %v1077_v36 = vsel %vm8689_vm0, %v1020_v24, %v1021_v26  ;;  %v1023_v37 = vrot.slane %v6395_v29, 1  ;;  %v5620_v38 = vpack.c.bf16 %v6368_v16, %v6368_v16 }
  0x17   : > { %1445 = vrot.lane.b32.xlu1 %v5621_v17, %s6262_s21  ;;  %1437 = vrot.lane.b32.xlu0 %v5617_v19, %s6262_s21  ;;  %v8765_v35 = vsel %vm6404_vm2, 4294967295, %v8764_v35  ;;  %v5649_v39 = vpack.c.bf16 %v1147_v32, %v1147_v32  ;;  %v1078_v40 = vsel %vm8689_vm0, %v1019_v20, %v1020_v24  ;;  %v1149_v41 = vsel %vm6404_vm2, %v1077_v36, 0.0  ;;  %v6504_v32 = vld [vmem:[%s6340_s18 + $0x50] sm:$0xff] }
  0x18   : > { %8766 = vst [vmem:[#allocation5_spill] sm:$0xff] %v8765_v35  ;;  %vm6422_vm3 = vcmp.le.s32.totalorder %v406_v33, 14  ;;  %v1075_v44 = vsel %vm8689_vm0, %v1022_v34, %v1023_v37  ;;  %v5650_v46 = vpack.c.bf16 %v1078_v40, %v1078_v40  ;;  %v5651_v47 = vpack.c.bf16 %v1149_v41, %v1149_v41 }
  0x19   : > { %5923 = vmatpush3.bf16.msra.mxu0 %v6135_v23  ;;  %6089 = vmatpush3.bf16.msra.mxu1 %v6135_v23  ;;  %v8768_v43 = vsel %vm6422_vm3, 4294967295, %v8767_v43  ;;  %v1076_v48 = vsel %vm8689_vm0, %v1021_v26, %v1022_v34  ;;  %v1151_v49 = vsel %vm6422_vm3, %v1075_v44, 0.0  ;;  %v1036_v56 = vrot.slane %v6440_v50, 1 }
  0x1a   : > { %8769 = vst [vmem:[#allocation6_spill] sm:$0xff] %v8768_v43  ;;  %5924 = vmatprep.subr.bf16.mxu0 %v6136_v42  ;;  %6084 = vmatprep.subr.bf16.mxu1 %v6136_v42  ;;  %v5652_v53 = vpack.c.bf16 %v1076_v48, %v1076_v48  ;;  %v5653_v54 = vpack.c.bf16 %v1151_v49, %v1151_v49  ;;  %v1037_v57 = vrot.slane %v6444_v52, 1  ;;  %v504_v58 = vand.u32 15, %v354_v51  ;;  %v6655_v49 = vld [vmem:[%s6340_s18 + $0xf8] sm:$0xff]  ;;  %v6710_v48 = vld [vmem:[%s6340_s18 + $0x70] sm:$0xff] }
  0x1b   : > { %1439 = vrot.lane.b32.xlu0 %v5618_v30, %s6262_s21  ;;  %1660 = vrot.lane.b32.xlu1 %v5648_v31, %s6263_s24  ;;  %v8683_v61 = vrot.slane %v6449_v55, 1  ;;  %v5634_v62 = vpack.c.bf16 %v6449_v55, %v6449_v55  ;;  %v5635_v63 = vpack.c.bf16 %v6440_v50, %v6440_v50  ;;  %v344_v0 = vadd.s32 72, %v6330_v2  ;;  %v6501_v31 = vld [vmem:[%s6340_s18 + $0x38] sm:$0xff] }
  0x1c   : > { %v827_v1 = vrot.slane %v6346_v6, 7  ;;  %v824_v3 = vrot.slane %v6349_v7, 7  ;;  %v8688_v4 = vrot.slane %v6352_v8, 7  ;;  %vm6469_vm4 = vcmp.le.s32.totalorder %v504_v58, 14 }
  0x1d   : > { %5925 = vmatpush3.bf16.msra.mxu0 %v6136_v42  ;;  %6090 = vmatpush3.bf16.msra.mxu1 %v6136_v42  ;;  %v8770_v9 = vmov 0  ;;  %v1061_v10 = vsel %vm8689_vm0, %v1036_v56, %v1037_v57  ;;  %v825_v14 = vrot.slane %v6360_v12, 7  ;;  %v5636_v17 = vpack.c.bf16 %v6444_v52, %v6444_v52 }
  0x1e   : > { %5926 = vmatprep.subr.bf16.mxu0 %v6137_v45  ;;  %6085 = vmatprep.subr.bf16.mxu1 %v6137_v45  ;;  %v8771_v9 = vsel %vm6469_vm4, 4294967295, %v8770_v9  ;;  %v1038_v19 = vrot.slane %v6467_v5, 1  ;;  %v5637_v20 = vpack.c.bf16 %v6467_v5, %v6467_v5  ;;  %v1062_v21 = vsel %vm8689_vm0, %v8683_v61, %v1036_v56 }
  0x1f   : > { %1443 = vrot.lane.b32.xlu0 %v5620_v38, %s6262_s21  ;;  %1662 = vrot.lane.b32.xlu1 %v5649_v39, %s6263_s24  ;;  %8772 = vst [vmem:[#allocation7_spill] sm:$0xff] %v8771_v9  ;;  %v518_v22 = vand.u32 15, %v356_v59  ;;  %v826_v23 = vrot.slane %v6363_v13, 7  ;;  %v828_v24 = vrot.slane %v6368_v16, 7  ;;  %v1165_v25 = vsel %vm6469_vm4, %v1061_v10, 0.0  ;;  %v6509_v38 = vld [vmem:[%s6340_s18 + $0x48] sm:$0xff] }
  0x20   : > { %v1039_v26 = vrot.slane %v6476_v11, 1  ;;  %v5666_v33 = vpack.c.bf16 %v1062_v21, %v1062_v21  ;;  %v1024_v34 = vrot.slane %v6501_v31, 1  ;;  %v1025_v36 = vrot.slane %v6482_v18, 1  ;;  %v6627_v21 = vld [vmem:[%s6340_s18 + $0x60] sm:$0xff] }
  0x21   : > { %5927 = vmatpush3.bf16.msra.mxu0 %v6137_v45  ;;  %6091 = vmatpush3.bf16.msra.mxu1 %v6137_v45  ;;  %v420_v39 = vand.u32 15, %v342_v60  ;;  %v5667_v40 = vpack.c.bf16 %v1165_v25, %v1165_v25  ;;  %v1060_v41 = vsel %vm8689_vm0, %v1037_v57, %v1038_v19  ;;  %vm6515_vm5 = vcmp.le.s32.totalorder %v518_v22, 14 }
  0x22   : > { %v8773_v42 = vmov 0  ;;  %v1026_v44 = vrot.slane %v6509_v38, 1  ;;  %v1059_v45 = vsel %vm8689_vm0, %v1038_v19, %v1039_v26  ;;  %v5622_v51 = vpack.c.bf16 %v6395_v29, %v6395_v29  ;;  %v6565_v19 = vld [vmem:[%s6340_s18 + $0xb8] sm:$0xff] }
  0x23   : > { %1664 = vrot.lane.b32.xlu0 %v5650_v46, %s6263_s24  ;;  %1666 = vrot.lane.b32.xlu1 %v5651_v47, %s6263_s24  ;;  %v8774_v42 = vsel %vm6515_vm5, 4294967295, %v8773_v42  ;;  %v434_v46 = vand.u32 15, %v344_v0  ;;  %v1027_v47 = vrot.slane %v6504_v32, 1  ;;  %v5668_v56 = vpack.c.bf16 %v1060_v41, %v1060_v41 }
  0x24   : > { %8775 = vst [vmem:[#allocation8_spill] sm:$0xff] %v8774_v42  ;;  %vm6532_vm6 = vcmp.le.s32.totalorder %v420_v39, 14  ;;  %v8776_v57 = vmov 0  ;;  %v1073_v58 = vsel %vm8689_vm0, %v1024_v34, %v1025_v36  ;;  %v1167_v59 = vsel %vm6515_vm5, %v1059_v45, 0.0 }
  0x25   : > { %v8777_v57 = vsel %vm6532_vm6, 4294967295, %v8776_v57  ;;  %v6546_v60 = vsel %vm8689_vm0, %v1023_v37, %v1024_v34  ;;  %v5624_v10 = vpack.c.bf16 %v6482_v18, %v6482_v18  ;;  %vm6556_vm7 = vcmp.le.s32.totalorder %v434_v46, 14  ;;  %v6579_v34 = vld [vmem:[%s6340_s18 + $0xc8] sm:$0xff] }
  0x26   : > { %8778 = vst [vmem:[#allocation9_spill] sm:$0xff] %v8777_v57  ;;  %v1071_v37 = vsel %vm8689_vm0, %v1026_v44, %v1027_v47  ;;  %v5625_v22 = vpack.c.bf16 %v6509_v38, %v6509_v38  ;;  %v6575_v25 = vsel %vm6532_vm6, %v1073_v58, 0.0  ;;  %v5654_v39 = vpack.c.bf16 %v6546_v60, %v6546_v60  ;;  %v7494_v57 = vld [vmem:[%s8675_s2] ss:$0 sm:$0xff] }
  0x27   : > { %1668 = vrot.lane.b32.xlu0 %v5652_v53, %s6263_s24  ;;  %1670 = vrot.lane.b32.xlu1 %v5653_v54, %s6263_s24  ;;  %v5623_v54 = vpack.c.bf16 %v6501_v31, %v6501_v31  ;;  %v1042_v41 = vrot.slane %v6579_v34, 1  ;;  %v360_v58 = vadd.s32 200, %v6330_v2  ;;  %v6615_v53 = vld [vmem:[%s6340_s18 + $0x58] sm:$0xff]  ;;  %vm8690_vm10 = vcmp.lt.s32.totalorder %v6330_v2, 1 }
  0x28   : > { %v1028_v15 = vrot.slane %v6615_v53, 1  ;;  %v8686_v30 = vrot.slane %v6655_v49, 7  ;;  %v8788_v28 = vmov 0  ;;  %v337_v60 = vadd.s32 16, %v6330_v2 }
  0x29   : > { %v353_v6 = vadd.s32 144, %v6330_v2  ;;  %v8792_v16 = vrot.slane %v6449_v55, 7  ;;  %vm8818_vm1 = vcmp.lt.s32.totalorder %v6330_v2, 1  ;;  %vm8864_vm6 = vcmask 257024  }
  0x2a   : > { %vm8820_vm4 = vmmov %vm8818_vm1 }
  0x2b   : > { %1471 = vrot.lane.b32.xlu0 %v5634_v62, %s6262_s21  ;;  %1473 = vrot.lane.b32.xlu1 %v5635_v63, %s6262_s21  ;;  %v6550_v62 = vsel %vm8689_vm0, %v1025_v36, %v1026_v44  ;;  %v358_v63 = vadd.s32 184, %v6330_v2  ;;  %v5669_v36 = vpack.c.bf16 %v1167_v59, %v1167_v59  ;;  %v6590_v44 = vsel %vm6556_vm7, %v1071_v37, 0.0  ;;  %v6602_v37 = vld [vmem:[%s6340_s18 + $0xd0] sm:$0xff]  ;;  %vm8822_vm2 = vmmov %vm8818_vm1 }
  0x2c   : > { %v5655_v59 = vpack.c.bf16 %v6575_v25, %v6575_v25  ;;  %v8791_v12 = vpack.c.bf16 %v6590_v44, %v6590_v44  ;;  %v8801_v44 = vrot.slane %v6444_v52, 7 }
  0x2d   : > { %v532_v46 = vand.u32 15, %v358_v63 }
  0x2f   : > { %1475 = vrot.lane.b32.xlu0 %v5636_v17, %s6262_s21  ;;  %1477 = vrot.lane.b32.xlu1 %v5637_v20, %s6262_s21  ;;  %v8779_v17 = vmov 0  ;;  %v6568_v20 = vld [vmem:[%s6340_s18 + $0xc0] sm:$0xff]  ;;  %vm6631_vm9 = vcmp.le.s32.totalorder %v532_v46, 14  ;;  %v6666_v46 = vsel %vm8689_vm0, %v1027_v47, %v1028_v15  ;;  %v885_v47 = vsel %vm8690_vm10, %v826_v23, %v827_v1 }
  0x30   : > { %v8780_v17 = vsel %vm6556_vm7, 4294967295, %v8779_v17  ;;  %v1041_v45 = vrot.slane %v6568_v20, 1  ;;  %vm8881_vm7 = vcmp.lt.s32.totalorder %v6330_v2, 1 }
  0x31   : > { %8781 = vst [vmem:[#allocation10_spill] sm:$0xff] %v8780_v17 }
  0x32   : > { %v6624_v63 = vsel %vm8689_vm0, %v1041_v45, %v1042_v41 }
  0x33   : > { %1696 = vrot.lane.b32.xlu0 %v5666_v33, %s6263_s24  ;;  %1698 = vrot.lane.b32.xlu1 %v5667_v40, %s6263_s24  ;;  %v1040_v33 = vrot.slane %v6565_v19, 1  ;;  %v5656_v40 = vpack.c.bf16 %v6550_v62, %v6550_v62 }
  0x35   : > { %v6612_v25 = vsel %vm8689_vm0, %v1039_v26, %v1040_v33  ;;  %v8782_v26 = vmov 0  ;;  %v1057_v0 = vsel %vm8689_vm0, %v1040_v33, %v1041_v45  ;;  %v8687_v33 = vrot.slane %v6627_v21, 1 }
  0x36   : > { %v8783_v26 = vsel %vm6631_vm9, 4294967295, %v8782_v26  ;;  %v8785_v45 = vmov 0 }
  0x37   : > { %1447 = vrot.lane.b32.xlu0 %v5622_v51, %s6262_s21  ;;  %1449 = vrot.lane.b32.xlu1 %v5623_v54, %s6262_s21  ;;  %8784 = vst [vmem:[#allocation11_spill] sm:$0xff] %v8783_v26  ;;  %v546_v54 = vand.u32 15, %v360_v58  ;;  %v8685_v51 = vrot.slane %v6602_v37, 1  ;;  %v6652_v58 = vld [vmem:[%s6340_s18 + $0x68] sm:$0xff] }
  0x39   : > { %vm6671_vm11 = vcmp.le.s32.totalorder %v546_v54, 14  ;;  %v346_v54 = vadd.s32 88, %v6330_v2 }
  0x3a   : > { %v8786_v45 = vsel %vm6671_vm11, 4294967295, %v8785_v45 }
  0x3b   : > { %1700 = vrot.lane.b32.xlu0 %v5668_v56, %s6263_s24  ;;  %1702 = vrot.lane.b32.xlu1 %v5669_v36, %s6263_s24  ;;  %v6659_v56 = vsel %vm6631_vm9, %v1057_v0, 0.0  ;;  %8787 = vst [vmem:[#allocation12_spill] sm:$0xff] %v8786_v45  ;;  %v1055_v0 = vsel %vm8689_vm0, %v1042_v41, %v8685_v51  ;;  %v5587_v36 = vpack.c.bf16 %v885_v47, %v885_v47  ;;  %v6713_v41 = vld [vmem:[%s6340_s18 + $0x88] sm:$0xff] }
  0x3c   : > { %v6707_v47 = vsel %vm8689_vm0, %v1028_v15, %v8687_v33  ;;  %v883_v15 = vsel %vm8690_vm10, %v828_v24, %v8688_v4  ;;  %v887_v51 = vsel %vm8690_vm10, %v824_v3, %v825_v14  ;;  %v448_v33 = vand.u32 15, %v346_v54 }
  0x3d   : > { %1310 = vst.msk [vmem:[#allocation2 + $0x14] sm:$0xf] %vm8697_vm8, %v5587_v36  ;;  %v841_v36 = vrot.slane %v6713_v41, 7  ;;  %v5585_v61 = vpack.c.bf16 %v887_v51, %v887_v51  ;;  %v385_v51 = vand.u32 15, %v337_v60  ;;  %v497_v60 = vand.u32 15, %v353_v6 }
  0x3e   : > { %vm6778_vm15 = vcmp.le.s32.totalorder %v448_v33, 14 }
  0x3f   : > { %1451 = vrot.lane.b32.xlu0 %v5624_v10, %s6262_s21  ;;  %1453 = vrot.lane.b32.xlu1 %v5625_v22, %s6262_s21  ;;  %v371_v10 = vand.u32 15, %v6330_v2  ;;  %v6701_v22 = vsel %vm6671_vm11, %v1055_v0, 0.0  ;;  %v888_v0 = vsel %vm8690_vm10, %v8686_v30, %v824_v3  ;;  %v5589_v30 = vpack.c.bf16 %v883_v15, %v883_v15  ;;  %1308 = vst.msk [vmem:[#allocation2 + $0xc] sm:$0xf] %vm8697_vm8, %v5585_v61 }
  0x40   : > { %v339_v3 = vadd.s32 32, %v6330_v2  ;;  %v6264_v61 = vmov 0   ;;  %vm6782_vm0 = vcmp.ge.s32.totalorder %v385_v51, 1  ;;  %vm6821_vm14 = vcmp.ge.s32.totalorder %v497_v60, 1 }
  0x41   : > { %vm6695_vm12 = vcmp.ge.s32.totalorder %v371_v10, 1  ;;  %1312 = vst.msk [vmem:[#allocation2 + $0x1c] sm:$0xf] %vm8697_vm8, %v5589_v30  ;;  %v884_v30 = vsel %vm8690_vm10, %v827_v1, %v828_v24  ;;  %v870_v1 = vsel %vm8690_vm10, %v841_v36, %v8792_v16  ;;  %v8800_v24 = vmov %v8792_v16  ;;  %6130 = vset.pattern.permute.xlu0 %v6264_v61  ;;  %6131 = vset.pattern.permute.xlu1 %v6264_v61 }
  0x42   : > { %v8789_v28 = vsel %vm6695_vm12, 4294967295, %v8788_v28  ;;  %v953_v10 = vsel %vm6695_vm12, %v888_v0, 0.0  ;;  %v886_v0 = vsel %vm8690_vm10, %v825_v14, %v826_v23  ;;  %v399_v13 = vand.u32 15, %v339_v3  ;;  %752 = vst.msk [vmem:[#allocation2] sm:$0xf] %vm751_vm13, %v6264_v61  ;;  %vm8883_vm12 = vmmov %vm8881_vm7 }
  0x43   : > { %8790 = vst [vmem:[#allocation13_spill] sm:$0xff] %v8789_v28  ;;  %1672 = vrot.lane.b32.xlu0 %v5654_v39, %s6263_s24  ;;  %1674 = vrot.lane.b32.xlu1 %v5655_v59, %s6263_s24  ;;  %v5584_v4 = vpack.c.bf16 %v953_v10, %v953_v10  ;;  %v6744_v39 = vadd.s32 104, %v6330_v2  ;;  %v1031_v59 = vrot.slane %v6710_v48, 1  ;;  %753 = vst.msk [vmem:[#allocation2 + $0x4] sm:$0xf] %vm751_vm13, %v6264_v61  ;;  %v8796_v14 = vmov 0 }
  0x44   : > { %754 = vst.msk [vmem:[#allocation2 + $0x88] sm:$0xf] %vm751_vm13, %v6264_v61  ;;  %755 = vst.msk [vmem:[#allocation2 + $0x8c] sm:$0xf] %vm751_vm13, %v6264_v61  ;;  %v8797_v14 = vsel %vm6782_vm0, 4294967295, %v8796_v14  ;;  %v8799_v23 = vrot.slane %v6440_v50, 7 }
  0x45   : > { %1307 = vst.msk [vmem:[#allocation2 + $0x8] sm:$0xf] %vm8697_vm8, %v5584_v4  ;;  %v8793_v4 = vmov 0  ;;  %8798 = vst [vmem:[#allocation15_spill] sm:$0xff] %v8797_v14  ;;  %v955_v15 = vsel %vm6782_vm0, %v886_v0, 0.0  ;;  %v8803_v10 = vmov 0  ;;  %v8808_v0 = vpack.c.bf16 %v6476_v11, %v6476_v11 }
  0x46   : > { %756 = vst.msk [vmem:[#allocation3] sm:$0xf] %vm751_vm13, %v6264_v61  ;;  %757 = vst.msk [vmem:[#allocation3 + $0x4] sm:$0xf] %vm751_vm13, %v6264_v61  ;;  %v8794_v4 = vsel %vm6778_vm15, 4294967295, %v8793_v4  ;;  %v869_v62 = vsel %vm8690_vm10, %v8800_v24, %v8799_v23  ;;  %v8802_v33 = vmov %v8799_v23  ;;  %v5586_v51 = vpack.c.bf16 %v955_v15, %v955_v15  ;;  %v6837_v15 = vld [vmem:[%s6340_s18 + $0xf0] sm:$0xff] }
  0x47   : > { %1676 = vrot.lane.b32.xlu0 %v5656_v40, %s6263_s24  ;;  %1678 = vrot.lane.b32.xlu1 %v8791_v12, %s6263_s24  ;;  %758 = vst.msk [vmem:[#allocation3 + $0x88] sm:$0xf] %vm751_vm13, %v6264_v61  ;;  %759 = vst.msk [vmem:[#allocation3 + $0x8c] sm:$0xf] %vm751_vm13, %v6264_v61  ;;  %v355_v40 = vadd.s32 160, %v6330_v2  ;;  %v868_v54 = vsel %vm8690_vm10, %v8802_v33, %v8801_v44  ;;  %vm6801_vm13 = vcmp.ge.s32.totalorder %v399_v13, 1  ;;  %v8807_v23 = vmov %v8801_v44 }
  0x48   : > { %8795 = vst [vmem:[#allocation14_spill] sm:$0xff] %v8794_v4  ;;  %v8804_v10 = vsel %vm6801_vm13, 4294967295, %v8803_v10  ;;  %v5603_v3 = vpack.c.bf16 %v869_v62, %v869_v62  ;;  %v957_v12 = vsel %vm6801_vm13, %v884_v30, 0.0  ;;  %v8806_v16 = vrot.slane %v6467_v5, 7  ;;  %1309 = vst.msk [vmem:[#allocation2 + $0x10] sm:$0xf] %vm8697_vm8, %v5586_v51 }
  0x49   : > { %8805 = vst [vmem:[#allocation16_spill] sm:$0xff] %v8804_v10  ;;  %v511_v50 = vand.u32 15, %v355_v40  ;;  %v8809_v13 = vpack.c.bf16 %v6565_v19, %v6565_v19  ;;  %v5588_v6 = vpack.c.bf16 %v957_v12, %v957_v12  ;;  %v8810_v30 = vmov 0 }
  0x4a   : > { %v867_v61 = vsel %vm8690_vm10, %v8807_v23, %v8806_v16  ;;  %v8811_v30 = vsel %vm6821_vm14, 4294967295, %v8810_v30  ;;  %1326 = vst.msk [vmem:[#allocation2 + $0x54] sm:$0xf] %vm8697_vm8, %v5603_v3  ;;  %v341_v24 = vadd.s32 48, %v6330_v2  ;;  %v971_v62 = vsel %vm6821_vm14, %v870_v1, 0.0 }
  0x4b   : > { %1479 = vrot.lane.b32.xlu0 %v8808_v0, %s6262_s21  ;;  %1481 = vrot.lane.b32.xlu1 %v8809_v13, %s6262_s21  ;;  %8812 = vst [vmem:[#allocation17_spill] sm:$0xff] %v8811_v30  ;;  %v5605_v52 = vpack.c.bf16 %v867_v61, %v867_v61  ;;  %vm6830_vm10 = vcmp.ge.s32.totalorder %v511_v50, 1  ;;  %v8813_v40 = vmov 0  ;;  %v830_v44 = vrot.slane %v6395_v29, 7  ;;  %1311 = vst.msk [vmem:[#allocation2 + $0x18] sm:$0xf] %vm8697_vm8, %v5588_v6 }
  0x4c   : > { %v8814_v40 = vsel %vm6830_vm10, 4294967295, %v8813_v40  ;;  %v343_v33 = vadd.s32 64, %v6330_v2  ;;  %v5602_v60 = vpack.c.bf16 %v971_v62, %v971_v62  ;;  %v973_v3 = vsel %vm6830_vm10, %v868_v54, 0.0  ;;  %v6138_v50 = vld [vmem:[#allocation2] sm:$0xff]  }
  0x4d   : > { %8815 = vst [vmem:[#allocation18_spill] sm:$0xff] %v8814_v40  ;;  %1328 = vst.msk [vmem:[#allocation2 + $0x5c] sm:$0xf] %vm8697_vm8, %v5605_v52  ;;  %v413_v51 = vand.u32 15, %v341_v24  ;;  %v8816_v1 = vrot.slane %v6482_v18, 7  ;;  %v8817_v12 = vrot.slane %v6501_v31, 7  ;;  %v5604_v16 = vpack.c.bf16 %v973_v3, %v973_v3 }
  0x4e   : > { %v8819_v23 = vrot.slane %v6352_v8, 7  ;;  %v427_v13 = vand.u32 15, %v343_v33  ;;  %v8823_v6 = vpack.c.bf16 %v6568_v20, %v6568_v20  ;;  %v8824_v52 = vpack.c.bf16 %v6579_v34, %v6579_v34  ;;  %1325 = vst.msk [vmem:[#allocation2 + $0x50] sm:$0xf] %vm8697_vm8, %v5602_v60 }
  0x4f   : > { %v880_v29 = vsel %vm8818_vm1, %v8817_v12, %v8816_v1  ;;  %v8821_v0 = vmov %v8817_v12  ;;  %v462_v8 = vand.u32 15, %v6744_v39  ;;  %vm6867_vm1 = vcmp.ge.s32.totalorder %v413_v51, 1  ;;  %1327 = vst.msk [vmem:[#allocation2 + $0x58] sm:$0xf] %vm8697_vm8, %v5604_v16 }
  0x50   : > { %v882_v61 = vsel %vm8820_vm4, %v8819_v23, %v830_v44  ;;  %v881_v54 = vsel %vm8822_vm2, %v830_v44, %v8821_v0  ;;  %1483 = vrot.lane.b32.xlu0 %v8823_v6, %s6262_s21  ;;  %1485 = vrot.lane.b32.xlu1 %v8824_v52, %s6262_s21  ;;  %v8825_v31 = vmov 0  ;;  %v8828_v62 = vrot.slane %v6509_v38, 7  ;;  %v6893_v23 = vld [vmem:[%s6340_s18 + $0xd8] sm:$0xff] }
  0x51   : > { %v8826_v31 = vsel %vm6867_vm1, 4294967295, %v8825_v31  ;;  %v5591_v24 = vpack.c.bf16 %v881_v54, %v881_v54  ;;  %v8829_v44 = vmov %v8816_v1  ;;  %v5673_v3 = vpack.c.bf16 %v6701_v22, %v6701_v22 }
  0x52   : > { %8827 = vst [vmem:[#allocation19_spill] sm:$0xff] %v8826_v31  ;;  %v879_v33 = vsel %vm8822_vm2, %v8829_v44, %v8828_v62  ;;  %vm8830_vm4 = vcmask 785408   ;;  %v959_v60 = vsel %vm6867_vm1, %v882_v61, 0.0  ;;  %vm6883_vm5 = vcmp.ge.s32.totalorder %v427_v13, 1 }
  0x53   : > { %5928 = vmatprep.mubr.msk.bf16.mxu0 %vm8830_vm4, %v6138_v50  ;;  %v8831_v51 = vmov 0  ;;  %v5593_v1 = vpack.c.bf16 %v879_v33, %v879_v33  ;;  %v1047_v18 = vrot.slane %v6837_v15, 1  ;;  %v5590_v12 = vpack.c.bf16 %v959_v60, %v959_v60  ;;  %1314 = vst.msk [vmem:[#allocation2 + $0x24] sm:$0xf] %vm8697_vm8, %v5591_v24 }
  0x54   : > { %v8832_v51 = vsel %vm6883_vm5, 4294967295, %v8831_v51  ;;  %v961_v22 = vsel %vm6883_vm5, %v880_v29, 0.0  ;;  %v1048_v50 = vrot.slane %v6655_v49, 1  ;;  %v357_v61 = vadd.s32 176, %v6330_v2 }
  0x55   : > { %8833 = vst [vmem:[#allocation20_spill] sm:$0xff] %v8832_v51  ;;  %v5592_v16 = vpack.c.bf16 %v961_v22, %v961_v22  ;;  %1316 = vst.msk [vmem:[#allocation2 + $0x2c] sm:$0xf] %vm8697_vm8, %v5593_v1  ;;  %v846_v0 = vrot.slane %v6476_v11, 7  ;;  %v359_v54 = vadd.s32 192, %v6330_v2  ;;  %v8834_v13 = vpack.c.bf16 %v6612_v25, %v6612_v25  ;;  %v6944_v1 = vld [vmem:[%s6340_s18 + $0xe0] sm:$0xff] }
  0x56   : > { %v8835_v29 = vpack.c.bf16 %v6659_v56, %v6659_v56  ;;  %v6910_v6 = vsel %vm6778_vm15, %v6707_v47, 0.0  ;;  %v851_v11 = vrot.slane %v6893_v23, 7  ;;  %1313 = vst.msk [vmem:[#allocation2 + $0x20] sm:$0xf] %vm8697_vm8, %v5590_v12  ;;  %vm8836_vm2 = vcmp.lt.s32.totalorder %v6330_v2, 7  ;;  %vm8882_vm15 = vmmov %vm8881_vm7 }
  0x57   : > { %1704 = vrot.lane.b32.xlu0 %v8834_v13, %s6263_s24  ;;  %v6918_v25 = vsel %vm8836_vm2, %v1047_v18, %v1048_v50  ;;  %v8837_v52 = vrot.slane %v6349_v7, 1  ;;  %vm8838_vm4 = vmmov %vm8836_vm2  ;;  %v8839_v47 = vrot.slane %v6652_v58, 1  ;;  %1315 = vst.msk [vmem:[#allocation2 + $0x28] sm:$0xf] %vm8697_vm8, %v5592_v16  ;;  %v525_v62 = vand.u32 15, %v357_v61 }
  0x58   : > { %1706 = vrot.lane.b32.xlu1 %v8835_v29, %s6263_s24  ;;  %vm8840_vm3 = vmmov %vm8836_vm2  ;;  %v8841_v44 = vrot.slane %v6467_v5, 7  ;;  %vm8842_vm2 = vcmp.lt.s32.totalorder %v6330_v2, 1  ;;  %v8843_v33 = vrot.slane %v6565_v19, 7  ;;  %v539_v22 = vand.u32 15, %v359_v54 }
  0x59   : > { %v6924_v56 = vsel %vm8838_vm4, %v1048_v50, %v8837_v52  ;;  %v6932_v24 = vsel %vm8840_vm3, %v8839_v47, %v1031_v59  ;;  %vm8844_vm4 = vmmov %vm8842_vm2  ;;  %v8845_v50 = vrot.slane %v6568_v20, 7  ;;  %v8848_v5 = vrot.slane %v6579_v34, 7  ;;  %v6960_v52 = vld [vmem:[%s6340_s18 + $0xe8] sm:$0xff] }
  0x5a   : > { %v866_v7 = vsel %vm8842_vm2, %v8841_v44, %v846_v0  ;;  %v865_v60 = vsel %vm8844_vm4, %v846_v0, %v8843_v33  ;;  %v8846_v13 = vmov %v8843_v33  ;;  %vm8847_vm3 = vmmov %vm8842_vm2  ;;  %v852_v0 = vrot.slane %v6944_v1, 7 }
  0x5b   : > { %v5607_v12 = vpack.c.bf16 %v865_v60, %v865_v60  ;;  %v864_v16 = vsel %vm8847_vm3, %v8846_v13, %v8845_v50  ;;  %v8849_v61 = vmov %v8845_v50  ;;  %vm6962_vm4 = vcmp.ge.s32.totalorder %v525_v62, 1  ;;  %vm8860_vm9 = vmmov %vm8842_vm2 }
  0x5c   : > { %v863_v29 = vsel %vm8842_vm2, %v8849_v61, %v8848_v5  ;;  %v8850_v54 = vmov 0  ;;  %v345_v19 = vadd.s32 80, %v6330_v2  ;;  %v8853_v44 = vpack.c.bf16 %v6504_v32, %v6504_v32 }
  0x5d   : > { %v8851_v54 = vsel %vm6962_vm4, 4294967295, %v8850_v54  ;;  %v5609_v47 = vpack.c.bf16 %v863_v29, %v863_v29  ;;  %v8854_v20 = vpack.c.bf16 %v6615_v53, %v6615_v53  ;;  %v853_v33 = vrot.slane %v6960_v52, 7  ;;  %1330 = vst.msk [vmem:[#allocation2 + $0x64] sm:$0xf] %vm8697_vm8, %v5607_v12 }
  0x5e   : > { %8852 = vst [vmem:[#allocation21_spill] sm:$0xff] %v8851_v54  ;;  %1455 = vrot.lane.b32.xlu0 %v8853_v44, %s6262_s21  ;;  %v975_v62 = vsel %vm6962_vm4, %v866_v7, 0.0  ;;  %vm6979_vm3 = vcmp.ge.s32.totalorder %v539_v22, 1  ;;  %v8855_v60 = vmov 0  ;;  %v834_v50 = vrot.slane %v6504_v32, 7 }
  0x5f   : > { %1457 = vrot.lane.b32.xlu1 %v8854_v20, %s6262_s21  ;;  %v8856_v60 = vsel %vm6979_vm3, 4294967295, %v8855_v60  ;;  %v5606_v13 = vpack.c.bf16 %v975_v62, %v975_v62  ;;  %v977_v5 = vsel %vm6979_vm3, %v864_v16, 0.0  ;;  %1332 = vst.msk [vmem:[#allocation2 + $0x6c] sm:$0xf] %vm8697_vm8, %v5609_v47  ;;  %v441_v61 = vand.u32 15, %v345_v19  ;;  %vm8863_vm8 = vmmov %vm8842_vm2 }
  0x60   : > { %8857 = vst [vmem:[#allocation22_spill] sm:$0xff] %v8856_v60  ;;  %v347_v29 = vadd.s32 96, %v6330_v2  ;;  %v5608_v44 = vpack.c.bf16 %v977_v5, %v977_v5  ;;  %v8858_v7 = vrot.slane %v6509_v38, 7  ;;  %v8859_v22 = vrot.slane %v6615_v53, 7 }
  0x61   : > { %v8861_v20 = vrot.slane %v6627_v21, 7  ;;  %1329 = vst.msk [vmem:[#allocation2 + $0x60] sm:$0xf] %vm8864_vm6, %v5606_v13  ;;  %vm7003_vm11 = vcmp.ge.s32.totalorder %v441_v61, 1  ;;  %v8865_v19 = vmov 0  ;;  %v8868_v5 = vrot.slane %v6652_v58, 7 }
  0x62   : > { %v878_v12 = vsel %vm8842_vm2, %v8858_v7, %v834_v50  ;;  %v877_v32 = vsel %vm8860_vm9, %v834_v50, %v8859_v22  ;;  %v8862_v16 = vmov %v8859_v22  ;;  %v8866_v19 = vsel %vm7003_vm11, 4294967295, %v8865_v19  ;;  %vm8870_vm9 = vmmov %vm8842_vm2  ;;  %1331 = vst.msk [vmem:[#allocation2 + $0x68] sm:$0xf] %vm8864_vm6, %v5608_v44 }
  0x63   : > { %v876_v47 = vsel %vm8863_vm8, %v8862_v16, %v8861_v20  ;;  %8867 = vst [vmem:[#allocation23_spill] sm:$0xff] %v8866_v19  ;;  %v5595_v38 = vpack.c.bf16 %v877_v32, %v877_v32  ;;  %v455_v62 = vand.u32 15, %v347_v29  ;;  %v8869_v7 = vmov %v8861_v20  ;;  %1710 = vrot.lane.b32.xlu1 %v5673_v3, %s6263_s24  ;;  %vm8875_vm2 = vmmov %vm8864_vm6 }
  0x64   : > { %v875_v50 = vsel %vm8870_vm9, %v8869_v7, %v8868_v5  ;;  %v8871_v53 = vpack.c.bf16 %v6624_v63, %v6624_v63  ;;  %v963_v13 = vsel %vm7003_vm11, %v878_v12, 0.0  ;;  %v361_v29 = vadd.s32 208, %v6330_v2  ;;  %vm8879_vm6 = vmmov %vm8875_vm2 }
  0x65   : > { %v5597_v61 = vpack.c.bf16 %v875_v50, %v875_v50  ;;  %v850_v22 = vrot.slane %v6602_v37, 7  ;;  %vm7025_vm8 = vcmp.le.s32.totalorder %v462_v8, 14  ;;  %v8872_v32 = vmov 0  ;;  %1318 = vst.msk [vmem:[#allocation2 + $0x34] sm:$0xf] %vm8875_vm2, %v5595_v38 }
  0x66   : > { %1708 = vrot.lane.b32.xlu0 %v8871_v53, %s6263_s24  ;;  %v8873_v32 = vsel %vm7025_vm8, 4294967295, %v8872_v32  ;;  %v5594_v63 = vpack.c.bf16 %v963_v13, %v963_v13  ;;  %vm7030_vm9 = vcmp.ge.s32.totalorder %v455_v62, 1  ;;  %v8876_v3 = vmov 0 }
  0x67   : > { %8874 = vst [vmem:[#allocation24_spill] sm:$0xff] %v8873_v32  ;;  %v8877_v3 = vsel %vm7030_vm9, 4294967295, %v8876_v3  ;;  %v363_v44 = vadd.s32 224, %v6330_v2  ;;  %v965_v12 = vsel %vm7030_vm9, %v876_v47, 0.0  ;;  %1320 = vst.msk [vmem:[#allocation2 + $0x3c] sm:$0xf] %vm8879_vm6, %v5597_v61  ;;  %v861_v16 = vsel %vm8882_vm15, %v850_v22, %v851_v11 }
  0x68   : > { %8878 = vst [vmem:[#allocation25_spill] sm:$0xff] %v8877_v3  ;;  %v553_v20 = vand.u32 15, %v361_v29  ;;  %v8880_v39 = vrot.slane %v6579_v34, 7  ;;  %1317 = vst.msk [vmem:[#allocation2 + $0x30] sm:$0xf] %vm8875_vm2, %v5594_v63  ;;  %v5596_v38 = vpack.c.bf16 %v965_v12, %v965_v12  ;;  %v5611_v62 = vpack.c.bf16 %v861_v16, %v861_v16  ;;  %v7084_v12 = vld [vmem:[%s6340_s18 + $0x78] sm:$0xff] }
  0x69   : > { %v567_v5 = vand.u32 15, %v363_v44  ;;  %v860_v47 = vsel %vm8883_vm12, %v851_v11, %v852_v0  ;;  %v8884_v7 = vpack.c.bf16 %v6627_v21, %v6627_v21  ;;  %v8885_v34 = vpack.c.bf16 %v6652_v58, %v6652_v58  ;;  %vm8892_vm6 = vmmov %vm8875_vm2  ;;  %v7094_v16 = vld [vmem:[%s8674_s1 + $0x88] sm:$0xff]  }
  0x6a   : > { %v862_v8 = vsel %vm8881_vm7, %v8880_v39, %v850_v22  ;;  %v5659_v50 = vpack.c.bf16 %v6910_v6, %v6910_v6  ;;  %v8886_v53 = vrot.slane %v6652_v58, 1  ;;  %v8887_v13 = vrot.slane %v6627_v21, 1  ;;  %1319 = vst.msk [vmem:[#allocation2 + $0x38] sm:$0xf] %vm8892_vm6, %v5596_v38  ;;  %vm8898_vm6 = vmmov %vm8875_vm2  ;;  %6004 = vmatprep.subr.bf16.mxu0 %v7094_v16 }
  0x6b   : > { %1459 = vrot.lane.b32.xlu0 %v8884_v7, %s6262_s21  ;;  %1461 = vrot.lane.b32.xlu1 %v8885_v34, %s6262_s21  ;;  %vm8888_vm7 = vcmp.lt.s32.totalorder %v6330_v2, 7  ;;  %vm7063_vm12 = vcmp.ge.s32.totalorder %v553_v20, 1  ;;  %v8889_v61 = vmov 0  ;;  %v859_v29 = vsel %vm8882_vm15, %v852_v0, %v853_v33  ;;  %1334 = vst.msk [vmem:[#allocation2 + $0x74] sm:$0xf] %vm8875_vm2, %v5611_v62  ;;  %vm8896_vm15 = vmmov %vm8875_vm2 }
  0x6c   : > { %v1068_v11 = vsel %vm8888_vm7, %v8887_v13, %v8886_v53  ;;  %v8890_v61 = vsel %vm7063_vm12, 4294967295, %v8889_v61  ;;  %v1159_v6 = vsel %vm7025_vm8, %v6932_v24, 0.0  ;;  %v979_v21 = vsel %vm7063_vm12, %v862_v8, 0.0 }
  0x6d   : > { %8891 = vst [vmem:[#allocation26_spill] sm:$0xff] %v8890_v61  ;;  %vm7078_vm7 = vcmp.ge.s32.totalorder %v567_v5, 1  ;;  %v8893_v22 = vmov 0  ;;  %v5613_v63 = vpack.c.bf16 %v859_v29, %v859_v29  ;;  %v362_v44 = vadd.s32 216, %v6330_v2 }
  0x6e   : > { %v8894_v22 = vsel %vm7078_vm7, 4294967295, %v8893_v22  ;;  %v5610_v0 = vpack.c.bf16 %v979_v21, %v979_v21  ;;  %v981_v24 = vsel %vm7078_vm7, %v860_v47, 0.0  ;;  %v349_v20 = vadd.s32 112, %v6330_v2 }
  0x6f   : > { %8895 = vst [vmem:[#allocation27_spill] sm:$0xff] %v8894_v22  ;;  %v839_v39 = vrot.slane %v7084_v12, 7  ;;  %v5612_v8 = vpack.c.bf16 %v981_v24, %v981_v24  ;;  %1336 = vst.msk [vmem:[#allocation2 + $0x7c] sm:$0xf] %vm8896_vm15, %v5613_v63  ;;  %v8897_v38 = vpack.c.bf16 %v6666_v46, %v6666_v46  ;;  %1682 = vrot.lane.b32.xlu1 %v5659_v50, %s6263_s24  ;;  %v838_v7 = vrot.slane %v6710_v48, 7  ;;  %v7110_v50 = vld [vmem:[%s8674_s1 + $0x58] sm:$0xff]  }
  0x70   : > { %v5660_v62 = vpack.c.bf16 %v1068_v11, %v1068_v11  ;;  %v5661_v5 = vpack.c.bf16 %v1159_v6, %v1159_v6  ;;  %1333 = vst.msk [vmem:[#allocation2 + $0x70] sm:$0xf] %vm8898_vm6, %v5610_v0  ;;  %v469_v47 = vand.u32 15, %v349_v20  ;;  %v1044_v34 = vrot.slane %v6893_v23, 1  ;;  %v7133_v20 = vld [vmem:[%s6340_s18 + $0x80] sm:$0xff]  ;;  %5960 = vmatprep.subr.bf16.mxu1 %v7110_v50 }
  0x71   : > { %1680 = vrot.lane.b32.xlu0 %v8897_v38, %s6263_s24  ;;  %v1045_v53 = vrot.slane %v6944_v1, 1  ;;  %1335 = vst.msk [vmem:[#allocation2 + $0x78] sm:$0xf] %vm8875_vm2, %v5612_v8  ;;  %v560_v46 = vand.u32 15, %v362_v44  ;;  %v8899_v13 = vmov 0  ;;  %v8902_v11 = vrot.slane %v6652_v58, 7 }
  0x72   : > { %vm7112_vm15 = vcmp.ge.s32.totalorder %v469_v47, 1  ;;  %vm8903_vm6 = vcmp.lt.s32.totalorder %v6330_v2, 1  ;;  %v5642_v6 = vpack.c.bf16 %v6602_v37, %v6602_v37  ;;  %v5643_v44 = vpack.c.bf16 %v6893_v23, %v6893_v23 }
  0x73   : > { %v8900_v13 = vsel %vm7112_vm15, 4294967295, %v8899_v13  ;;  %v874_v29 = vsel %vm8903_vm6, %v8902_v11, %v838_v7  ;;  %vm8904_vm2 = vmmov %vm8903_vm6  ;;  %1686 = vrot.lane.b32.xlu1 %v5661_v5, %s6263_s24  ;;  %vm8905_vm6 = vcmp.lt.s32.totalorder %v6330_v2, 7  ;;  %v8906_v8 = vmov 0 }
  0x74   : > { %8901 = vst [vmem:[#allocation28_spill] sm:$0xff] %v8900_v13  ;;  %v967_v21 = vsel %vm7112_vm15, %v874_v29, 0.0  ;;  %v873_v63 = vsel %vm8904_vm2, %v838_v7, %v839_v39  ;;  %v1053_v24 = vsel %vm8905_vm6, %v1044_v34, %v1045_v53  ;;  %vm7136_vm15 = vcmp.le.s32.totalorder %v560_v46, 14 }
  0x75   : > { %1684 = vrot.lane.b32.xlu0 %v5660_v62, %s6263_s24  ;;  %v5598_v58 = vpack.c.bf16 %v967_v21, %v967_v21  ;;  %v5599_v0 = vpack.c.bf16 %v873_v63, %v873_v63  ;;  %v8907_v8 = vsel %vm7136_vm15, 4294967295, %v8906_v8  ;;  %v364_v38 = vadd.s32 232, %v6330_v2 }
  0x76   : > { %8908 = vst [vmem:[#allocation29_spill] sm:$0xff] %v8907_v8  ;;  %v840_v62 = vrot.slane %v7133_v20, 7  ;;  %vm8909_vm2 = vcmask 257024   ;;  %v351_v23 = vadd.s32 128, %v6330_v2  ;;  %v5644_v5 = vpack.c.bf16 %v6944_v1, %v6944_v1 }
  0x77   : > { %1321 = vst.msk [vmem:[#allocation2 + $0x40] sm:$0xf] %vm8909_vm2, %v5598_v58  ;;  %vm8910_vm14 = vmmov %vm8909_vm2  ;;  %1489 = vrot.lane.b32.xlu1 %v5643_v44, %s6262_s21  ;;  %v5645_v47 = vpack.c.bf16 %v6960_v52, %v6960_v52  ;;  %v8911_v7 = vrot.slane %v6602_v37, 1  ;;  %v1173_v29 = vsel %vm7136_vm15, %v1053_v24, 0.0  ;;  %v1046_v21 = vrot.slane %v6960_v52, 1 }
  0x78   : > { %1322 = vst.msk [vmem:[#allocation2 + $0x44] sm:$0xf] %vm8910_vm14, %v5599_v0  ;;  %v483_v11 = vand.u32 15, %v351_v23  ;;  %v8912_v63 = vmov 0  ;;  %vm8915_vm2 = vcmp.lt.s32.totalorder %v6330_v2, 1  ;;  %v5675_v58 = vpack.c.bf16 %v1173_v29, %v1173_v29 }
  0x79   : > { %1487 = vrot.lane.b32.xlu0 %v5642_v6, %s6262_s21  ;;  %v1054_v46 = vsel %vm8905_vm6, %v8911_v7, %v1044_v34  ;;  %v574_v6 = vand.u32 15, %v364_v38  ;;  %v872_v1 = vsel %vm8915_vm2, %v839_v39, %v840_v62  ;;  %vm8916_vm6 = vmmov %vm8915_vm2  ;;  %v8917_v38 = vmov 0 }
  0x7a   : > { %vm7158_vm14 = vcmp.ge.s32.totalorder %v483_v11, 1  ;;  %v5674_v44 = vpack.c.bf16 %v1054_v46, %v1054_v46  ;;  %v871_v34 = vsel %vm8916_vm6, %v840_v62, %v841_v36  ;;  %vm8920_vm2 = vcmp.lt.s32.totalorder %v6330_v2, 7 }
  0x7b   : > { %v8913_v63 = vsel %vm7158_vm14, 4294967295, %v8912_v63  ;;  %v969_v37 = vsel %vm7158_vm14, %v872_v1, 0.0  ;;  %1493 = vrot.lane.b32.xlu1 %v5645_v47, %s6262_s21  ;;  %v5601_v24 = vpack.c.bf16 %v871_v34, %v871_v34  ;;  %vm7172_vm15 = vcmp.le.s32.totalorder %v574_v6, 14  ;;  %vm8923_vm0 = vmmov %vm8920_vm2 }
  0x7c   : > { %8914 = vst [vmem:[#allocation30_spill] sm:$0xff] %v8913_v63  ;;  %v5600_v0 = vpack.c.bf16 %v969_v37, %v969_v37  ;;  %v8918_v38 = vsel %vm7172_vm15, 4294967295, %v8917_v38  ;;  %v1051_v39 = vsel %vm8920_vm2, %v1046_v21, %v1047_v18  ;;  %v350_v23 = vadd.s32 120, %v6330_v2  ;;  %vm8927_vm2 = vmmov %vm8923_vm0 }
  0x7d   : > { %1491 = vrot.lane.b32.xlu0 %v5644_v5, %s6262_s21  ;;  %8919 = vst [vmem:[#allocation31_spill] sm:$0xff] %v8918_v38  ;;  %vm8921_vm14 = vcmask 257024   ;;  %v5630_v36 = vpack.c.bf16 %v6710_v48, %v6710_v48  ;;  %v5631_v62 = vpack.c.bf16 %v7084_v12, %v7084_v12  ;;  %v1052_v5 = vsel %vm8923_vm0, %v1045_v53, %v1046_v21 }
  0x7e   : > { %1323 = vst.msk [vmem:[#allocation2 + $0x48] sm:$0xf] %vm8921_vm14, %v5600_v0  ;;  %vm8922_vm6 = vmmov %vm8921_vm14  ;;  %v1175_v18 = vsel %vm7172_vm15, %v1051_v39, 0.0  ;;  %v1032_v47 = vrot.slane %v7084_v12, 1  ;;  %v1033_v7 = vrot.slane %v7133_v20, 1  ;;  %v476_v46 = vand.u32 15, %v350_v23 }
  0x7f   : > { %1324 = vst.msk [vmem:[#allocation2 + $0x4c] sm:$0xf] %vm8922_vm6, %v5601_v24  ;;  %1714 = vrot.lane.b32.xlu1 %v5675_v58, %s6263_s24  ;;  %v352_v11 = vadd.s32 136, %v6330_v2  ;;  %v5676_v29 = vpack.c.bf16 %v1052_v5, %v1052_v5  ;;  %v5677_v6 = vpack.c.bf16 %v1175_v18, %v1175_v18  ;;  %v1034_v1 = vrot.slane %v6713_v41, 1 }
  0x80   : > { %vm7199_vm14 = vcmp.le.s32.totalorder %v476_v46, 14  ;;  %v8924_v53 = vmov 0  ;;  %v1065_v12 = vsel %vm8923_vm0, %v1032_v47, %v1033_v7  ;;  %v5633_v37 = vpack.c.bf16 %v6713_v41, %v6713_v41 }
  0x81   : > { %1712 = vrot.lane.b32.xlu0 %v5674_v44, %s6263_s24  ;;  %v8925_v53 = vsel %vm7199_vm14, 4294967295, %v8924_v53  ;;  %v490_v21 = vand.u32 15, %v352_v11  ;;  %v5632_v44 = vpack.c.bf16 %v7133_v20, %v7133_v20  ;;  %v1066_v34 = vsel %vm8927_vm2, %v1031_v59, %v1032_v47  ;;  %vm8932_vm2 = vmmov %vm8923_vm0 }
  0x82   : > { %8926 = vst [vmem:[#allocation32_spill] sm:$0xff] %v8925_v53  ;;  %v1161_v58 = vsel %vm7199_vm14, %v1065_v12, 0.0  ;;  %v8928_v0 = vmov 0  ;;  %v8931_v24 = vrot.slane %v6449_v55, 1  ;;  %v366_v39 = vadd.s32 248, %v6330_v2 }
  0x83   : > { %1465 = vrot.lane.b32.xlu1 %v5631_v62, %s6262_s21  ;;  %vm7217_vm6 = vcmp.le.s32.totalorder %v490_v21, 14  ;;  %v5662_v48 = vpack.c.bf16 %v1066_v34, %v1066_v34  ;;  %v5663_v41 = vpack.c.bf16 %v1161_v58, %v1161_v58  ;;  %v1064_v59 = vsel %vm8932_vm2, %v1033_v7, %v1034_v1 }
  0x84   : > { %v8929_v0 = vsel %vm7217_vm6, 4294967295, %v8928_v0  ;;  %v1063_v20 = vsel %vm8923_vm0, %v1034_v1, %v8931_v24  ;;  %vm8709_vm0 = vcmask 519424   ;;  %v5664_v55 = vpack.c.bf16 %v1064_v59, %v1064_v59 }
  0x85   : > { %1463 = vrot.lane.b32.xlu0 %v5630_v36, %s6262_s21  ;;  %8930 = vst [vmem:[#allocation33_spill] sm:$0xff] %v8929_v0  ;;  %v1163_v23 = vsel %vm7217_vm6, %v1063_v20, 0.0  ;;  %v588_v36 = vand.u32 15, %v366_v39  ;;  %v1442_v5 = vpop.permute.xlu1 %1441  ;;  %v1436_v18 = vpop.permute.xlu0 %1435  ;;  %v8933_v47 = vmov 0  ;;  %v5646_v7 = vpack.c.bf16 %v6837_v15, %v6837_v15 }
  0x86   : > { %v5665_v62 = vpack.c.bf16 %v1163_v23, %v1163_v23  ;;  %1535 = vst.msk [vmem:[#allocation2 + $0x14] sm:$0xf] %vm8709_vm0, %v1442_v5  ;;  %1532 = vst.msk [vmem:[#allocation2 + $0x8] sm:$0xf] %vm8709_vm0, %v1436_v18  ;;  %v5647_v46 = vpack.c.bf16 %v6655_v49, %v6655_v49  ;;  %vm8713_vm2 = vcmask 781824   ;;  %v5678_v1 = vpack.c.bf16 %v6918_v25, %v6918_v25  ;;  %v6152_v25 = vld [vmem:[%s8674_s1 + $0x80] sm:$0xff]  }
  0x87   : > { %1718 = vrot.lane.b32.xlu1 %v5677_v6, %s6263_s24  ;;  %vm7234_vm14 = vcmp.le.s32.totalorder %v588_v36, 14  ;;  %v6158_v36 = vld [vmem:[%s8674_s1 + $0x70] sm:$0xff]  }
  0x88   : > { %v8934_v47 = vsel %vm7234_vm14, 4294967295, %v8933_v47  ;;  %v1177_v11 = vsel %vm7234_vm14, %v6924_v56, 0.0  ;;  %vm8937_vm14 = vcmask 519424  }
  0x89   : > { %1716 = vrot.lane.b32.xlu0 %v5676_v29, %s6263_s24  ;;  %8935 = vst [vmem:[#allocation34_spill] sm:$0xff] %v8934_v47  ;;  %v1446_v29 = vpop.permute.xlu1 %1445  ;;  %v1438_v6 = vpop.permute.xlu0 %1437  ;;  %v5679_v12 = vpack.c.bf16 %v1177_v11, %v1177_v11  ;;  %vm8938_vm6 = vmmov %vm8937_vm14  ;;  %v854_v11 = vrot.slane %v6837_v15, 7  ;;  %v8949_v15 = vmov 0 }
  0x8a   : > { %1537 = vst.msk [vmem:[#allocation2 + $0x1c] sm:$0xf] %vm8709_vm0, %v1446_v29  ;;  %1533 = vst.msk [vmem:[#allocation2 + $0xc] sm:$0xf] %vm8709_vm0, %v1438_v6 }
  0x8b   : > { %1469 = vrot.lane.b32.xlu1 %v5633_v37, %s6262_s21 }
  0x8d   : > { %1467 = vrot.lane.b32.xlu0 %v5632_v44, %s6262_s21  ;;  %v1440_v21 = vpop.permute.xlu0 %1439  ;;  %v1661_v44 = vpop.permute.xlu1 %1660 }
  0x8e   : > { %1534 = vst.msk [vmem:[#allocation2 + $0x10] sm:$0xf] %vm8709_vm0, %v1440_v21 }
  0x8f   : > { %1690 = vrot.lane.b32.xlu1 %v5663_v41, %s6263_s24  ;;  %1757 = vst.msk [vmem:[#allocation2 + $0x8] sm:$0xf] %vm8713_vm2, %v1661_v44  ;;  %v8946_v44 = vrot.slane %v6655_v49, 7 }
  0x91   : > { %1688 = vrot.lane.b32.xlu0 %v5662_v48, %s6263_s24  ;;  %v1444_v56 = vpop.permute.xlu0 %1443  ;;  %v1663_v37 = vpop.permute.xlu1 %1662  ;;  %v6156_v48 = vld [vmem:[%s8674_s1 + $0x78] sm:$0xff]  }
  0x92   : > { %1536 = vst.msk [vmem:[#allocation2 + $0x18] sm:$0xf] %vm8709_vm0, %v1444_v56  ;;  %vm8936_vm0 = vcmask 785408  }
  0x93   : > { %1694 = vrot.lane.b32.xlu1 %v5665_v62, %s6263_s24  ;;  %1758 = vst.msk [vmem:[#allocation2 + $0xc] sm:$0xf] %vm8713_vm2, %v1663_v37  ;;  %vm8939_vm10 = vmmov %vm8936_vm0 }
  0x94   : > { %vm8942_vm13 = vmmov %vm8939_vm10 }
  0x95   : > { %1692 = vrot.lane.b32.xlu0 %v5664_v55, %s6263_s24  ;;  %v1665_v34 = vpop.permute.xlu0 %1664  ;;  %v1667_v58 = vpop.permute.xlu1 %1666 }
  0x96   : > { %1759 = vst.msk [vmem:[#allocation2 + $0x10] sm:$0xf] %vm8713_vm2, %v1665_v34  ;;  %1760 = vst.msk [vmem:[#allocation2 + $0x14] sm:$0xf] %vm8713_vm2, %v1667_v58 }
  0x97   : > { %1497 = vrot.lane.b32.xlu1 %v5647_v46, %s6262_s21  ;;  %v365_v46 = vadd.s32 240, %v6330_v2 }
  0x99   : > { %1495 = vrot.lane.b32.xlu0 %v5646_v7, %s6262_s21  ;;  %v1669_v24 = vpop.permute.xlu0 %1668  ;;  %v1671_v20 = vpop.permute.xlu1 %1670  ;;  %v6163_v7 = vld [vmem:[%s8674_s1 + $0x68] sm:$0xff]   ;;  %v581_v29 = vand.u32 15, %v365_v46 }
  0x9a   : > { %v6139_v39 = vld [vmem:[#allocation2 + $0x8] sm:$0xff]   ;;  %1761 = vst.msk [vmem:[#allocation2 + $0x18] sm:$0xf] %vm8713_vm2, %v1669_v24  ;;  %1762 = vst.msk [vmem:[#allocation2 + $0x1c] sm:$0xf] %vm8713_vm2, %v1671_v20  ;;  %v6153_v20 = vld [vmem:[%s8674_s1 + $0x50] sm:$0xff]  }
  0x9b   : > { %1722 = vrot.lane.b32.xlu1 %v5679_v12, %s6263_s24  ;;  %5929 = vmatmul.mubr.msk.bf16.vlgmr.msra.gmra.mxu0 %vm8936_vm0, %v6139_v39  ;;  %vm8940_vm0 = vmmov %vm8938_vm6  ;;  %v6168_v12 = vld [vmem:[%s8674_s1 + $0x60] sm:$0xff]  }
  0x9c   : > { %6005 = vmatpush3.bf16.msra.mxu0 %v7094_v16  ;;  %vm8941_vm2 = vmmov %vm8940_vm0 }
  0x9d   : > { %1720 = vrot.lane.b32.xlu0 %v5678_v1, %s6263_s24  ;;  %v1472_v41 = vpop.permute.xlu0 %1471  ;;  %v1474_v59 = vpop.permute.xlu1 %1473  ;;  %v6140_v23 = vld [vmem:[#allocation2 + $0x10] sm:$0xff]   ;;  %6006 = vmatprep.subr.bf16.mxu0 %v6152_v25 }
  0x9e   : > { %1550 = vst.msk [vmem:[#allocation2 + $0x50] sm:$0xf] %vm8937_vm14, %v1472_v41  ;;  %5932 = vmatprep.mubr.msk.bf16.mxu0 %vm8939_vm10, %v6140_v23  ;;  %vm8943_vm10 = vcmask 781824  }
  0x9f   : > { %1551 = vst.msk [vmem:[#allocation2 + $0x54] sm:$0xf] %vm8938_vm6, %v1474_v59  ;;  %vm8944_vm14 = vmmov %vm8943_vm10 }
  0xa0   : > { %6007 = vmatpush3.bf16.msra.mxu0 %v6152_v25 }
  0xa1   : > { %v1476_v16 = vpop.permute.xlu0 %1475  ;;  %v1478_v55 = vpop.permute.xlu1 %1477  ;;  %v6141_v62 = vld [vmem:[#allocation2 + $0x18] sm:$0xff]   ;;  %6008 = vmatprep.subr.bf16.mxu0 %v6156_v48 }
  0xa2   : > { %1552 = vst.msk [vmem:[#allocation2 + $0x58] sm:$0xf] %vm8940_vm0, %v1476_v16  ;;  %v6157_v16 = vld [vmem:[%s8674_s1 + $0x40] sm:$0xff]  }
  0xa3   : > { %1553 = vst.msk [vmem:[#allocation2 + $0x5c] sm:$0xf] %vm8941_vm2, %v1478_v55  ;;  %5933 = vmatmul.mubr.msk.bf16.gmra.mxu0 %vm8942_vm13, %v6141_v62  ;;  %vm8945_vm13 = vcmp.lt.s32.totalorder %v6330_v2, 1  ;;  %vm8948_vm2 = vmmov %vm8940_vm0 }
  0xa4   : > { %6009 = vmatpush3.bf16.msra.mxu0 %v6156_v48  ;;  %v858_v21 = vsel %vm8945_vm13, %v853_v33, %v854_v11  ;;  %vm8947_vm6 = vmmov %vm8945_vm13  ;;  %vm8953_vm13 = vcmask 781824  }
  0xa5   : > { %v1697_v5 = vpop.permute.xlu0 %1696  ;;  %v1699_v18 = vpop.permute.xlu1 %1698  ;;  %6010 = vmatprep.subr.bf16.mxu0 %v6158_v36  ;;  %v857_v56 = vsel %vm8947_vm6, %v854_v11, %v8946_v44  ;;  %vm8954_vm6 = vmmov %vm8953_vm13 }
  0xa6   : > { %1775 = vst.msk [vmem:[#allocation2 + $0x50] sm:$0xf] %vm8943_vm10, %v1697_v5  ;;  %vm7302_vm10 = vcmp.ge.s32.totalorder %v581_v29, 1  ;;  %v5615_v37 = vpack.c.bf16 %v857_v56, %v857_v56 }
  0xa7   : > { %1776 = vst.msk [vmem:[#allocation2 + $0x54] sm:$0xf] %vm8944_vm14, %v1699_v18  ;;  %v8950_v15 = vsel %vm7302_vm10, 4294967295, %v8949_v15  ;;  %v983_v52 = vsel %vm7302_vm10, %v858_v21, 0.0  ;;  %vm8952_vm14 = vcmask 257024   ;;  %vm8957_vm10 = vcmask 519424  }
  0xa8   : > { %6011 = vmatpush3.bf16.msra.mxu0 %v6158_v36  ;;  %8951 = vst [vmem:[#allocation35_spill] sm:$0xff] %v8950_v15  ;;  %v5614_v34 = vpack.c.bf16 %v983_v52, %v983_v52  ;;  %1338 = vst.msk [vmem:[#allocation2 + $0x84] sm:$0xf] %vm8952_vm14, %v5615_v37  ;;  %v6155_v36 = vld [vmem:[%s8674_s1 + $0x48] sm:$0xff]  }
  0xa9   : > { %v1448_v6 = vpop.permute.xlu0 %1447  ;;  %v1450_v1 = vpop.permute.xlu1 %1449  ;;  %6012 = vmatprep.subr.bf16.mxu0 %v6163_v7  ;;  %vm8958_vm4 = vmmov %vm8957_vm10 }
  0xaa   : > { %1538 = vst.msk [vmem:[#allocation2 + $0x20] sm:$0xf] %vm8948_vm2, %v1448_v6  ;;  %vm8955_vm2 = vmmov %vm8952_vm14  ;;  %v6162_v6 = vld [vmem:[%s8674_s1 + $0x30] sm:$0xff]  }
  0xab   : > { %1539 = vst.msk [vmem:[#allocation2 + $0x24] sm:$0xf] %vm8940_vm0, %v1450_v1  ;;  %vm8956_vm0 = vcmask 785408   ;;  %vm8959_vm14 = vmmov %vm8954_vm6 }
  0xac   : > { %6013 = vmatpush3.bf16.msra.mxu0 %v6163_v7  ;;  %1337 = vst.msk [vmem:[#allocation2 + $0x80] sm:$0xf] %vm8955_vm2, %v5614_v34  ;;  %vm8964_vm2 = vcmask 519424  }
  0xad   : > { %v1701_v49 = vpop.permute.xlu0 %1700  ;;  %v1703_v33 = vpop.permute.xlu1 %1702  ;;  %6014 = vmatprep.subr.bf16.mxu0 %v6168_v12 }
  0xae   : > { %v6142_v58 = vld [vmem:[#allocation2 + $0x50] sm:$0xff]   ;;  %1777 = vst.msk [vmem:[#allocation2 + $0x58] sm:$0xf] %vm8953_vm13, %v1701_v49  ;;  %vm8960_vm13 = vmmov %vm8954_vm6 }
  0xaf   : > { %1778 = vst.msk [vmem:[#allocation2 + $0x5c] sm:$0xf] %vm8954_vm6, %v1703_v33  ;;  %5948 = vmatprep.mubr.msk.bf16.mxu1 %vm8956_vm0, %v6142_v58  ;;  %vm8961_vm6 = vmmov %vm8956_vm0 }
  0xb0   : > { %6015 = vmatpush3.bf16.msra.mxu0 %v6168_v12  ;;  %vm8965_vm0 = vmmov %vm8964_vm2 }
  0xb1   : > { %v1452_v25 = vpop.permute.xlu0 %1451  ;;  %v1454_v24 = vpop.permute.xlu1 %1453 }
  0xb2   : > { %1540 = vst.msk [vmem:[#allocation2 + $0x28] sm:$0xf] %vm8957_vm10, %v1452_v25 }
  0xb3   : > { %1541 = vst.msk [vmem:[#allocation2 + $0x2c] sm:$0xf] %vm8958_vm4, %v1454_v24  ;;  %vm8962_vm4 = vmmov %vm8960_vm13 }
  0xb4   : > { %vm8963_vm10 = vmmov %vm8962_vm4 }
  0xb5   : > { %v1673_v39 = vpop.permute.xlu0 %1672  ;;  %v1675_v48 = vpop.permute.xlu1 %1674 }
  0xb6   : > { %v6143_v41 = vld [vmem:[#allocation2 + $0x58] sm:$0xff]   ;;  %1763 = vst.msk [vmem:[#allocation2 + $0x20] sm:$0xf] %vm8959_vm14, %v1673_v39  ;;  %vm8966_vm14 = vmmov %vm8961_vm6 }
  0xb7   : > { %1764 = vst.msk [vmem:[#allocation2 + $0x24] sm:$0xf] %vm8960_vm13, %v1675_v48  ;;  %5949 = vmatmul.mubr.msk.bf16.vlgmr.msra.gmra.mxu1 %vm8961_vm6, %v6143_v41  ;;  %vm8967_vm13 = vmmov %vm8965_vm0 }
  0xb8   : > { %5961 = vmatpush3.bf16.msra.mxu1 %v7110_v50  ;;  %v6160_v50 = vld [vmem:[%s8674_s1 + $0x38] sm:$0xff]   ;;  %vm8968_vm6 = vmmov %vm8965_vm0 }
  0xb9   : > { %v1677_v59 = vpop.permute.xlu0 %1676  ;;  %v1679_v23 = vpop.permute.xlu1 %1678  ;;  %5962 = vmatprep.subr.bf16.mxu1 %v6153_v20 }
  0xba   : > { %1765 = vst.msk [vmem:[#allocation2 + $0x28] sm:$0xf] %vm8962_vm4, %v1677_v59  ;;  %vm8969_vm4 = vmmov %vm8966_vm14 }
  0xbb   : > { %1766 = vst.msk [vmem:[#allocation2 + $0x2c] sm:$0xf] %vm8963_vm10, %v1679_v23  ;;  %vm8978_vm1 = vmmov %vm8969_vm4 }
  0xbc   : > { %5963 = vmatpush3.bf16.msra.mxu1 %v6153_v20 }
  0xbd   : > { %v1480_v55 = vpop.permute.xlu0 %1479  ;;  %v1482_v62 = vpop.permute.xlu1 %1481  ;;  %5964 = vmatprep.subr.bf16.mxu1 %v6155_v36 }
  0xbe   : > { %v6144_v5 = vld [vmem:[#allocation2 + $0x20] sm:$0xff]   ;;  %1554 = vst.msk [vmem:[#allocation2 + $0x60] sm:$0xf] %vm8964_vm2, %v1480_v55  ;;  %vm8970_vm2 = vmmov %vm8963_vm10 }
  0xbf   : > { %1555 = vst.msk [vmem:[#allocation2 + $0x64] sm:$0xf] %vm8965_vm0, %v1482_v62  ;;  %5936 = vmatprep.mubr.msk.bf16.mxu0 %vm8966_vm14, %v6144_v5  ;;  %vm8971_vm14 = vmmov %vm8965_vm0 }
  0xc0   : > { %5965 = vmatpush3.bf16.msra.mxu1 %v6155_v36 }
  0xc1   : > { %5966 = vmatprep.subr.bf16.mxu1 %v6157_v16 }
  0xc2   : > { %v1484_v18 = vpop.permute.xlu0 %1483  ;;  %v1486_v7 = vpop.permute.xlu1 %1485  ;;  %v6145_v46 = vld [vmem:[#allocation2 + $0x28] sm:$0xff]  }
  0xc3   : > { %1556 = vst.msk [vmem:[#allocation2 + $0x68] sm:$0xf] %vm8967_vm13, %v1484_v18  ;;  %5937 = vmatmul.mubr.msk.bf16.gmra.mxu0 %vm8969_vm4, %v6145_v46  ;;  %vm8972_vm13 = vmmov %vm8970_vm2 }
  0xc4   : > { %1557 = vst.msk [vmem:[#allocation2 + $0x6c] sm:$0xf] %vm8968_vm6, %v1486_v7  ;;  %5967 = vmatpush3.bf16.msra.mxu1 %v6157_v16  ;;  %vm8973_vm6 = vmmov %vm8970_vm2 }
  0xc5   : > { %5968 = vmatprep.subr.bf16.mxu1 %v6160_v50 }
  0xc8   : > { %5969 = vmatpush3.bf16.msra.mxu1 %v6160_v50 }
  0xc9   : > { %v1705_v11 = vpop.permute.xlu0 %1704  ;;  %5970 = vmatprep.subr.bf16.mxu1 %v6162_v6 }
  0xca   : > { %v1707_v29 = vpop.permute.xlu1 %1706  ;;  %1779 = vst.msk [vmem:[#allocation2 + $0x60] sm:$0xf] %vm8963_vm10, %v1705_v11  ;;  %vm8974_vm10 = vmmov %vm8965_vm0 }
  0xcb   : > { %1780 = vst.msk [vmem:[#allocation2 + $0x64] sm:$0xf] %vm8970_vm2, %v1707_v29  ;;  %vm8975_vm2 = vmmov %vm8965_vm0 }
  0xcc   : > { %5971 = vmatpush3.bf16.msra.mxu1 %v6162_v6  ;;  %v6161_v6 = vld [vmem:[#allocation2 + $0x8] sm:$0xff]  }
  0xd0   : > { %v1456_v1 = vpop.permute.xlu0 %1455 }
  0xd1   : > { %v1458_v12 = vpop.permute.xlu1 %1457  ;;  %1542 = vst.msk [vmem:[#allocation2 + $0x30] sm:$0xf] %vm8965_vm0, %v1456_v1  ;;  %vm8976_vm0 = vmmov %vm8973_vm6 }
  0xd2   : > { %1543 = vst.msk [vmem:[#allocation2 + $0x34] sm:$0xf] %vm8971_vm14, %v1458_v12  ;;  %v6146_v56 = vld [vmem:[#allocation2 + $0x60] sm:$0xff]   ;;  %vm8977_vm14 = vmmov %vm8976_vm0 }
  0xd3   : > { %5952 = vmatprep.mubr.msk.bf16.mxu1 %vm8969_vm4, %v6146_v56  ;;  %vm8981_vm4 = vmmov %vm8975_vm2 }
  0xd5   : > { %v1711_v44 = vpop.permute.xlu1 %1710 }
  0xd6   : > { %1782 = vst.msk [vmem:[#allocation2 + $0x6c] sm:$0xf] %vm8973_vm6, %v1711_v44  ;;  %vm8980_vm6 = vmmov %vm8976_vm0 }
  0xd8   : > { %v1709_v21 = vpop.permute.xlu0 %1708 }
  0xd9   : > { %1781 = vst.msk [vmem:[#allocation2 + $0x68] sm:$0xf] %vm8972_vm13, %v1709_v21  ;;  %vm8979_vm13 = vmmov %vm8976_vm0  ;;  %v6165_v21 = vld [vmem:[#allocation2 + $0x10] sm:$0xff]  }
  0xdd   : > { %v1460_v37 = vpop.permute.xlu0 %1459  ;;  %v1462_v52 = vpop.permute.xlu1 %1461 }
  0xde   : > { %1544 = vst.msk [vmem:[#allocation2 + $0x38] sm:$0xf] %vm8974_vm10, %v1460_v37  ;;  %vm8982_vm10 = vmmov %vm8975_vm2 }
  0xdf   : > { %1545 = vst.msk [vmem:[#allocation2 + $0x3c] sm:$0xf] %vm8975_vm2, %v1462_v52  ;;  %vm8983_vm2 = vmmov %vm8978_vm1  ;;  %v6166_v52 = vld [vmem:[#allocation2 + $0x18] sm:$0xff]  }
  0xe0   : > { %v6147_v33 = vld [vmem:[#allocation2 + $0x68] sm:$0xff]  }
  0xe1   : > { %v1683_v49 = vpop.permute.xlu1 %1682  ;;  %5953 = vmatmul.mubr.msk.bf16.gmra.mxu1 %vm8978_vm1, %v6147_v33 }
  0xe2   : > { %1768 = vst.msk [vmem:[#allocation2 + $0x34] sm:$0xf] %vm8977_vm14, %v1683_v49  ;;  %vm8986_vm14 = vmmov %vm8983_vm2 }
  0xe3   : > { %v1681_v34 = vpop.permute.xlu0 %1680 }
  0xe4   : > { %1767 = vst.msk [vmem:[#allocation2 + $0x30] sm:$0xf] %vm8976_vm0, %v1681_v34  ;;  %vm8984_vm0 = vmmov %vm8981_vm4 }
  0xe5   : > { %v1687_v25 = vpop.permute.xlu1 %1686  ;;  %vm8985_vm1 = vmmov %vm8984_vm0 }
  0xe6   : > { %1770 = vst.msk [vmem:[#allocation2 + $0x3c] sm:$0xf] %vm8980_vm6, %v1687_v25  ;;  %v6170_v25 = vld [vmem:[#allocation2 + $0x20] sm:$0xff]  }
  0xe7   : > { %v1685_v58 = vpop.permute.xlu0 %1684 }
  0xe8   : > { %1769 = vst.msk [vmem:[#allocation2 + $0x38] sm:$0xf] %vm8979_vm13, %v1685_v58  ;;  %vm8987_vm13 = vmmov %vm8980_vm6  ;;  %v6169_v58 = vld [vmem:[#allocation2 + $0x10] sm:$0xff]  }
  0xe9   : > { %v1490_v20 = vpop.permute.xlu1 %1489 }
  0xea   : > { %1559 = vst.msk [vmem:[#allocation2 + $0x74] sm:$0xf] %vm8982_vm10, %v1490_v20  ;;  %vm8989_vm10 = vmmov %vm8984_vm0  ;;  %v6172_v20 = vld [vmem:[#allocation2 + $0x18] sm:$0xff]  }
  0xeb   : > { %v1488_v24 = vpop.permute.xlu0 %1487  ;;  %v6148_v39 = vld [vmem:[#allocation2 + $0x30] sm:$0xff]  }
  0xec   : > { %1558 = vst.msk [vmem:[#allocation2 + $0x70] sm:$0xf] %vm8981_vm4, %v1488_v24  ;;  %5940 = vmatprep.mubr.msk.bf16.mxu0 %vm8983_vm2, %v6148_v39  ;;  %vm8988_vm4 = vmmov %vm8984_vm0  ;;  %v6171_v24 = vld [vmem:[#allocation2 + $0x28] sm:$0xff]   ;;  %v6173_v39 = vld [vmem:[#allocation2 + $0x20] sm:$0xff]  }
  0xed   : > { %v1494_v41 = vpop.permute.xlu1 %1493  ;;  %vm8990_vm2 = vmmov %vm8980_vm6 }
  0xee   : > { %1561 = vst.msk [vmem:[#allocation2 + $0x7c] sm:$0xf] %vm8985_vm1, %v1494_v41  ;;  %vm8992_vm1 = vmmov %vm8986_vm14 }
  0xef   : > { %v1492_v48 = vpop.permute.xlu0 %1491  ;;  %v6150_v59 = vld [vmem:[#allocation2 + $0x38] sm:$0xff]  }
  0xf0   : > { %1560 = vst.msk [vmem:[#allocation2 + $0x78] sm:$0xf] %vm8984_vm0, %v1492_v48  ;;  %5941 = vmatmul.mubr.msk.bf16.gmra.mxu0 %vm8986_vm14, %v6150_v59  ;;  %vm8991_vm0 = vmmov %vm8990_vm2  ;;  %v6174_v48 = vld [vmem:[#allocation2 + $0x30] sm:$0xff]   ;;  %v6175_v41 = vld [vmem:[#allocation2 + $0x38] sm:$0xff]  }
  0xf1   : > { %v1715_v36 = vpop.permute.xlu1 %1714  ;;  %vm8993_vm14 = vmmov %vm8988_vm4  ;;  %v6176_v59 = vld [vmem:[#allocation2 + $0x28] sm:$0xff]  }
  0xf2   : > { %1784 = vst.msk [vmem:[#allocation2 + $0x74] sm:$0xf] %vm8980_vm6, %v1715_v36  ;;  %vm8995_vm6 = vmmov %vm8991_vm0 }
  0xf3   : > { %v1713_v23 = vpop.permute.xlu0 %1712 }
  0xf4   : > { %1783 = vst.msk [vmem:[#allocation2 + $0x70] sm:$0xf] %vm8987_vm13, %v1713_v23  ;;  %vm8994_vm13 = vmmov %vm8988_vm4  ;;  %v6177_v23 = vld [vmem:[#allocation2 + $0x30] sm:$0xff]  }
  0xf5   : > { %v1466_v55 = vpop.permute.xlu1 %1465 }
  0xf6   : > { %1547 = vst.msk [vmem:[#allocation2 + $0x44] sm:$0xf] %vm8989_vm10, %v1466_v55  ;;  %vm8997_vm10 = vmmov %vm8992_vm1  ;;  %v6180_v55 = vld [vmem:[#allocation2 + $0x38] sm:$0xff]  }
  0xf7   : > { %v1464_v16 = vpop.permute.xlu0 %1463 }
  0xf8   : > { %1546 = vst.msk [vmem:[#allocation2 + $0x40] sm:$0xf] %vm8988_vm4, %v1464_v16  ;;  %vm8996_vm4 = vmmov %vm8991_vm0 }
  0xf9   : > { %v1719_v5 = vpop.permute.xlu1 %1718 }
  0xfa   : > { %1786 = vst.msk [vmem:[#allocation2 + $0x7c] sm:$0xf] %vm8991_vm0, %v1719_v5  ;;  %v6182_v5 = vld [vmem:[#allocation2 + $0x50] sm:$0xff]  }
  0xfb   : > { %v1717_v62 = vpop.permute.xlu0 %1716  ;;  %v6154_v50 = vld [vmem:[#allocation2 + $0x70] sm:$0xff]  }
  0xfc   : > { %1785 = vst.msk [vmem:[#allocation2 + $0x78] sm:$0xf] %vm8990_vm2, %v1717_v62  ;;  %5956 = vmatprep.mubr.msk.bf16.mxu1 %vm8992_vm1, %v6154_v50  ;;  %vm8998_vm2 = vmmov %vm8992_vm1  ;;  %v6183_v50 = vld [vmem:[#allocation2 + $0x58] sm:$0xff]  }
  0xfd   : > { %v1470_v7 = vpop.permute.xlu1 %1469  ;;  %vm8999_vm1 = vmmov %vm8991_vm0 }
  0xfe   : > { %1549 = vst.msk [vmem:[#allocation2 + $0x4c] sm:$0xf] %vm8994_vm13, %v1470_v7  ;;  %v6185_v7 = vld [vmem:[#allocation2 + $0x50] sm:$0xff]  }
  0xff   : > { %v1468_v18 = vpop.permute.xlu0 %1467 }
 0x100   : > { %1548 = vst.msk [vmem:[#allocation2 + $0x48] sm:$0xf] %vm8993_vm14, %v1468_v18  ;;  %vm9000_vm14 = vmmov %vm8994_vm13 }
 0x101   : > { %v1691_v11 = vpop.permute.xlu1 %1690 }
 0x102   : > { %1772 = vst.msk [vmem:[#allocation2 + $0x44] sm:$0xf] %vm8996_vm4, %v1691_v11  ;;  %vm9002_vm4 = vmmov %vm8998_vm2  ;;  %v6187_v11 = vld [vmem:[#allocation2 + $0x68] sm:$0xff]  }
 0x103   : > { %v1689_v46 = vpop.permute.xlu0 %1688  ;;  %v6159_v29 = vld [vmem:[#allocation2 + $0x78] sm:$0xff]  }
 0x104   : > { %1771 = vst.msk [vmem:[#allocation2 + $0x40] sm:$0xf] %vm8995_vm6, %v1689_v46  ;;  %5957 = vmatmul.mubr.msk.bf16.gmra.mxu1 %vm8997_vm10, %v6159_v29  ;;  %vm9001_vm6 = vmmov %vm8998_vm2  ;;  %v6186_v46 = vld [vmem:[#allocation2 + $0x60] sm:$0xff]   ;;  %v6188_v29 = vld [vmem:[#allocation2 + $0x58] sm:$0xff]  }
 0x105   : > { %5972 = vmatprep.mubr.msk.bf16.mxu1 %vm8998_vm2, %v6161_v6  ;;  %v1695_v12 = vpop.permute.xlu1 %1694  ;;  %vm9003_vm10 = vmmov %vm8998_vm2  ;;  %v6189_v6 = vld [vmem:[#allocation2 + $0x60] sm:$0xff]  }
 0x106   : > { %1774 = vst.msk [vmem:[#allocation2 + $0x4c] sm:$0xf] %vm8999_vm1, %v1695_v12  ;;  %vm9004_vm2 = vmmov %vm8991_vm0  ;;  %v6191_v12 = vld [vmem:[#allocation2 + $0x78] sm:$0xff]  }
 0x107   : > { %v1693_v1 = vpop.permute.xlu0 %1692  ;;  %vm9005_vm1 = vmmov %vm9002_vm4 }
 0x108   : > { %1773 = vst.msk [vmem:[#allocation2 + $0x48] sm:$0xf] %vm8991_vm0, %v1693_v1  ;;  %vm9006_vm3 = vmmov %vm9005_vm1  ;;  %v6190_v1 = vld [vmem:[#allocation2 + $0x70] sm:$0xff]  }
 0x109   : > { %v1498_v37 = vpop.permute.xlu1 %1497 }
 0x10a   : > { %1563 = vst.msk [vmem:[#allocation2 + $0x84] sm:$0xf] %vm8994_vm13, %v1498_v37  ;;  %vm9008_vm13 = vmmov %vm9005_vm1 }
 0x10b   : > { %v6164_v44 = vld [vmem:[#allocation2 + $0x40] sm:$0xff]   ;;  %v1496_v56 = vpop.permute.xlu0 %1495 }
 0x10c   : > { %1562 = vst.msk [vmem:[#allocation2 + $0x80] sm:$0xf] %vm9000_vm14, %v1496_v56  ;;  %5944 = vmatprep.mubr.msk.bf16.mxu0 %vm9001_vm6, %v6164_v44  ;;  %5973 = vmatmul.mubr.msk.bf16.vlgmr.msra.gmra.mxu1 %vm9002_vm4, %v6165_v21  ;;  %vm9007_vm14 = vmmov %vm9005_vm1  ;;  %v6178_v36 = vld [vmem:[#allocation2 + $0x40] sm:$0xff]   ;;  %v6192_v21 = vld [vmem:[#allocation2 + $0x68] sm:$0xff]  }
 0x10d   : > { %5976 = vmatprep.mubr.msk.bf16.mxu1 %vm9003_vm10, %v6166_v52  ;;  %v1723_v33 = vpop.permute.xlu1 %1722  ;;  %vm9009_vm6 = vmmov %vm9005_vm1  ;;  %v6181_v62 = vld [vmem:[#allocation2 + $0x40] sm:$0xff]   ;;  %v6193_v44 = vld [vmem:[#allocation2 + $0x70] sm:$0xff]  }
 0x10e   : > { %1788 = vst.msk [vmem:[#allocation2 + $0x84] sm:$0xf] %vm8991_vm0, %v1723_v33  ;;  %vm9010_vm4 = vmmov %vm9005_vm1  ;;  %v6195_v52 = vld [vmem:[#allocation2 + $0x78] sm:$0xff]   ;;  %v8719_v33 = vmov 0.0  }
 0x10f   : > { %v6167_v34 = vld [vmem:[#allocation2 + $0x48] sm:$0xff]   ;;  %v1721_v49 = vpop.permute.xlu0 %1720  ;;  %vm9011_vm10 = vmmov %vm9005_vm1  ;;  %6048 = vmatprep.subr.mxu1 %v8719_v33 }
 0x110   : > { %1787 = vst.msk [vmem:[#allocation2 + $0x80] sm:$0xf] %vm9004_vm2, %v1721_v49  ;;  %5945 = vmatmul.mubr.msk.bf16.gmra.mxu0 %vm9005_vm1, %v6167_v34  ;;  %vm9012_vm2 = vmmov %vm9005_vm1  ;;  %v6179_v16 = vld [vmem:[#allocation2 + $0x48] sm:$0xff]   ;;  %v7417_v49 = vld [vmem:[%s8678_s5 + $0x18] sm:$0xff] }
 0x111   : > { %6016 = vmatprep.mubr.msk.bf16.mxu0 %vm9006_vm3, %v6169_v58  ;;  %vm9013_vm3 = vmmov %vm9005_vm1  ;;  %v6184_v18 = vld [vmem:[#allocation2 + $0x48] sm:$0xff]   ;;  %6049 = vmatpush3.msra.mxu1 %v7417_v49  ;;  %v7425_v58 = vld [vmem:[%s8678_s5 + $0x10] sm:$0xff] }
 0x112   : > { %vm9014_vm0 = vmmov %vm9005_vm1  ;;  %v6197_v34 = vld [vmem:[#allocation2 + $0x88] sm:$0xff]   ;;  %6050 = vmatprep.subr.mxu1 %v8719_v33 }
 0x113   : > { %vm9015_vm1 = vmmov %vm9014_vm0  ;;  %6051 = vmatpush3.msra.mxu1 %v7425_v58 }
 0x114   : > { %5977 = vmatmul.mubr.msk.bf16.gmra.mxu1 %vm9007_vm14, %v6170_v25  ;;  %vm9016_vm14 = vmmov %vm9014_vm0  ;;  %6052 = vmatprep.subr.mxu1 %v8719_v33  ;;  %v7432_v25 = vld [vmem:[%s8678_s5 + $0x8] sm:$0xff] }
 0x115   : > { %5980 = vmatprep.mubr.msk.bf16.mxu1 %vm9008_vm13, %v6171_v24  ;;  %vm9017_vm13 = vmmov %vm9014_vm0  ;;  %6053 = vmatpush3.msra.mxu1 %v7432_v25 }
 0x116   : > { %6054 = vmatprep.subr.mxu1 %v8719_v33 }
 0x117   : > { %v6194_v56 = vld [vmem:[#allocation2 + $0x80] sm:$0xff]  }
 0x118   : > { %6017 = vmatmul.mubr.msk.bf16.vlgmr.msra.gmra.mxu0 %vm9009_vm6, %v6172_v20  ;;  %vm9018_vm6 = vmmov %vm9014_vm0  ;;  %v6196_v37 = vld [vmem:[#allocation2 + $0x80] sm:$0xff]  }
 0x119   : > { %6020 = vmatprep.mubr.msk.bf16.mxu0 %vm9010_vm4, %v6173_v39  ;;  %vm9019_vm4 = vmmov %vm9014_vm0 }
 0x11c   : > { %5981 = vmatmul.mubr.msk.bf16.gmra.mxu1 %vm9011_vm10, %v6174_v48  ;;  %vm9020_vm10 = vmmov %vm9014_vm0 }
 0x11d   : > { %5984 = vmatprep.mubr.msk.bf16.mxu1 %vm9012_vm2, %v6175_v41  ;;  %vm9021_vm2 = vmmov %vm9014_vm0 }
 0x120   : > { %6021 = vmatmul.mubr.msk.bf16.gmra.mxu0 %vm9013_vm3, %v6176_v59  ;;  %vm9022_vm3 = vmmov %vm9014_vm0 }
 0x121   : > { %6024 = vmatprep.mubr.msk.bf16.mxu0 %vm9014_vm0, %v6177_v23 }
 0x124   : > { %5985 = vmatmul.mubr.msk.bf16.gmra.mxu1 %vm9015_vm1, %v6178_v36  ;;  %vm9023_vm1 = vmmov %vm9014_vm0  ;;  %v7441_v36 = vld [vmem:[%s8678_s5] sm:$0xff] }
 0x125   : > { %5988 = vmatprep.mubr.msk.bf16.mxu1 %vm9016_vm14, %v6179_v16  ;;  %vm9024_vm14 = vmmov %vm9014_vm0  ;;  %6055 = vmatpush3.msra.mxu1 %v7441_v36 }
 0x126   : > { %6059 = vmatprep.subr.mxu1 %v8719_v33 }
 0x128   : > { %6025 = vmatmul.mubr.msk.bf16.gmra.mxu0 %vm9017_vm13, %v6180_v55  ;;  %vm9025_vm13 = vmmov %vm9014_vm0 }
 0x129   : > { %6028 = vmatprep.mubr.msk.bf16.mxu0 %vm9018_vm6, %v6181_v62  ;;  %vm9026_vm6 = vmmov %vm9014_vm0 }
 0x12c   : > { %5989 = vmatmul.mubr.msk.bf16.gmra.mxu1 %vm9019_vm4, %v6182_v5  ;;  %vm9027_vm4 = vmmov %vm9014_vm0 }
 0x12d   : > { %5992 = vmatprep.mubr.msk.bf16.mxu1 %vm9020_vm10, %v6183_v50  ;;  %vm9028_vm10 = vmmov %vm9014_vm0 }
 0x130   : > { %6029 = vmatmul.mubr.msk.bf16.gmra.mxu0 %vm9021_vm2, %v6184_v18  ;;  %vm9029_vm2 = vmmov %vm9014_vm0 }
 0x131   : > { %6032 = vmatprep.mubr.msk.bf16.mxu0 %vm9022_vm3, %v6185_v7  ;;  %vm9030_vm3 = vmmov %vm9014_vm0 }
 0x134   : > { %5993 = vmatmul.mubr.msk.bf16.gmra.mxu1 %vm9014_vm0, %v6186_v46 }
 0x135   : > { %5996 = vmatprep.mubr.msk.bf16.mxu1 %vm9023_vm1, %v6187_v11  ;;  %vm9031_vm1 = vmmov %vm9014_vm0 }
 0x138   : > { %6033 = vmatmul.mubr.msk.bf16.gmra.mxu0 %vm9024_vm14, %v6188_v29  ;;  %vm9032_vm14 = vmmov %vm9014_vm0 }
 0x139   : > { %6036 = vmatprep.mubr.msk.bf16.mxu0 %vm9025_vm13, %v6189_v6  ;;  %vm6266_vm13 = vmmov 0  }
 0x13c   : > { %5997 = vmatmul.mubr.msk.bf16.gmra.mxu1 %vm9026_vm6, %v6190_v1  ;;  %vm3002_vm6 = vcmask 261120  }
 0x13d   : > { %6000 = vmatprep.mubr.msk.bf16.mxu1 %vm9027_vm4, %v6191_v12  ;;  %vm3331_vm4 = vcmask 64512  }
 0x140   : > { %6037 = vmatmul.mubr.msk.bf16.gmra.mxu0 %vm9028_vm10, %v6192_v21  ;;  %vm9038_vm10 = vcmp.lt.s32.totalorder %v6330_v2, 7 }
 0x141   : > { %6040 = vmatprep.mubr.msk.bf16.mxu0 %vm9029_vm2, %v6193_v44  ;;  %vm9040_vm2 = vcmp.lt.s32.totalorder %v6330_v2, 1 }
 0x144   : > { %6001 = vmatmul.mubr.msk.bf16.gmra.mxu1 %vm9030_vm3, %v6194_v56  ;;  %vm9041_vm3 = vmmov %vm9038_vm10 }
 0x145   : > { %6056 = vmatprep.mubr.msk.f32.mxu1 %vm6266_vm13, %v8719_v33 }
 0x148   : > { %6041 = vmatmul.mubr.msk.bf16.gmra.mxu0 %vm9014_vm0, %v6195_v52  ;;  %vm9042_vm0 = vmmov %vm9040_vm2 }
 0x149   : > { %6044 = vmatprep.mubr.msk.bf16.mxu0 %vm9031_vm1, %v6196_v37  ;;  %vm9044_vm1 = vmmov %vm9041_vm3 }
 0x150   : > { %6045 = vmatmul.mubr.msk.bf16.gmra.mxu0 %vm9032_vm14, %v6197_v34  ;;  %vm9046_vm14 = vmmov %vm9042_vm0 }
 0x15b   : > { %v5930_v24 = vpop.f32.mrf.mxu0 }
 0x15c   : > { %v2168_v63 = vadd.f32 %v5930_v24, %v7494_v57 }
 0x15d   : > { %v2039_v20 = vpop.f32.mrf.mxu0 }
 0x15e   : > { %v2166_v8 = vadd.f32 %v7494_v57, %v2039_v20 }
 0x15f   : > { %v5931_v39 = vpop.f32.mrf.mxu0 }
 0x160   : > { %v2169_v14 = vadd.f32 %v5931_v39, %v7494_v57 }
 0x161   : > { %v2042_v48 = vpop.f32.mrf.mxu0 }
 0x162   : > { %v2167_v40 = vadd.f32 %v7494_v57, %v2042_v48 }
 0x163   : > { %v5934_v41 = vpop.f32.mrf.mxu0 }
 0x165   : > { %v2055_v23 = vpop.f32.mrf.mxu0 }
 0x167   : > { %v5935_v55 = vpop.f32.mrf.mxu0 }
 0x169   : > { %v2058_v5 = vpop.f32.mrf.mxu0 }
 0x177   : > { %v7436_v59 = vpop.f32.mrf.mxu1 }
 0x179   : > { %v7443_v16 = vpop.f32.mrf.mxu1 }
 0x17b   : > { %v7449_v62 = vpop.f32.mrf.mxu1 }
 0x17d   : > { %v7451_v50 = vpop.f32.mrf.mxu1 }
 0x183   : > { %v7453_v18 = vpop.f32.mrf.mxu0 }
 0x185   : > { %v7457_v46 = vpop.f32.mrf.mxu0 }
 0x187   : > { %v7461_v29 = vpop.f32.mrf.mxu0 }
 0x189   : > { %v7465_v1 = vpop.f32.mrf.mxu0 }
 0x1a1   : > { %v7455_v7 = vpop.f32.mrf.mxu1 }
 0x1a3   : > { %v7459_v11 = vpop.f32.mrf.mxu1 }
 0x1a5   : > { %v7463_v6 = vpop.f32.mrf.mxu1 }
 0x1a7   : > { %v7467_v12 = vpop.f32.mrf.mxu1 }
 0x1b0   : > { %v7469_v21 = vpop.f32.mrf.mxu0 }
 0x1b2   : > { %v7473_v56 = vpop.f32.mrf.mxu0 }
 0x1b4   : > { %v7479_v34 = vpop.f32.mrf.mxu0 }
 0x1b6   : > { %v7483_v53 = vpop.f32.mrf.mxu0 }
 0x1c4   : > { %v7471_v44 = vpop.f32.mrf.mxu1 }
 0x1c6   : > { %v7475_v37 = vpop.f32.mrf.mxu1 }
 0x1c8   : > { %v7477_v52 = vpop.f32.mrf.mxu1 }
 0x1ca   : > { %v7481_v33 = vpop.f32.mrf.mxu1 }
 0x1cc   : > { %v5974_v47 = vpop.f32.mrf.mxu1 }
 0x1cd   : > { %v2570_v10 = vadd.f32 %v5974_v47, %v2168_v63  ;;  %v2172_v63 = vadd.f32 %v5934_v41, %v7494_v57 }
 0x1ce   : > { %v2441_v0 = vpop.f32.mrf.mxu1 }
 0x1cf   : > { %v2568_v4 = vadd.f32 %v2441_v0, %v2166_v8 }
 0x1d0   : > { %v7485_v27 = vpop.f32.mrf.mxu0  ;;  %v5975_v9 = vpop.f32.mrf.mxu1 }
 0x1d1   : > { %v2571_v51 = vadd.f32 %v5975_v9, %v2169_v14 }
 0x1d2   : > { %v7487_v35 = vpop.f32.mrf.mxu0  ;;  %v2444_v42 = vpop.f32.mrf.mxu1 }
 0x1d3   : > { %v2569_v61 = vadd.f32 %v2444_v42, %v2167_v40 }
 0x1d4   : > { %v7489_v43 = vpop.f32.mrf.mxu0  ;;  %v5978_v26 = vpop.f32.mrf.mxu1 }
 0x1d6   : > { %v7496_v45 = vpop.f32.mrf.mxu0  ;;  %v2457_v17 = vpop.f32.mrf.mxu1 }
 0x1d8   : > { %v5979_v15 = vpop.f32.mrf.mxu1  ;;  %v6018_v13 = vpop.f32.mrf.mxu0 }
 0x1d9   : > { %v7506_v20 = vadd.f32 %v6018_v13, %v2570_v10 }
 0x1da   : > { %v2460_v28 = vpop.f32.mrf.mxu1  ;;  %v2843_v30 = vpop.f32.mrf.mxu0 }
 0x1db   : > { %v7502_v54 = vadd.f32 %v2843_v30, %v2568_v4  ;;  %v2170_v4 = vadd.f32 %v7494_v57, %v2055_v23  ;;  %v2173_v30 = vadd.f32 %v5935_v55, %v7494_v57  ;;  %v3074_v14 = vmul.f32 %v7506_v20, %v7506_v20 }
 0x1dc   : > { %v7504_v31 = vpop.f32.mrf.mxu1  ;;  %v6019_v60 = vpop.f32.mrf.mxu0  ;;  %v3006_v48 = vsel %vm3002_vm6, %v7506_v20, 0.0 }
 0x1dd   : > { %v3072_v8 = vmul.f32 %v7502_v54, %v7502_v54  ;;  %v7510_v0 = vadd.f32 %v6019_v60, %v2571_v51  ;;  %v3003_v10 = vsel %vm3002_vm6, %v7502_v54, 0.0  ;;  %v2171_v60 = vadd.f32 %v7494_v57, %v2058_v5 }
 0x1de   : > { %v2473_v19 = vpop.f32.mrf.mxu1  ;;  %v2846_v38 = vpop.f32.mrf.mxu0  ;;  %v2572_v13 = vadd.f32 %v2457_v17, %v2170_v4  ;;  %v2575_v22 = vadd.f32 %v5979_v15, %v2173_v30  ;;  %v3107_v5 = vsel %vm3002_vm6, %v3074_v14, 0.0 }
 0x1df   : > { %v7512_v24 = vadd.f32 %v2846_v38, %v2569_v61  ;;  %v2574_v61 = vadd.f32 %v5978_v26, %v2172_v63  ;;  %v3104_v41 = vsel %vm3002_vm6, %v3072_v8, 0.0  ;;  %v3075_v23 = vmul.f32 %v7510_v0, %v7510_v0 }
 0x1e0   : > { %v5983_v9 = vpop.f32.mrf.mxu1  ;;  %v6022_v42 = vpop.f32.mrf.mxu0  ;;  %v2573_v63 = vadd.f32 %v2460_v28, %v2171_v60  ;;  %v3008_v4 = vsel %vm3002_vm6, %v7510_v0, 0.0 }
 0x1e1   : > { %9033 = vst [vmem:[#allocation36_spill] sm:$0xff] %v7512_v24  ;;  %v3004_v40 = vsel %vm3002_vm6, %v7512_v24, 0.0  ;;  %v3073_v51 = vmul.f32 %v7512_v24, %v7512_v24  ;;  %v7539_v8 = vadd.f32 %v6022_v42, %v2574_v61 }
 0x1e2   : > { %v3005_v38 = vadd.f32 %v3004_v40, %v3003_v10  ;;  %v2476_v47 = vpop.f32.mrf.mxu1  ;;  %v2859_v39 = vpop.f32.mrf.mxu0  ;;  %v2174_v10 = vadd.f32 %v7494_v57, %v7457_v46 }
 0x1e3   : > { %v3105_v55 = vsel %vm3002_vm6, %v3073_v51, 0.0  ;;  %v7532_v24 = vadd.f32 %v2859_v39, %v2572_v13 }
 0x1e4   : > { %v3007_v3 = vadd.f32 %v3006_v48, %v3005_v38  ;;  %v3106_v32 = vadd.f32 %v3105_v55, %v3104_v41  ;;  %v7534_v26 = vpop.f32.mrf.mxu1  ;;  %v6023_v17 = vpop.f32.mrf.mxu0  ;;  %v3109_v38 = vsel %vm3002_vm6, %v3075_v23, 0.0  ;;  %v2576_v42 = vadd.f32 %v2473_v19, %v2174_v10 }
 0x1e5   : > { %v3076_v30 = vmul.f32 %v7532_v24, %v7532_v24  ;;  %v3010_v28 = vsel %vm3002_vm6, %v7532_v24, 0.0  ;;  %v7548_v14 = vadd.f32 %v6023_v17, %v2575_v22  ;;  %v2176_v22 = vadd.f32 %v7453_v18, %v7494_v57 }
 0x1e6   : > { %v3108_v40 = vadd.f32 %v3107_v5, %v3106_v32  ;;  %v3009_v15 = vadd.f32 %v3008_v4, %v3007_v3  ;;  %v2489_v51 = vpop.f32.mrf.mxu1  ;;  %v2862_v13 = vpop.f32.mrf.mxu0  ;;  %v3078_v3 = vmul.f32 %v7539_v8, %v7539_v8  ;;  %v2177_v19 = vadd.f32 %v7461_v29, %v7494_v57 }
 0x1e7   : > { %v7550_v60 = vadd.f32 %v2862_v13, %v2573_v63  ;;  %v3111_v48 = vsel %vm3002_vm6, %v3076_v30, 0.0  ;;  %v3014_v4 = vsel %vm3002_vm6, %v7539_v8, 0.0  ;;  %v3079_v10 = vmul.f32 %v7548_v14, %v7548_v14 }
 0x1e8   : > { %v3011_v61 = vadd.f32 %v3010_v28, %v3009_v15  ;;  %v3110_v39 = vadd.f32 %v3109_v38, %v3108_v40  ;;  %v5987_v46 = vpop.f32.mrf.mxu1  ;;  %v6026_v32 = vpop.f32.mrf.mxu0  ;;  %v2175_v18 = vadd.f32 %v7494_v57, %v7465_v1  ;;  %v2578_v30 = vadd.f32 %v7504_v31, %v2176_v22 }
 0x1e9   : > { %v3012_v41 = vsel %vm3002_vm6, %v7550_v60, 0.0  ;;  %v3077_v23 = vmul.f32 %v7550_v60, %v7550_v60 }
 0x1ea   : > { %v3112_v55 = vadd.f32 %v3111_v48, %v3110_v39  ;;  %v3013_v17 = vadd.f32 %v3012_v41, %v3011_v61  ;;  %v2492_v5 = vpop.f32.mrf.mxu1  ;;  %v2875_v63 = vpop.f32.mrf.mxu0  ;;  %v2579_v61 = vadd.f32 %v5983_v9, %v2177_v19  ;;  %v3115_v39 = vsel %vm3002_vm6, %v3078_v3, 0.0 }
 0x1eb   : > { %v3113_v40 = vsel %vm3002_vm6, %v3077_v23, 0.0  ;;  %v7568_v15 = vadd.f32 %v2875_v63, %v2576_v42  ;;  %v3016_v48 = vsel %vm3002_vm6, %v7548_v14, 0.0  ;;  %v2577_v41 = vadd.f32 %v2476_v47, %v2175_v18 }
 0x1ec   : > { %v3015_v29 = vadd.f32 %v3014_v4, %v3013_v17  ;;  %v3114_v13 = vadd.f32 %v3113_v40, %v3112_v55  ;;  %v7573_v38 = vpop.f32.mrf.mxu1  ;;  %v6027_v28 = vpop.f32.mrf.mxu0  ;;  %v7580_v63 = vadd.f32 %v6026_v32, %v2578_v30  ;;  %v2178_v55 = vadd.f32 %v7494_v57, %v7473_v56 }
 0x1ed   : > { %v3080_v42 = vmul.f32 %v7568_v15, %v7568_v15  ;;  %v3117_v9 = vsel %vm3002_vm6, %v3079_v10, 0.0  ;;  %v3018_v3 = vsel %vm3002_vm6, %v7568_v15, 0.0  ;;  %v7587_v4 = vadd.f32 %v6027_v28, %v2579_v61 }
 0x1ee   : > { %v3116_v23 = vadd.f32 %v3115_v39, %v3114_v13  ;;  %v3017_v1 = vadd.f32 %v3016_v48, %v3015_v29  ;;  %v2505_v31 = vpop.f32.mrf.mxu1  ;;  %v2878_v22 = vpop.f32.mrf.mxu0  ;;  %v2180_v18 = vadd.f32 %v7469_v21, %v7494_v57  ;;  %v2580_v30 = vadd.f32 %v2489_v51, %v2178_v55 }
 0x1ef   : > { %v7589_v40 = vadd.f32 %v2878_v22, %v2577_v41  ;;  %v3119_v29 = vsel %vm3002_vm6, %v3080_v42, 0.0  ;;  %v3082_v56 = vmul.f32 %v7580_v63, %v7580_v63  ;;  %v2181_v48 = vadd.f32 %v7479_v34, %v7494_v57 }
 0x1f0   : > { %v3019_v19 = vadd.f32 %v3018_v3, %v3017_v1  ;;  %v3118_v17 = vadd.f32 %v3117_v9, %v3116_v23  ;;  %v5991_v47 = vpop.f32.mrf.mxu1  ;;  %v6030_v32 = vpop.f32.mrf.mxu0  ;;  %v2179_v21 = vadd.f32 %v7494_v57, %v7483_v53  ;;  %v2582_v51 = vadd.f32 %v7534_v26, %v2180_v18 }
 0x1f1   : > { %v3020_v13 = vsel %vm3002_vm6, %v7589_v40, 0.0  ;;  %v3081_v28 = vmul.f32 %v7589_v40, %v7589_v40  ;;  %v3022_v41 = vsel %vm3002_vm6, %v7580_v63, 0.0  ;;  %v3083_v23 = vmul.f32 %v7587_v4, %v7587_v4 }
 0x1f2   : > { %v3120_v10 = vadd.f32 %v3119_v29, %v3118_v17  ;;  %v2508_v61 = vpop.f32.mrf.mxu1  ;;  %v2891_v39 = vpop.f32.mrf.mxu0  ;;  %v3021_v42 = vadd.f32 %v3020_v13, %v3019_v19  ;;  %v2583_v34 = vadd.f32 %v5987_v46, %v2181_v48  ;;  %v2581_v3 = vadd.f32 %v2492_v5, %v2179_v21 }
 0x1f3   : > { %v3121_v1 = vsel %vm3002_vm6, %v3081_v28, 0.0  ;;  %v7610_v22 = vadd.f32 %v2891_v39, %v2580_v30  ;;  %v3123_v26 = vsel %vm3002_vm6, %v3082_v56, 0.0  ;;  %v3024_v19 = vsel %vm3002_vm6, %v7587_v4, 0.0 }
 0x1f4   : > { %v7612_v55 = vpop.f32.mrf.mxu1  ;;  %v6031_v9 = vpop.f32.mrf.mxu0  ;;  %v3023_v17 = vadd.f32 %v3022_v41, %v3021_v42  ;;  %v3122_v53 = vadd.f32 %v3121_v1, %v3120_v10  ;;  %v7617_v18 = vadd.f32 %v6030_v32, %v2582_v51  ;;  %v2184_v28 = vadd.f32 %v7485_v27, %v7494_v57 }
 0x1f5   : > { %v3084_v29 = vmul.f32 %v7610_v22, %v7610_v22  ;;  %v2182_v56 = vadd.f32 %v7494_v57, %v7487_v35  ;;  %v3125_v10 = vsel %vm3002_vm6, %v3083_v23, 0.0  ;;  %v3026_v32 = vsel %vm3002_vm6, %v7610_v22, 0.0 }
 0x1f6   : > { %v2521_v13 = vpop.f32.mrf.mxu1  ;;  %v2894_v30 = vpop.f32.mrf.mxu0  ;;  %v3124_v39 = vadd.f32 %v3123_v26, %v3122_v53  ;;  %v3025_v46 = vadd.f32 %v3024_v19, %v3023_v17  ;;  %v7630_v48 = vadd.f32 %v6031_v9, %v2583_v34  ;;  %v2185_v35 = vadd.f32 %v7489_v43, %v7494_v57 }
 0x1f7   : > { %v7623_v5 = vadd.f32 %v2894_v30, %v2581_v3  ;;  %v2584_v3 = vadd.f32 %v2505_v31, %v2182_v56  ;;  %v3086_v23 = vmul.f32 %v7617_v18, %v7617_v18  ;;  %v3127_v9 = vsel %vm3002_vm6, %v3084_v29, 0.0 }
 0x1f8   : > { %v5995_v21 = vpop.f32.mrf.mxu1  ;;  %v6034_v51 = vpop.f32.mrf.mxu0  ;;  %v3027_v42 = vadd.f32 %v3026_v32, %v3025_v46  ;;  %v3126_v41 = vadd.f32 %v3125_v10, %v3124_v39  ;;  %v2183_v53 = vadd.f32 %v7494_v57, %v7496_v45  ;;  %v2586_v39 = vadd.f32 %v7573_v38, %v2184_v28 }
 0x1f9   : > { %v3028_v27 = vsel %vm3002_vm6, %v7623_v5, 0.0  ;;  %v3085_v1 = vmul.f32 %v7623_v5, %v7623_v5  ;;  %v3030_v43 = vsel %vm3002_vm6, %v7617_v18, 0.0  ;;  %v3087_v31 = vmul.f32 %v7630_v48, %v7630_v48 }
 0x1fa   : > { %v2524_v34 = vpop.f32.mrf.mxu1  ;;  %v2907_v17 = vpop.f32.mrf.mxu0  ;;  %v3128_v26 = vadd.f32 %v3127_v9, %v3126_v41  ;;  %v3029_v19 = vadd.f32 %v3028_v27, %v3027_v42  ;;  %v2587_v10 = vadd.f32 %v5991_v47, %v2185_v35  ;;  %v2585_v32 = vadd.f32 %v2508_v61, %v2183_v53 }
 0x1fb   : > { %v3129_v30 = vsel %vm3002_vm6, %v3085_v1, 0.0  ;;  %v7649_v46 = vadd.f32 %v2907_v17, %v2584_v3  ;;  %v3131_v42 = vsel %vm3002_vm6, %v3086_v23, 0.0  ;;  %v3032_v38 = vsel %vm3002_vm6, %v7630_v48, 0.0 }
 0x1fc   : > { %v7651_v29 = vpop.f32.mrf.mxu1  ;;  %v6035_v56 = vpop.f32.mrf.mxu0  ;;  %v3031_v45 = vadd.f32 %v3030_v43, %v3029_v19  ;;  %v3130_v41 = vadd.f32 %v3129_v30, %v3128_v26  ;;  %v7656_v28 = vadd.f32 %v6034_v51, %v2586_v39  ;;  %v2188_v9 = vadd.f32 %v7436_v59, %v7494_v57 }
 0x1fd   : > { %v3088_v27 = vmul.f32 %v7649_v46, %v7649_v46  ;;  %v2186_v47 = vadd.f32 %v7494_v57, %v7443_v16  ;;  %v3133_v23 = vsel %vm3002_vm6, %v3087_v31, 0.0  ;;  %v3034_v17 = vsel %vm3002_vm6, %v7649_v46, 0.0 }
 0x1fe   : > { %v2537_v1 = vpop.f32.mrf.mxu1  ;;  %v2910_v3 = vpop.f32.mrf.mxu0  ;;  %v3132_v61 = vadd.f32 %v3131_v42, %v3130_v41  ;;  %v3033_v35 = vadd.f32 %v3032_v38, %v3031_v45  ;;  %v7667_v51 = vadd.f32 %v6035_v56, %v2587_v10  ;;  %v2189_v30 = vadd.f32 %v7449_v62, %v7494_v57 }
 0x1ff   : > { %v7669_v53 = vadd.f32 %v2910_v3, %v2585_v32  ;;  %v2588_v59 = vadd.f32 %v2521_v13, %v2186_v47  ;;  %v3090_v16 = vmul.f32 %v7656_v28, %v7656_v28  ;;  %v3135_v31 = vsel %vm3002_vm6, %v3088_v27, 0.0 }
 0x200   : > { %v5999_v26 = vpop.f32.mrf.mxu1  ;;  %v6038_v19 = vpop.f32.mrf.mxu0  ;;  %v3035_v39 = vadd.f32 %v3034_v17, %v3033_v35  ;;  %v3134_v43 = vadd.f32 %v3133_v23, %v3132_v61  ;;  %v2187_v41 = vadd.f32 %v7494_v57, %v7451_v50  ;;  %v2590_v38 = vadd.f32 %v7612_v55, %v2188_v9 }
 0x201   : > { %9034 = vst [vmem:[#allocation37_spill] sm:$0xff] %v7669_v53  ;;  %v3036_v45 = vsel %vm3002_vm6, %v7669_v53, 0.0  ;;  %v3089_v56 = vmul.f32 %v7669_v53, %v7669_v53  ;;  %v3038_v27 = vsel %vm3002_vm6, %v7656_v28, 0.0  ;;  %v3091_v3 = vmul.f32 %v7667_v51, %v7667_v51 }
 0x202   : > { %v2540_v10 = vpop.f32.mrf.mxu1  ;;  %v2923_v32 = vpop.f32.mrf.mxu0  ;;  %v3136_v62 = vadd.f32 %v3135_v31, %v3134_v43  ;;  %v3037_v13 = vadd.f32 %v3036_v45, %v3035_v39  ;;  %v2591_v35 = vadd.f32 %v5995_v21, %v2189_v30  ;;  %v2589_v23 = vadd.f32 %v2524_v34, %v2187_v41 }
 0x203   : > { %v7682_v42 = vadd.f32 %v2923_v32, %v2588_v59  ;;  %v3137_v47 = vsel %vm3002_vm6, %v3089_v56, 0.0  ;;  %v3139_v50 = vsel %vm3002_vm6, %v3090_v16, 0.0  ;;  %v3040_v59 = vsel %vm3002_vm6, %v7667_v51, 0.0 }
 0x204   : > { %v6039_v61 = vpop.f32.mrf.mxu0  ;;  %v3039_v17 = vadd.f32 %v3038_v27, %v3037_v13  ;;  %v3138_v53 = vadd.f32 %v3137_v47, %v3136_v62  ;;  %v7693_v39 = vadd.f32 %v6038_v19, %v2590_v38  ;;  %v6002_v9 = vpop.f32.mrf.mxu1  ;;  %v2192_v31 = vadd.f32 %v7455_v7, %v7494_v57 }
 0x205   : > { %v3092_v55 = vmul.f32 %v7682_v42, %v7682_v42  ;;  %v2190_v21 = vadd.f32 %v7494_v57, %v7459_v11  ;;  %v3141_v16 = vsel %vm3002_vm6, %v3091_v3, 0.0  ;;  %v3042_v45 = vsel %vm3002_vm6, %v7682_v42, 0.0 }
 0x206   : > { %v2926_v43 = vpop.f32.mrf.mxu0  ;;  %v3140_v34 = vadd.f32 %v3139_v50, %v3138_v53  ;;  %v3041_v30 = vadd.f32 %v3040_v59, %v3039_v17  ;;  %v7704_v19 = vadd.f32 %v6039_v61, %v2591_v35  ;;  %v2193_v41 = vadd.f32 %v7463_v6, %v7494_v57  ;;  %v2553_v38 = vpop.f32.mrf.mxu1 }
 0x207   : > { %v7706_v56 = vadd.f32 %v2926_v43, %v2589_v23  ;;  %v2592_v62 = vadd.f32 %v2537_v1, %v2190_v21  ;;  %v3094_v11 = vmul.f32 %v7693_v39, %v7693_v39  ;;  %v3143_v53 = vsel %vm3002_vm6, %v3092_v55, 0.0 }
 0x208   : > { %v6042_v32 = vpop.f32.mrf.mxu0  ;;  %v3043_v7 = vadd.f32 %v3042_v45, %v3041_v30  ;;  %v3142_v13 = vadd.f32 %v3141_v16, %v3140_v34  ;;  %v2191_v61 = vadd.f32 %v7494_v57, %v7467_v12  ;;  %v2594_v6 = vadd.f32 %v7651_v29, %v2192_v31  ;;  %v6003_v31 = vpop.f32.mrf.mxu1 }
 0x209   : > { %v3044_v27 = vsel %vm3002_vm6, %v7706_v56, 0.0  ;;  %v3093_v3 = vmul.f32 %v7706_v56, %v7706_v56  ;;  %v3046_v23 = vsel %vm3002_vm6, %v7693_v39, 0.0  ;;  %v3095_v17 = vmul.f32 %v7704_v19, %v7704_v19 }
 0x20a   : > { %v2939_v47 = vpop.f32.mrf.mxu0  ;;  %v3144_v1 = vadd.f32 %v3143_v53, %v3142_v13  ;;  %v3045_v35 = vadd.f32 %v3044_v27, %v3043_v7  ;;  %v2595_v43 = vadd.f32 %v5999_v26, %v2193_v41  ;;  %v2593_v21 = vadd.f32 %v2540_v10, %v2191_v61 }
 0x20b   : > { %v3145_v50 = vsel %vm3002_vm6, %v3093_v3, 0.0  ;;  %v7725_v59 = vadd.f32 %v2939_v47, %v2592_v62  ;;  %v3147_v12 = vsel %vm3002_vm6, %v3094_v11, 0.0  ;;  %v3048_v29 = vsel %vm3002_vm6, %v7704_v19, 0.0 }
 0x20c   : > { %v6043_v55 = vpop.f32.mrf.mxu0  ;;  %v3047_v34 = vadd.f32 %v3046_v23, %v3045_v35  ;;  %v3146_v30 = vadd.f32 %v3145_v50, %v3144_v1  ;;  %v7730_v16 = vadd.f32 %v6042_v32, %v2594_v6  ;;  %v2196_v62 = vadd.f32 %v7471_v44, %v7494_v57  ;;  %v2556_v6 = vpop.f32.mrf.mxu1 }
 0x20d   : > { %v3096_v45 = vmul.f32 %v7725_v59, %v7725_v59  ;;  %v2194_v26 = vadd.f32 %v7494_v57, %v7475_v37  ;;  %v3149_v13 = vsel %vm3002_vm6, %v3095_v17, 0.0  ;;  %v3050_v11 = vsel %vm3002_vm6, %v7725_v59, 0.0 }
 0x20e   : > { %v2942_v7 = vpop.f32.mrf.mxu0  ;;  %v3148_v10 = vadd.f32 %v3147_v12, %v3146_v30  ;;  %v3049_v41 = vadd.f32 %v3048_v29, %v3047_v34  ;;  %v7741_v53 = vadd.f32 %v6043_v55, %v2595_v43  ;;  %v2197_v3 = vadd.f32 %v7477_v52, %v7494_v57 }
 0x20f   : > { %v7743_v32 = vadd.f32 %v2942_v7, %v2593_v21  ;;  %v2596_v47 = vadd.f32 %v2553_v38, %v2194_v26  ;;  %v3098_v37 = vmul.f32 %v7730_v16, %v7730_v16  ;;  %v3151_v1 = vsel %vm3002_vm6, %v3096_v45, 0.0 }
 0x210   : > { %v6046_v27 = vpop.f32.mrf.mxu0  ;;  %v3051_v44 = vadd.f32 %v3050_v11, %v3049_v41  ;;  %v3150_v61 = vadd.f32 %v3149_v13, %v3148_v10  ;;  %v2195_v50 = vadd.f32 %v7494_v57, %v7481_v33  ;;  %v2598_v52 = vadd.f32 %v6002_v9, %v2196_v62 }
 0x211   : > { %v3052_v35 = vsel %vm3002_vm6, %v7743_v32, 0.0  ;;  %v3097_v23 = vmul.f32 %v7743_v32, %v7743_v32  ;;  %v3054_v43 = vsel %vm3002_vm6, %v7730_v16, 0.0  ;;  %v3099_v21 = vmul.f32 %v7741_v53, %v7741_v53 }
 0x212   : > { %v2955_v17 = vpop.f32.mrf.mxu0  ;;  %v3152_v38 = vadd.f32 %v3151_v1, %v3150_v61  ;;  %v3053_v55 = vadd.f32 %v3052_v35, %v3051_v44  ;;  %v2599_v29 = vadd.f32 %v6003_v31, %v2197_v3  ;;  %v2597_v45 = vadd.f32 %v2556_v6, %v2195_v50 }
 0x213   : > { %v3153_v34 = vsel %vm3002_vm6, %v3097_v23, 0.0  ;;  %v7761_v30 = vadd.f32 %v2955_v17, %v2596_v47  ;;  %v3155_v57 = vsel %vm3002_vm6, %v3098_v37, 0.0  ;;  %v3056_v33 = vsel %vm3002_vm6, %v7741_v53, 0.0 }
 0x214   : > { %v6047_v12 = vpop.f32.mrf.mxu0  ;;  %v3055_v7 = vadd.f32 %v3054_v43, %v3053_v55  ;;  %v3154_v26 = vadd.f32 %v3153_v34, %v3152_v38  ;;  %v7766_v9 = vadd.f32 %v6046_v27, %v2598_v52  ;;  %v3157_v11 = vsel %vm3002_vm6, %v3099_v21, 0.0 }
 0x215   : > { %v3100_v62 = vmul.f32 %v7761_v30, %v7761_v30  ;;  %v3058_v31 = vsel %vm3002_vm6, %v7761_v30, 0.0  ;;  %v7773_v3 = vadd.f32 %v6047_v12, %v2599_v29 }
 0x216   : > { %v2958_v10 = vpop.f32.mrf.mxu0  ;;  %v3156_v41 = vadd.f32 %v3155_v57, %v3154_v26  ;;  %v3057_v13 = vadd.f32 %v3056_v33, %v3055_v7  ;;  %v3102_v27 = vmul.f32 %v7766_v9, %v7766_v9  ;;  %v3062_v17 = vsel %vm3002_vm6, %v7766_v9, 0.0 }
 0x217   : > { %v7775_v47 = vadd.f32 %v2958_v10, %v2597_v45  ;;  %v3159_v37 = vsel %vm3002_vm6, %v3100_v62, 0.0  ;;  %v3103_v50 = vmul.f32 %v7773_v3, %v7773_v3  ;;  %v3064_v21 = vsel %vm3002_vm6, %v7773_v3, 0.0 }
 0x218   : > { %v3059_v44 = vadd.f32 %v3058_v31, %v3057_v13  ;;  %v3158_v61 = vadd.f32 %v3157_v11, %v3156_v41  ;;  %v3163_v43 = vsel %vm3002_vm6, %v3102_v27, 0.0 }
 0x219   : > { %v3060_v6 = vsel %vm3002_vm6, %v7775_v47, 0.0  ;;  %v3101_v1 = vmul.f32 %v7775_v47, %v7775_v47  ;;  %v3165_v29 = vsel %vm3002_vm6, %v3103_v50, 0.0 }
 0x21a   : > { %v3160_v35 = vadd.f32 %v3159_v37, %v3158_v61  ;;  %v3061_v23 = vadd.f32 %v3060_v6, %v3059_v44  ;;  %v9035_v44 = vmov 0.0  }
 0x21b   : > { %v3161_v52 = vsel %vm3002_vm6, %v3101_v1, 0.0 }
 0x21c   : > { %v3063_v38 = vadd.f32 %v3062_v17, %v3061_v23  ;;  %v3162_v55 = vadd.f32 %v3161_v52, %v3160_v35 }
 0x21e   : > { %v3065_v34 = vadd.f32 %v3064_v21, %v3063_v38  ;;  %v3164_v12 = vadd.f32 %v3163_v43, %v3162_v55  ;;  %v3478_v55 = vld [vmem:[%s8676_s3] sm:$0x1] }
 0x220   : > { %v3066_v45 = vrot.slane %v3065_v34, 4  ;;  %v3166_v7 = vadd.f32 %v3165_v29, %v3164_v12  ;;  %v3480_v29 = vld [vmem:[%s8677_s4] sm:$0x1] }
 0x222   : > { %v3067_v26 = vadd.f32 %v3066_v45, %v3065_v34  ;;  %v3167_v57 = vrot.slane %v3166_v7, 4  ;;  %v3485_v45 = vsub.s32 0, %v6330_v2 }
 0x224   : > { %v3068_v33 = vrot.slane %v3067_v26, 2  ;;  %v3168_v62 = vadd.f32 %v3167_v57, %v3166_v7 }
 0x226   : > { %v3069_v10 = vadd.f32 %v3068_v33, %v3067_v26  ;;  %v3169_v41 = vrot.slane %v3168_v62, 2 }
 0x228   : > { %v3070_v13 = vrot.slane %v3069_v10, 1  ;;  %v3170_v31 = vadd.f32 %v3169_v41, %v3168_v62 }
 0x22a   : > { %v3071_v11 = vadd.f32 %v3070_v13, %v3069_v10  ;;  %v3171_v61 = vrot.slane %v3170_v31, 1 }
 0x22c   : > { %6057 = vmatmul.mubr.msk.f32.vlgmr.msra.gmra.mxu1 %vm3002_vm6, %v3071_v11  ;;  %v3172_v27 = vadd.f32 %v3171_v61, %v3170_v31 }
 0x22d   : > { %6060 = vmatpush3.msra.mxu1 %v7417_v49  ;;  %6067 = vmatprep.mubr.msk.f32.mxu1 %vm6266_vm13, %v9035_v44  ;;  %v3330_v49 = vld [vmem:[%s8679_s6] sm:$0xff] }
 0x22e   : > { %6061 = vmatprep.subr.mxu1 %v9035_v44 }
 0x22f   : > { %6062 = vmatpush3.msra.mxu1 %v7425_v58 }
 0x230   : > { %6063 = vmatprep.subr.mxu1 %v9035_v44 }
 0x231   : > { %6064 = vmatpush3.msra.mxu1 %v7432_v25 }
 0x232   : > { %6065 = vmatprep.subr.mxu1 %v9035_v44 }
 0x233   : > { %6066 = vmatpush3.msra.mxu1 %v7441_v36 }
 0x234   : > { %6068 = vmatmul.mubr.msk.f32.vlgmr.msra.gmra.mxu1 %vm3002_vm6, %v3172_v27  ;;  %6070 = vmatprep.subr.mxu1 %v9035_v44  ;;  %vm9048_vm6 = vmmov %vm9042_vm0 }
 0x235   : > { %6072 = vmatprep.mubr.msk.f32.mxu1 %vm6266_vm13, %v9035_v44  ;;  %6071 = vmatpush3.msra.mxu1 %v3330_v49 }
 0x236   : > { %6075 = vmatprep.subr.mxu1 %v9035_v44 }
 0x2ec   : > { %v3246_v58 = vpop.f32.mrf.mxu1 }
 0x2ed   : > { %v3324_v25 = vmul.f32 0.0009765625, %v3246_v58 }
 0x2ee   : > { %v6058_v37 = vpop.f32.mrf.mxu1 }
 0x2ef   : > { %6073 = vmatmul.mubr.msk.f32.vlgmr.msra.gmra.mxu1 %vm3331_vm4, %v3324_v25  ;;  %v3326_v6 = vmul.f32 %v3324_v25, %v3324_v25 }
 0x2f0   : > { %6076 = vmatpush3.msra.mxu1 %v3330_v49  ;;  %6077 = vmatprep.mubr.msk.f32.mxu1 %vm6266_vm13, %v9035_v44  ;;  %vm9047_vm13 = vcmask 257024  }
 0x2f4   : > { %v3319_v36 = vpop.f32.mrf.mxu1 }
 0x2f5   : > { %v3325_v1 = vmul.f32 0.0009765625, %v3319_v36 }
 0x2f6   : > { %v6069_v35 = vpop.f32.mrf.mxu1 }
 0x2f7   : > { %v3327_v23 = vsub.f32 %v3325_v1, %v3326_v6 }
 0x2f9   : > { %v3328_v17 = vadd.f32 1e-05, %v3327_v23 }
 0x2fb   : > { %6252 = vrsqrt.f32 %v3328_v17 }
 0x308   : > { %v6253_v50 = vpop.eup %6252 }
 0x309   : > { %6078 = vmatmul.mubr.msk.f32.vlgmr.msra.gmra.mxu1 %vm3331_vm4, %v6253_v50  ;;  %vm9052_vm4 = vmmov %vm9047_vm13 }
 0x3af   : > { %v3401_v52 = vpop.f32.mrf.mxu1 }
 0x3b1   : > { %v6074_v38 = vpop.f32.mrf.mxu1 }
 0x3c9   : > { %v3474_v43 = vpop.f32.mrf.mxu1 }
 0x3ca   : > { %v3479_v21 = vmul.f32 %v3478_v55, %v3474_v43 }
 0x3cb   : > { %v6079_v34 = vpop.f32.mrf.mxu1 }
 0x3cc   : > { %v3481_v12 = vmul.f32 %v3479_v21, %v3401_v52  ;;  %v7820_v26 = vrot.slane %v3479_v21, %v3485_v45 }
 0x3ce   : > { %v3482_v7 = vsub.f32 %v3480_v29, %v3481_v12  ;;  %v3500_v33 = vmul.f32 %v7820_v26, %v7623_v5  ;;  %v3502_v62 = vmul.f32 %v7820_v26, %v7630_v48  ;;  %v3499_v13 = vmul.f32 %v7820_v26, %v7610_v22 }
 0x3cf   : > { %v3517_v11 = vmul.f32 %v7820_v26, %v7766_v9  ;;  %v3515_v22 = vmul.f32 %v7820_v26, %v7761_v30  ;;  %v3516_v9 = vmul.f32 %v7820_v26, %v7775_v47  ;;  %v3497_v25 = vmul.f32 %v7820_v26, %v7580_v63 }
 0x3d0   : > { %v7822_v57 = vrot.slane %v3482_v7, %v3485_v45  ;;  %v3498_v37 = vmul.f32 %v7820_v26, %v7587_v4  ;;  %v3513_v1 = vmul.f32 %v7820_v26, %v7730_v16  ;;  %v3514_v35 = vmul.f32 %v7820_v26, %v7741_v53  ;;  %v9036_v4 = vld [vmem:[#allocation36_spill] sm:$0xff] }
 0x3d1   : > { %v3487_v63 = vmul.f32 %v7820_v26, %v7502_v54  ;;  %v3488_v23 = vmul.f32 %v7820_v26, %v9036_v4  ;;  %v3489_v17 = vmul.f32 %v7820_v26, %v7506_v20  ;;  %v3490_v50 = vmul.f32 %v7820_v26, %v7510_v0 }
 0x3d2   : > { %v3538_v10 = vadd.f32 %v7822_v57, %v3500_v33  ;;  %v7830_v41 = vadd.f32 %v7822_v57, %v3502_v62  ;;  %v3537_v31 = vadd.f32 %v7822_v57, %v3499_v13  ;;  %v7838_v44 = vadd.f32 %v7822_v57, %v3517_v11 }
 0x3d3   : > { %v3553_v27 = vadd.f32 %v7822_v57, %v3515_v22  ;;  %v3554_v49 = vadd.f32 %v7822_v57, %v3516_v9  ;;  %v3535_v30 = vadd.f32 %v7822_v57, %v3497_v25  ;;  %v3536_v36 = vadd.f32 %v7822_v57, %v3498_v37 }
 0x3d4   : > { %v7840_v5 = vmax.f32 %v3538_v10, 0.0  ;;  %v7845_v61 = vmax.f32 %v3537_v31, 0.0  ;;  %v3551_v52 = vadd.f32 %v7822_v57, %v3513_v1  ;;  %v3552_v38 = vadd.f32 %v7822_v57, %v3514_v35 }
 0x3d5   : > { %v7862_v47 = vmax.f32 %v3553_v27, 0.0  ;;  %v7864_v6 = vmax.f32 %v3554_v49, 0.0  ;;  %v7880_v16 = vmax.f32 %v3535_v30, 0.0  ;;  %v7882_v55 = vmax.f32 %v3536_v36, 0.0 }
 0x3d6   : > { %v5725_v48 = vpack.c.bf16 %v7840_v5, %v7840_v5  ;;  %v5724_v58 = vpack.c.bf16 %v7845_v61, %v7845_v61  ;;  %v3491_v20 = vmul.f32 %v7820_v26, %v7532_v24  ;;  %v3492_v0 = vmul.f32 %v7820_v26, %v7550_v60  ;;  %v9037_v60 = vld [vmem:[#allocation37_spill] sm:$0xff] }
 0x3d7   : > { %v5741_v54 = vpack.c.bf16 %v7864_v6, %v7864_v6  ;;  %v5740_v53 = vpack.c.bf16 %v7862_v47, %v7862_v47  ;;  %v3495_v43 = vmul.f32 %v7820_v26, %v7568_v15  ;;  %v3496_v21 = vmul.f32 %v7820_v26, %v7589_v40 }
 0x3d8   : > { %4063 = vrot.lane.b32.xlu1 %v5725_v48, %s6262_s21  ;;  %4061 = vrot.lane.b32.xlu0 %v5724_v58, %s6262_s21  ;;  %v3493_v34 = vmul.f32 %v7820_v26, %v7539_v8  ;;  %v3494_v12 = vmul.f32 %v7820_v26, %v7548_v14  ;;  %v3501_v29 = vmul.f32 %v7820_v26, %v7617_v18  ;;  %v7910_v45 = vmax.f32 %v3551_v52, 0.0 }
 0x3d9   : > { %v3503_v24 = vmul.f32 %v7820_v26, %v7649_v46  ;;  %v3504_v15 = vmul.f32 %v7820_v26, %v9037_v60  ;;  %v3533_v40 = vadd.f32 %v7822_v57, %v3495_v43  ;;  %v3534_v8 = vadd.f32 %v7822_v57, %v3496_v21 }
 0x3da   : > { %v7912_v14 = vmax.f32 %v3552_v38, 0.0  ;;  %v5723_v18 = vpack.c.bf16 %v7882_v55, %v7882_v55  ;;  %v5722_v7 = vpack.c.bf16 %v7880_v16, %v7880_v16  ;;  %v3505_v46 = vmul.f32 %v7820_v26, %v7656_v28 }
 0x3db   : > { %v3506_v33 = vmul.f32 %v7820_v26, %v7667_v51  ;;  %v3511_v62 = vmul.f32 %v7820_v26, %v7725_v59  ;;  %v3512_v10 = vmul.f32 %v7820_v26, %v7743_v32  ;;  %v3507_v13 = vmul.f32 %v7820_v26, %v7682_v42 }
 0x3dc   : > { %4095 = vrot.lane.b32.xlu1 %v5741_v54, %s6262_s21  ;;  %4093 = vrot.lane.b32.xlu0 %v5740_v53, %s6262_s21  ;;  %v3508_v11 = vmul.f32 %v7820_v26, %v7706_v56  ;;  %v3509_v31 = vmul.f32 %v7820_v26, %v7693_v39  ;;  %v3510_v28 = vmul.f32 %v7820_v26, %v7704_v19  ;;  %v7940_v32 = vmax.f32 %v3533_v40, 0.0 }
 0x3dd   : > { %v3518_v51 = vmul.f32 %v7820_v26, %v7773_v3  ;;  %v3549_v59 = vadd.f32 %v7822_v57, %v3511_v62  ;;  %v3550_v42 = vadd.f32 %v7822_v57, %v3512_v10  ;;  %v7942_v56 = vmax.f32 %v3534_v8, 0.0 }
 0x3de   : > { %v5739_v39 = vpack.c.bf16 %v7912_v14, %v7912_v14  ;;  %v5738_v48 = vpack.c.bf16 %v7910_v45, %v7910_v45  ;;  %v3525_v22 = vadd.f32 %v7822_v57, %v3487_v63  ;;  %v3526_v19 = vadd.f32 %v7822_v57, %v3488_v23 }
 0x3df   : > { %v3527_v3 = vadd.f32 %v7822_v57, %v3489_v17  ;;  %v3528_v26 = vadd.f32 %v7822_v57, %v3490_v50  ;;  %v3529_v9 = vadd.f32 %v7822_v57, %v3491_v20  ;;  %v3530_v27 = vadd.f32 %v7822_v57, %v3492_v0 }
 0x3e0   : > { %4059 = vrot.lane.b32.xlu1 %v5723_v18, %s6262_s21  ;;  %4057 = vrot.lane.b32.xlu0 %v5722_v7, %s6262_s21  ;;  %v3531_v49 = vadd.f32 %v7822_v57, %v3493_v34  ;;  %v3532_v58 = vadd.f32 %v7822_v57, %v3494_v12  ;;  %v3539_v25 = vadd.f32 %v7822_v57, %v3501_v29  ;;  %v7961_v36 = vmax.f32 %v3549_v59, 0.0 }
 0x3e1   : > { %v3541_v37 = vadd.f32 %v7822_v57, %v3503_v24  ;;  %v3542_v30 = vadd.f32 %v7822_v57, %v3504_v15  ;;  %v7963_v1 = vmax.f32 %v3550_v42, 0.0  ;;  %v5721_v35 = vpack.c.bf16 %v7942_v56, %v7942_v56 }
 0x3e2   : > { %v5720_v63 = vpack.c.bf16 %v7940_v32, %v7940_v32  ;;  %v3543_v4 = vadd.f32 %v7822_v57, %v3505_v46  ;;  %v3544_v23 = vadd.f32 %v7822_v57, %v3506_v33  ;;  %v3545_v17 = vadd.f32 %v7822_v57, %v3507_v13 }
 0x3e3   : > { %v3548_v50 = vadd.f32 %v7822_v57, %v3510_v28  ;;  %v3546_v52 = vadd.f32 %v7822_v57, %v3508_v11  ;;  %v3547_v38 = vadd.f32 %v7822_v57, %v3509_v31  ;;  %v3556_v54 = vadd.f32 %v7822_v57, %v3518_v51 }
 0x3e4   : > { %4091 = vrot.lane.b32.xlu1 %v5739_v39, %s6262_s21  ;;  %4089 = vrot.lane.b32.xlu0 %v5738_v48, %s6262_s21  ;;  %v7976_v53 = vmax.f32 %v3525_v22, 0.0  ;;  %v7980_v20 = vmax.f32 %v3526_v19, 0.0  ;;  %v7982_v0 = vmax.f32 %v3527_v3, 0.0  ;;  %v7984_v43 = vmax.f32 %v3528_v26, 0.0 }
 0x3e5   : > { %v7986_v21 = vmax.f32 %v3529_v9, 0.0  ;;  %v7988_v34 = vmax.f32 %v3531_v49, 0.0  ;;  %v7990_v12 = vmax.f32 %v3532_v58, 0.0  ;;  %v5737_v57 = vpack.c.bf16 %v7963_v1, %v7963_v1 }
 0x3e6   : > { %v5736_v29 = vpack.c.bf16 %v7961_v36, %v7961_v36  ;;  %v7996_v24 = vmax.f32 %v3530_v27, 0.0  ;;  %v7998_v60 = vmax.f32 %v3539_v25, 0.0  ;;  %v8001_v15 = vmax.f32 %v7830_v41, 0.0 }
 0x3e7   : > { %v8003_v40 = vmax.f32 %v3548_v50, 0.0  ;;  %v8005_v8 = vmax.f32 %v3541_v37, 0.0  ;;  %v8007_v18 = vmax.f32 %v3542_v30, 0.0  ;;  %v8009_v7 = vmax.f32 %v3547_v38, 0.0 }
 0x3e8   : > { %4055 = vrot.lane.b32.xlu1 %v5721_v35, %s6262_s21  ;;  %4053 = vrot.lane.b32.xlu0 %v5720_v63, %s6262_s21  ;;  %v8011_v46 = vmax.f32 %v3556_v54, 0.0  ;;  %v8015_v33 = vmax.f32 %v3543_v4, 0.0  ;;  %v8017_v62 = vmax.f32 %v3544_v23, 0.0  ;;  %v8019_v41 = vmax.f32 %v3545_v17, 0.0 }
 0x3e9   : > { %v8021_v10 = vmax.f32 %v3546_v52, 0.0  ;;  %v8024_v13 = vmax.f32 %v7838_v44, 0.0  ;;  %v5719_v31 = vpack.c.bf16 %v7990_v12, %v7990_v12  ;;  %v5718_v28 = vpack.c.bf16 %v7988_v34, %v7988_v34 }
 0x3ea   : > { %v5735_v59 = vpack.c.bf16 %v8003_v40, %v8003_v40  ;;  %v3698_v42 = vrot.slane %v7840_v5, 1  ;;  %v8755_v39 = vrot.slane %v7998_v60, 1  ;;  %v8758_v44 = vrot.slane %v8011_v46, 1 }
 0x3eb   : > { %v5734_v48 = vpack.c.bf16 %v8009_v7, %v8009_v7  ;;  %v5717_v22 = vpack.c.bf16 %v7996_v24, %v7996_v24  ;;  %v5716_v19 = vpack.c.bf16 %v7986_v21, %v7986_v21  ;;  %v5733_v3 = vpack.c.bf16 %v8021_v10, %v8021_v10 }
 0x3ec   : > { %4087 = vrot.lane.b32.xlu1 %v5737_v57, %s6262_s21  ;;  %4085 = vrot.lane.b32.xlu0 %v5736_v29, %s6262_s21  ;;  %v5732_v26 = vpack.c.bf16 %v8019_v41, %v8019_v41  ;;  %v5715_v9 = vpack.c.bf16 %v7984_v43, %v7984_v43  ;;  %v5714_v27 = vpack.c.bf16 %v7982_v0, %v7982_v0  ;;  %v3601_v37 = vrot.slane %v7845_v61, 7 }
 0x3ed   : > { %v5731_v49 = vpack.c.bf16 %v8017_v62, %v8017_v62  ;;  %v5730_v58 = vpack.c.bf16 %v8015_v33, %v8015_v33  ;;  %v5713_v25 = vpack.c.bf16 %v7980_v20, %v7980_v20  ;;  %v5712_v30 = vpack.c.bf16 %v7976_v53, %v7976_v53 }
 0x3ee   : > { %v5729_v35 = vpack.c.bf16 %v8007_v18, %v8007_v18  ;;  %v3734_v63 = vsel %vm9038_vm10, %v3698_v42, %v8755_v39  ;;  %v3697_v4 = vrot.slane %v7845_v61, 1  ;;  %v3714_v23 = vrot.slane %v7864_v6, 1  ;;  %vm9053_vm10 = vmmov %vm9052_vm4 }
 0x3ef   : > { %v3715_v17 = vrot.slane %v8024_v13, 1  ;;  %v8757_v50 = vrot.slane %v7862_v47, 1  ;;  %v8756_v52 = vrot.slane %v7840_v5, 7  ;;  %v8760_v54 = vrot.slane %v7882_v55, 1 }
 0x3f0   : > { %4051 = vrot.lane.b32.xlu1 %v5719_v31, %s6262_s21  ;;  %4049 = vrot.lane.b32.xlu0 %v5718_v28, %s6262_s21  ;;  %v3600_v57 = vrot.slane %v7882_v55, 7  ;;  %v3617_v61 = vrot.slane %v7862_v47, 7  ;;  %v8082_v31 = vsel %vm7025_vm8, %v3734_v63, 0.0  ;;  %v8092_v39 = vsel %vm9041_vm3, %v3697_v4, %v3698_v42  ;;  %vm9043_vm8 = vmmov %vm9041_vm3 }
 0x3f1   : > { %v3616_v63 = vrot.slane %v7912_v14, 7  ;;  %v3718_v29 = vsel %vm9043_vm8, %v3714_v23, %v3715_v17  ;;  %v3599_v38 = vrot.slane %v7880_v16, 7  ;;  %v3598_v42 = vrot.slane %v7942_v56, 7  ;;  %vm9057_vm3 = vmmov %vm9052_vm4 }
 0x3f2   : > { %v3640_v51 = vsel %vm9042_vm0, %v3600_v57, %v3601_v37  ;;  %vm9060_vm8 = vmmov %vm9048_vm6 }
 0x3f3   : > { %v3624_v28 = vsel %vm9048_vm6, %v3616_v63, %v3617_v61 }
 0x3f4   : > { %4083 = vrot.lane.b32.xlu1 %v5735_v59, %s6262_s21  ;;  %4081 = vrot.lane.b32.xlu0 %v5734_v48, %s6262_s21  ;;  %v3639_v59 = vsel %vm9040_vm2, %v3601_v37, %v8756_v52  ;;  %v8759_v48 = vrot.slane %v7864_v6, 7  ;;  %v8105_v52 = vsel %vm9044_vm1, %v8757_v50, %v3714_v23  ;;  %v5757_v23 = vpack.c.bf16 %v8082_v31, %v8082_v31  ;;  %vm9055_vm2 = vmmov %vm9044_vm1  ;;  %v9120_v31 = vld [vmem:[#allocation14_spill] sm:$0xff] }
 0x3f5   : > { %v5693_v11 = vpack.c.bf16 %v3639_v59, %v3639_v59  ;;  %v3665_v59 = vsel %vm7030_vm9, %v3640_v51, 0.0  ;;  %v3681_v51 = vsel %vm7078_vm7, %v3624_v28, 0.0  ;;  %vm9050_vm9 = vmmov %vm9044_vm1 }
 0x3f6   : > { %v3623_v37 = vsel %vm9046_vm14, %v3617_v61, %v8759_v48  ;;  %v5708_v50 = vpack.c.bf16 %v3681_v51, %v3681_v51  ;;  %vm9054_vm7 = vmmov %vm9042_vm0  ;;  %v3596_v61 = vrot.slane %v7990_v12, 7 }
 0x3f7   : > { %3922 = vst.msk [vmem:[#allocation3 + $0x3c] sm:$0xf] %vm9047_vm13, %v5693_v11  ;;  %v8126_v11 = vsel %vm9050_vm9, %v3715_v17, %v8758_v44  ;;  %v3641_v28 = vsel %vm9054_vm7, %v3599_v38, %v3600_v57  ;;  %v8144_v17 = vsel %vm9055_vm2, %v8760_v54, %v3697_v4  ;;  %v3612_v44 = vrot.slane %v8003_v40, 7  ;;  %vm9061_vm1 = vmmov %vm9048_vm6 }
 0x3f8   : > { %4047 = vrot.lane.b32.xlu1 %v5717_v22, %s6262_s21  ;;  %4045 = vrot.lane.b32.xlu0 %v5716_v19, %s6262_s21  ;;  %v5692_v22 = vpack.c.bf16 %v3665_v59, %v3665_v59  ;;  %v5709_v19 = vpack.c.bf16 %v3623_v37, %v3623_v37  ;;  %v5756_v59 = vpack.c.bf16 %v8092_v39, %v8092_v39  ;;  %v8132_v37 = vsel %vm7172_vm15, %v3718_v29, 0.0  ;;  %vm9056_vm15 = vmmov %vm9042_vm0 }
 0x3f9   : > { %v5691_v29 = vpack.c.bf16 %v3641_v28, %v3641_v28  ;;  %3937 = vst.msk [vmem:[#allocation3 + $0x78] sm:$0xf] %vm9057_vm3, %v5708_v50  ;;  %vm9059_vm0 = vmmov %vm9057_vm3  ;;  %v3619_v39 = vrot.slane %v8024_v13, 7 }
 0x3fa   : > { %3921 = vst.msk [vmem:[#allocation3 + $0x38] sm:$0xf] %vm9052_vm4, %v5692_v22  ;;  %v3642_v22 = vsel %vm9056_vm15, %v3598_v42, %v3599_v38  ;;  %v3613_v38 = vrot.slane %v7961_v36, 7  ;;  %vm9063_vm14 = vmmov %vm9061_vm1 }
 0x3fb   : > { %3938 = vst.msk [vmem:[#allocation3 + $0x7c] sm:$0xf] %vm9053_vm10, %v5709_v19  ;;  %v3615_v19 = vrot.slane %v7910_v45, 7  ;;  %v3663_v57 = vsel %vm7003_vm11, %v3642_v22, 0.0  ;;  %vm9062_vm11 = vmmov %vm9061_vm1 }
 0x3fc   : > { %4079 = vrot.lane.b32.xlu1 %v5733_v3, %s6262_s21  ;;  %4077 = vrot.lane.b32.xlu0 %v5732_v26, %s6262_s21  ;;  %v3614_v3 = vrot.slane %v7963_v1, 7  ;;  %v3597_v26 = vrot.slane %v7940_v32, 7  ;;  %3920 = vst.msk [vmem:[#allocation3 + $0x34] sm:$0xf] %vm9059_vm0, %v5691_v29  ;;  %v5690_v4 = vpack.c.bf16 %v3663_v57, %v3663_v57  ;;  %vm9064_vm13 = vmmov %vm9059_vm0 }
 0x3fd   : > { %v3625_v28 = vsel %vm9060_vm8, %v3615_v19, %v3616_v63  ;;  %vm9067_vm6 = vmmov %vm9061_vm1  ;;  %v3611_v63 = vrot.slane %v8009_v7, 7 }
 0x3fe   : > { %v5707_v50 = vpack.c.bf16 %v3625_v28, %v3625_v28  ;;  %v3626_v22 = vsel %vm9061_vm1, %v3614_v3, %v3615_v19  ;;  %v3643_v51 = vsel %vm9062_vm11, %v3597_v26, %v3598_v42  ;;  %v3644_v48 = vsel %vm9063_vm14, %v3596_v61, %v3597_v26  ;;  %3919 = vst.msk [vmem:[#allocation3 + $0x30] sm:$0xf] %vm9064_vm13, %v5690_v4  ;;  %vm9068_vm9 = vmmov %vm9059_vm0  ;;  %v9071_v4 = vld [vmem:[#allocation22_spill] sm:$0xff] }
 0x3ff   : > { %v3679_v29 = vsel %vm7063_vm12, %v3626_v22, 0.0  ;;  %v5689_v19 = vpack.c.bf16 %v3643_v51, %v3643_v51  ;;  %v3661_v57 = vsel %vm6883_vm5, %v3644_v48, 0.0  ;;  %v3627_v26 = vsel %vm9067_vm6, %v3613_v38, %v3614_v3  ;;  %vm9069_vm4 = vmmov %vm9061_vm1 }
 0x400   : > { %4043 = vrot.lane.b32.xlu1 %v5715_v9, %s6262_s21  ;;  %4041 = vrot.lane.b32.xlu0 %v5714_v27, %s6262_s21  ;;  %3936 = vst.msk [vmem:[#allocation3 + $0x74] sm:$0xf] %vm9068_vm9, %v5707_v50  ;;  %v5706_v9 = vpack.c.bf16 %v3679_v29, %v3679_v29  ;;  %v5688_v28 = vpack.c.bf16 %v3661_v57, %v3661_v57  ;;  %vm9070_vm10 = vmmov %vm9059_vm0  ;;  %vm9072_vm7 = vnez %v9071_v4  ;;  %v3595_v51 = vrot.slane %v7988_v34, 7 }
 0x401   : > { %v5705_v54 = vpack.c.bf16 %v3627_v26, %v3627_v26  ;;  %v3628_v27 = vsel %vm9069_vm4, %v3612_v44, %v3613_v38  ;;  %3918 = vst.msk [vmem:[#allocation3 + $0x2c] sm:$0xf] %vm9070_vm10, %v5689_v19  ;;  %v3594_v48 = vrot.slane %v7996_v24, 7  ;;  %vm9073_vm5 = vmmov %vm9059_vm0  ;;  %v3610_v38 = vrot.slane %v8021_v10, 7 }
 0x402   : > { %v3677_v22 = vsel %vm9072_vm7, %v3628_v27, 0.0  ;;  %3935 = vst.msk [vmem:[#allocation3 + $0x70] sm:$0xf] %vm9073_vm5, %v5706_v9  ;;  %vm9074_vm12 = vmmov %vm9059_vm0  ;;  %v3593_v50 = vrot.slane %v7986_v21, 7  ;;  %v3592_v29 = vrot.slane %v7984_v43, 7  ;;  %v3609_v57 = vrot.slane %v8019_v41, 7 }
 0x403   : > { %3917 = vst.msk [vmem:[#allocation3 + $0x28] sm:$0xf] %vm9074_vm12, %v5688_v28  ;;  %vm9075_vm2 = vmmov %vm9059_vm0  ;;  %v5704_v3 = vpack.c.bf16 %v3677_v22, %v3677_v22 }
 0x404   : > { %3934 = vst.msk [vmem:[#allocation3 + $0x6c] sm:$0xf] %vm9075_vm2, %v5705_v54  ;;  %4075 = vrot.lane.b32.xlu1 %v5731_v49, %s6262_s21  ;;  %4073 = vrot.lane.b32.xlu0 %v5730_v58, %s6262_s21  ;;  %vm9076_vm15 = vmmov %vm9061_vm1  ;;  %v9080_v49 = vld [vmem:[#allocation19_spill] sm:$0xff] }
 0x405   : > { %v3645_v54 = vsel %vm9076_vm15, %v3595_v51, %v3596_v61  ;;  %vm9077_vm3 = vmmov %vm9061_vm1  ;;  %v9083_v61 = vld [vmem:[#allocation21_spill] sm:$0xff] }
 0x406   : > { %v3646_v19 = vsel %vm9077_vm3, %v3594_v48, %v3595_v51  ;;  %vm9078_vm0 = vmmov %vm9061_vm1  ;;  %v5687_v26 = vpack.c.bf16 %v3645_v54, %v3645_v54  ;;  %vm9081_vm1 = vnez %v9080_v49  ;;  %vm9084_vm14 = vnez %v9083_v61  ;;  %v9089_v54 = vld [vmem:[#allocation16_spill] sm:$0xff]  ;;  %v9097_v61 = vld [vmem:[#allocation18_spill] sm:$0xff] }
 0x407   : > { %v3629_v42 = vsel %vm9078_vm0, %v3611_v63, %v3612_v44  ;;  %vm9079_vm8 = vmmov %vm9075_vm2  ;;  %v3659_v9 = vsel %vm9081_vm1, %v3646_v19, 0.0  ;;  %vm9090_vm10 = vnez %v9089_v54  ;;  %v3606_v49 = vrot.slane %v8007_v18, 7 }
 0x408   : > { %3933 = vst.msk [vmem:[#allocation3 + $0x68] sm:$0xf] %vm9079_vm8, %v5704_v3  ;;  %v5703_v28 = vpack.c.bf16 %v3629_v42, %v3629_v42  ;;  %vm9082_vm11 = vmmov %vm9078_vm0  ;;  %v5686_v27 = vpack.c.bf16 %v3659_v9, %v3659_v9  ;;  %4039 = vrot.lane.b32.xlu1 %v5713_v25, %s6262_s21  ;;  %4037 = vrot.lane.b32.xlu0 %v5712_v30, %s6262_s21  ;;  %v3608_v42 = vrot.slane %v8017_v62, 7  ;;  %v3607_v25 = vrot.slane %v8015_v33, 7 }
 0x409   : > { %v3630_v58 = vsel %vm9082_vm11, %v3610_v38, %v3611_v63  ;;  %vm9085_vm13 = vmmov %vm9078_vm0  ;;  %v3589_v30 = vrot.slane %v7976_v53, 7  ;;  %vm9098_vm1 = vnez %v9097_v61  ;;  %v9112_v61 = vld [vmem:[#allocation13_spill] sm:$0xff] }
 0x40a   : > { %v3675_v4 = vsel %vm9084_vm14, %v3630_v58, 0.0  ;;  %v3647_v22 = vsel %vm9085_vm13, %v3593_v50, %v3594_v48  ;;  %vm9086_vm6 = vmmov %vm9078_vm0  ;;  %v3632_v9 = vsel %vm9078_vm0, %v3608_v42, %v3609_v57  ;;  %v3620_v58 = vrot.slane %v8011_v46, 7 }
 0x40b   : > { %v3648_v44 = vsel %vm9086_vm6, %v3592_v29, %v3593_v50  ;;  %vm9087_vm9 = vmmov %vm9075_vm2  ;;  %v5702_v51 = vpack.c.bf16 %v3675_v4, %v3675_v4  ;;  %v5685_v3 = vpack.c.bf16 %v3647_v22, %v3647_v22  ;;  %v3673_v4 = vsel %vm9098_vm1, %v3632_v9, 0.0 }
 0x40c   : > { %3916 = vst.msk [vmem:[#allocation3 + $0x24] sm:$0xf] %vm9087_vm9, %v5687_v26  ;;  %vm9088_vm4 = vmmov %vm9075_vm2  ;;  %v3657_v19 = vsel %vm9090_vm10, %v3648_v44, 0.0  ;;  %v3591_v26 = vrot.slane %v7982_v0, 7  ;;  %4071 = vrot.lane.b32.xlu1 %v5729_v35, %s6262_s21 }
 0x40d   : > { %3932 = vst.msk [vmem:[#allocation3 + $0x64] sm:$0xf] %vm9088_vm4, %v5703_v28  ;;  %vm9091_vm7 = vmmov %vm9078_vm0  ;;  %v5684_v48 = vpack.c.bf16 %v3657_v19, %v3657_v19 }
 0x40e   : > { %v3631_v63 = vsel %vm9091_vm7, %v3609_v57, %v3610_v38  ;;  %vm9092_vm5 = vmmov %vm9075_vm2  ;;  %3914 = vst.msk [vmem:[#allocation3 + $0x1c] sm:$0xf] %vm9075_vm2, %v5685_v3  ;;  %v3590_v38 = vrot.slane %v7980_v20, 7  ;;  %v5700_v57 = vpack.c.bf16 %v3673_v4, %v3673_v4  ;;  %v9102_v3 = vld [vmem:[#allocation15_spill] sm:$0xff] }
 0x40f   : > { %3915 = vst.msk [vmem:[#allocation3 + $0x20] sm:$0xf] %vm9092_vm5, %v5686_v27  ;;  %v5701_v50 = vpack.c.bf16 %v3631_v63, %v3631_v63  ;;  %vm9093_vm12 = vmmov %vm9075_vm2  ;;  %v3605_v27 = vrot.slane %v8005_v8, 7  ;;  %vm9103_vm13 = vnez %v9102_v3 }
 0x410   : > { %3931 = vst.msk [vmem:[#allocation3 + $0x60] sm:$0xf] %vm9093_vm12, %v5702_v51  ;;  %vm9094_vm15 = vmmov %vm9075_vm2  ;;  %4287 = vrot.lane.b32.xlu1 %v5757_v23, %s6263_s24 }
 0x411   : > { %3913 = vst.msk [vmem:[#allocation3 + $0x18] sm:$0xf] %vm9094_vm15, %v5684_v48  ;;  %vm9095_vm3 = vmmov %vm9075_vm2 }
 0x412   : > { %3930 = vst.msk [vmem:[#allocation3 + $0x5c] sm:$0xf] %vm9095_vm3, %v5701_v50  ;;  %vm9096_vm8 = vmmov %vm9078_vm0  ;;  %v9106_v50 = vld [vmem:[#allocation17_spill] sm:$0xff] }
 0x413   : > { %v3649_v28 = vsel %vm9096_vm8, %v3591_v26, %v3592_v29  ;;  %vm9099_vm11 = vmmov %vm9078_vm0  ;;  %v9101_v29 = vpack.c.bf16 %v8005_v8, %v8005_v8  ;;  %vm9107_vm4 = vnez %v9106_v50 }
 0x414   : > { %v5683_v22 = vpack.c.bf16 %v3649_v28, %v3649_v28  ;;  %v3650_v44 = vsel %vm9099_vm11, %v3590_v38, %v3591_v26  ;;  %vm9100_vm14 = vmmov %vm9078_vm0  ;;  %vm9121_vm11 = vnez %v9120_v31  ;;  %v9151_v31 = vld [vmem:[#allocation10_spill] sm:$0xff] }
 0x415   : > { %v3633_v51 = vsel %vm9100_vm14, %v3607_v25, %v3608_v42  ;;  %4069 = vrot.lane.b32.xlu0 %v9101_v29, %s6262_s21  ;;  %v3655_v54 = vsel %vm9103_vm13, %v3650_v44, 0.0  ;;  %vm9104_vm6 = vmmov %vm9078_vm0  ;;  %v9115_v29 = vrot.slane %v7882_v55, 1  ;;  %v3760_v23 = vsel %vm9121_vm11, %v8144_v17, 0.0  ;;  %v9129_v17 = vld [vmem:[#allocation28_spill] sm:$0xff] }
 0x416   : > { %v5699_v19 = vpack.c.bf16 %v3633_v51, %v3633_v51  ;;  %v3634_v63 = vsel %vm9104_vm6, %v3606_v49, %v3607_v25  ;;  %vm9105_vm9 = vmmov %vm9075_vm2  ;;  %v5682_v48 = vpack.c.bf16 %v3655_v54, %v3655_v54  ;;  %v5772_v51 = vpack.c.bf16 %v8105_v52, %v8105_v52  ;;  %v9127_v54 = vld [vmem:[#allocation30_spill] sm:$0xff] }
 0x417   : > { %3912 = vst.msk [vmem:[#allocation3 + $0x14] sm:$0xf] %vm9105_vm9, %v5683_v22  ;;  %v3671_v42 = vsel %vm9107_vm4, %v3634_v63, 0.0  ;;  %vm9108_vm10 = vmmov %vm9078_vm0 }
 0x418   : > { %v3651_v35 = vsel %vm9108_vm10, %v3589_v30, %v3590_v38  ;;  %vm9109_vm7 = vmmov %vm9078_vm0  ;;  %v5698_v9 = vpack.c.bf16 %v3671_v42, %v3671_v42  ;;  %3911 = vst.msk [vmem:[#allocation3 + $0x10] sm:$0xf] %vm9095_vm3, %v5682_v48  ;;  %v3604_v38 = vrot.slane %v8001_v15, 7  ;;  %vm9128_vm10 = vnez %v9127_v54  ;;  %v9156_v54 = vld [vmem:[#allocation12_spill] sm:$0xff] }
 0x419   : > { %v3652_v26 = vsel %vm9109_vm7, %v3620_v58, %v3589_v30  ;;  %vm9110_vm5 = vmmov %vm9075_vm2  ;;  %v5681_v28 = vpack.c.bf16 %v3651_v35, %v3651_v35  ;;  %v3603_v30 = vrot.slane %v7998_v60, 7  ;;  %4285 = vrot.lane.b32.xlu0 %v5756_v59, %s6263_s24  ;;  %v9125_v59 = vrot.slane %v7840_v5, 7 }
 0x41a   : > { %3929 = vst.msk [vmem:[#allocation3 + $0x58] sm:$0xf] %vm9110_vm5, %v5700_v57  ;;  %vm9111_vm12 = vmmov %vm9075_vm2  ;;  %vm9113_vm2 = vnez %v9112_v61  ;;  %v9116_v57 = vrot.slane %v7880_v16, 1  ;;  %v3636_v55 = vsel %vm9104_vm6, %v3604_v38, %v3605_v27  ;;  %vm9130_vm7 = vnez %v9129_v17 }
 0x41b   : > { %3928 = vst.msk [vmem:[#allocation3 + $0x54] sm:$0xf] %vm9111_vm12, %v5699_v19  ;;  %v3653_v25 = vsel %vm9113_vm2, %v3652_v26, 0.0  ;;  %vm9114_vm15 = vmmov %vm9078_vm0  ;;  %vm9117_vm0 = vcmp.lt.s32.totalorder %v6330_v2, 7  ;;  %v3669_v19 = vsel %vm9128_vm10, %v3636_v55, 0.0  ;;  %v9132_v26 = vrot.slane %v7864_v6, 7 }
 0x41c   : > { %v3635_v4 = vsel %vm9114_vm15, %v3605_v27, %v3606_v49  ;;  %v5680_v22 = vpack.c.bf16 %v3653_v25, %v3653_v25  ;;  %v5773_v49 = vpack.c.bf16 %v8132_v37, %v8132_v37  ;;  %v3737_v3 = vsel %vm9117_vm0, %v9116_v57, %v9115_v29  ;;  %vm9118_vm8 = vmmov %vm9095_vm3  ;;  %v9138_v25 = vld [vmem:[#allocation35_spill] sm:$0xff] }
 0x41d   : > { %v5697_v44 = vpack.c.bf16 %v3635_v4, %v3635_v4  ;;  %3927 = vst.msk [vmem:[#allocation3 + $0x50] sm:$0xf] %vm9118_vm8, %v5698_v9  ;;  %vm9119_vm1 = vmmov %vm9095_vm3  ;;  %v5696_v42 = vpack.c.bf16 %v3669_v19, %v3669_v19  ;;  %v3694_v9 = vrot.slane %v7942_v56, 1  ;;  %4317 = vrot.lane.b32.xlu0 %v5772_v51, %s6263_s24  ;;  %v9135_v61 = vrot.slane %v7912_v14, 1 }
 0x41e   : > { %3910 = vst.msk [vmem:[#allocation3 + $0xc] sm:$0xf] %vm9119_vm1, %v5681_v28  ;;  %vm9122_vm14 = vmmov %vm9119_vm1  ;;  %4319 = vrot.lane.b32.xlu1 %v5773_v49, %s6263_s24  ;;  %v9134_v28 = vrot.slane %v7862_v47, 1  ;;  %vm9139_vm3 = vnez %v9138_v25  ;;  %v5755_v4 = vpack.c.bf16 %v3760_v23, %v3760_v23  ;;  %v3693_v47 = vrot.slane %v7940_v32, 1 }
 0x41f   : > { %3909 = vst.msk [vmem:[#allocation3 + $0x8] sm:$0xf] %vm9122_vm14, %v5680_v22  ;;  %vm9123_vm13 = vmmov %vm9119_vm1  ;;  %v5754_v22 = vpack.c.bf16 %v3737_v3, %v3737_v3  ;;  %v9146_v49 = vrot.slane %v7910_v45, 1  ;;  %v3710_v29 = vrot.slane %v7963_v1, 1  ;;  %v9149_v32 = vmov %v9116_v57 }
 0x420   : > { %3926 = vst.msk [vmem:[#allocation3 + $0x4c] sm:$0xf] %vm9123_vm13, %v5697_v44  ;;  %vm9124_vm9 = vmmov %vm9104_vm6  ;;  %v9143_v44 = vld [vmem:[#allocation29_spill] sm:$0xff]  ;;  %v3692_v1 = vrot.slane %v7990_v12, 1  ;;  %v3708_v12 = vrot.slane %v8003_v40, 1 }
 0x421   : > { %v3637_v52 = vsel %vm9124_vm9, %v3603_v30, %v3604_v38  ;;  %vm9126_vm4 = vmmov %vm9104_vm6  ;;  %vm9144_vm11 = vnez %v9143_v44  ;;  %4281 = vrot.lane.b32.xlu0 %v5754_v22, %s6263_s24  ;;  %vm9152_vm9 = vnez %v9151_v31  ;;  %v9154_v16 = vmov %v9146_v49 }
 0x422   : > { %v3638_v37 = vsel %vm9126_vm4, %v9125_v59, %v3603_v30  ;;  %v5695_v63 = vpack.c.bf16 %v3637_v52, %v3637_v52  ;;  %vm9131_vm5 = vmmov %vm9126_vm4  ;;  %v9145_v30 = vmov %v9135_v61  ;;  %4283 = vrot.lane.b32.xlu1 %v5755_v4, %s6263_s24  ;;  %v3686_v31 = vrot.slane %v7980_v20, 1 }
 0x423   : > { %v3667_v48 = vsel %vm9130_vm7, %v3638_v37, 0.0  ;;  %v3621_v50 = vsel %vm9131_vm5, %v3619_v39, %v3620_v58  ;;  %vm9133_vm12 = vmmov %vm9126_vm4  ;;  %vm9157_vm7 = vnez %v9156_v54  ;;  %v3701_v54 = vrot.slane %v8005_v8, 1 }
 0x424   : > { %v5694_v27 = vpack.c.bf16 %v3667_v48, %v3667_v48  ;;  %v5711_v35 = vpack.c.bf16 %v3621_v50, %v3621_v50  ;;  %v3622_v5 = vsel %vm9133_vm12, %v9132_v26, %v3619_v39  ;;  %vm9136_vm2 = vmmov %vm9117_vm0  ;;  %v3709_v39 = vrot.slane %v7961_v36, 1 }
 0x425   : > { %v3720_v58 = vsel %vm9136_vm2, %v9135_v61, %v9134_v28  ;;  %vm9137_vm15 = vmmov %vm9119_vm1  ;;  %v3683_v6 = vsel %vm9139_vm3, %v3622_v5, 0.0  ;;  %v3691_v36 = vrot.slane %v7988_v34, 1  ;;  %v3707_v50 = vrot.slane %v8009_v7, 1  ;;  %v9160_v34 = vld [vmem:[#allocation9_spill] sm:$0xff]  ;;  %v9164_v7 = vld [vmem:[#allocation11_spill] sm:$0xff] }
 0x426   : > { %3924 = vst.msk [vmem:[#allocation3 + $0x44] sm:$0xf] %vm9137_vm15, %v5695_v63  ;;  %vm9140_vm0 = vmmov %vm9119_vm1  ;;  %v5710_v56 = vpack.c.bf16 %v3683_v6, %v3683_v6  ;;  %v3776_v38 = vsel %vm9144_vm11, %v3720_v58, 0.0  ;;  %v3706_v58 = vrot.slane %v8021_v10, 1 }
 0x427   : > { %3925 = vst.msk [vmem:[#allocation3 + $0x48] sm:$0xf] %vm9140_vm0, %v5696_v42  ;;  %vm9141_vm8 = vmmov %vm9140_vm0  ;;  %v5771_v3 = vpack.c.bf16 %v3776_v38, %v3776_v38 }
 0x428   : > { %3923 = vst.msk [vmem:[#allocation3 + $0x40] sm:$0xf] %vm9141_vm8, %v5694_v27  ;;  %vm9142_vm1 = vmmov %vm9140_vm0 }
 0x429   : > { %3940 = vst.msk [vmem:[#allocation3 + $0x84] sm:$0xf] %vm9142_vm1, %v5711_v35  ;;  %vm9147_vm14 = vmmov %vm9136_vm2  ;;  %4315 = vrot.lane.b32.xlu1 %v5771_v3, %s6263_s24  ;;  %v3690_v35 = vrot.slane %v7996_v24, 1  ;;  %v3703_v3 = vrot.slane %v8015_v33, 1  ;;  %v9180_v33 = vld [vmem:[#allocation7_spill] sm:$0xff] }
 0x42a   : > { %v3721_v51 = vsel %vm9147_vm14, %v9146_v49, %v9145_v30  ;;  %vm9148_vm13 = vmmov %vm9140_vm0  ;;  %vm9165_vm0 = vnez %v9164_v7  ;;  %v3687_v30 = vrot.slane %v7982_v0, 1  ;;  %v9176_v0 = vld [vmem:[#allocation5_spill] sm:$0xff] }
 0x42b   : > { %3939 = vst.msk [vmem:[#allocation3 + $0x80] sm:$0xf] %vm9148_vm13, %v5710_v56  ;;  %vm9150_vm6 = vmmov %vm9136_vm2  ;;  %v5770_v14 = vpack.c.bf16 %v3721_v51, %v3721_v51  ;;  %v3705_v56 = vrot.slane %v8019_v41, 1  ;;  %v9172_v41 = vld [vmem:[#allocation8_spill] sm:$0xff] }
 0x42c   : > { %v3738_v57 = vsel %vm9150_vm6, %v3694_v9, %v9149_v32  ;;  %vm9153_vm4 = vmmov %vm9136_vm2  ;;  %vm9173_vm6 = vnez %v9172_v41 }
 0x42d   : > { %v3758_v23 = vsel %vm9152_vm9, %v3738_v57, 0.0  ;;  %v3739_v55 = vsel %vm9153_vm4, %v3693_v47, %v3694_v9  ;;  %4313 = vrot.lane.b32.xlu0 %v5770_v14, %s6263_s24  ;;  %vm9155_vm10 = vmmov %vm9136_vm2  ;;  %v3689_v9 = vrot.slane %v7986_v21, 1  ;;  %v9168_v21 = vld [vmem:[#allocation6_spill] sm:$0xff] }
 0x42e   : > { %v3722_v52 = vsel %vm9155_vm10, %v3710_v29, %v9154_v16  ;;  %v5753_v59 = vpack.c.bf16 %v3758_v23, %v3758_v23  ;;  %v5752_v37 = vpack.c.bf16 %v3739_v55, %v3739_v55  ;;  %vm9158_vm5 = vmmov %vm9136_vm2  ;;  %vm9169_vm11 = vnez %v9168_v21 }
 0x42f   : > { %v3774_v19 = vsel %vm9157_vm7, %v3722_v52, 0.0  ;;  %v3723_v63 = vsel %vm9158_vm5, %v3709_v39, %v3710_v29  ;;  %vm9159_vm12 = vmmov %vm9136_vm2  ;;  %vm9161_vm2 = vnez %v9160_v34  ;;  %v3704_v29 = vrot.slane %v8017_v62, 1 }
 0x430   : > { %4279 = vrot.lane.b32.xlu1 %v5753_v59, %s6263_s24  ;;  %v3740_v45 = vsel %vm9159_vm12, %v3692_v1, %v3693_v47  ;;  %v5769_v17 = vpack.c.bf16 %v3774_v19, %v3774_v19  ;;  %v5768_v48 = vpack.c.bf16 %v3723_v63, %v3723_v63  ;;  %vm9162_vm15 = vmmov %vm9153_vm4  ;;  %v3688_v47 = vrot.slane %v7984_v43, 1 }
 0x431   : > { %4277 = vrot.lane.b32.xlu0 %v5752_v37, %s6263_s24  ;;  %v3756_v42 = vsel %vm9161_vm2, %v3740_v45, 0.0  ;;  %v3741_v27 = vsel %vm9162_vm15, %v3691_v36, %v3692_v1  ;;  %vm9163_vm3 = vmmov %vm9153_vm4  ;;  %vm9177_vm10 = vnez %v9176_v0  ;;  %v3685_v1 = vrot.slane %v7976_v53, 1  ;;  %v9184_v53 = vld [vmem:[#allocation4_spill] sm:$0xff] }
 0x432   : > { %v3724_v40 = vsel %vm9163_vm3, %v3708_v12, %v3709_v39  ;;  %v5751_v26 = vpack.c.bf16 %v3756_v42, %v3756_v42  ;;  %v5750_v5 = vpack.c.bf16 %v3741_v27, %v3741_v27  ;;  %vm9166_vm8 = vmmov %vm9163_vm3  ;;  %vm9181_vm12 = vnez %v9180_v33 }
 0x433   : > { %v3772_v28 = vsel %vm9165_vm0, %v3724_v40, 0.0  ;;  %v3725_v61 = vsel %vm9166_vm8, %v3707_v50, %v3708_v12  ;;  %vm9167_vm1 = vmmov %vm9163_vm3  ;;  %v3702_v59 = vrot.slane %v8007_v18, 1  ;;  %vm9185_vm3 = vnez %v9184_v53 }
 0x434   : > { %4311 = vrot.lane.b32.xlu1 %v5769_v17, %s6263_s24  ;;  %v3742_v24 = vsel %vm9167_vm1, %v3690_v35, %v3691_v36  ;;  %v5767_v25 = vpack.c.bf16 %v3772_v28, %v3772_v28  ;;  %v5766_v6 = vpack.c.bf16 %v3725_v61, %v3725_v61  ;;  %vm9170_vm14 = vmmov %vm9167_vm1  ;;  %v9188_v17 = vld [vmem:[#allocation33_spill] sm:$0xff]  ;;  %v5727_v40 = vpack.c.bf16 %v8001_v15, %v8001_v15 }
 0x435   : > { %4309 = vrot.lane.b32.xlu0 %v5768_v48, %s6263_s24  ;;  %v3754_v4 = vsel %vm9169_vm11, %v3742_v24, 0.0  ;;  %v3743_v22 = vsel %vm9170_vm14, %v3689_v9, %v3690_v35  ;;  %vm9171_vm13 = vmmov %vm9167_vm1  ;;  %vm9191_vm14 = vcmask 519424   ;;  %v9195_v28 = vrot.slane %v7998_v60, 1 }
 0x436   : > { %v3726_v10 = vsel %vm9171_vm13, %v3706_v58, %v3707_v50  ;;  %v5749_v44 = vpack.c.bf16 %v3754_v4, %v3754_v4  ;;  %v5748_v38 = vpack.c.bf16 %v3743_v22, %v3743_v22  ;;  %vm9174_vm9 = vmmov %vm9167_vm1  ;;  %v3700_v50 = vrot.slane %v8001_v15, 1  ;;  %v8482_v15 = vld [vmem:[%s8680_s7] sm:$0xff]   ;;  %v9203_v22 = vld [vmem:[#allocation34_spill] sm:$0xff] }
 0x437   : > { %v3770_v49 = vsel %vm9173_vm6, %v3726_v10, 0.0  ;;  %v3727_v51 = vsel %vm9174_vm9, %v3705_v56, %v3706_v58  ;;  %vm9175_vm4 = vmmov %vm9167_vm1  ;;  %v5743_v21 = vpack.c.bf16 %v8011_v46, %v8011_v46  ;;  %v5742_v4 = vpack.c.bf16 %v8024_v13, %v8024_v13 }
 0x438   : > { %4275 = vrot.lane.b32.xlu1 %v5751_v26, %s6263_s24  ;;  %v3744_v43 = vsel %vm9175_vm4, %v3688_v47, %v3689_v9  ;;  %v5765_v32 = vpack.c.bf16 %v3770_v49, %v3770_v49  ;;  %v5764_v57 = vpack.c.bf16 %v3727_v51, %v3727_v51  ;;  %vm9178_vm7 = vmmov %vm9167_vm1  ;;  %v5726_v26 = vpack.c.bf16 %v7998_v60, %v7998_v60  ;;  %v9193_v9 = vld [vmem:[#allocation32_spill] sm:$0xff] }
 0x439   : > { %4273 = vrot.lane.b32.xlu0 %v5750_v5, %s6263_s24  ;;  %v3752_v14 = vsel %vm9177_vm10, %v3744_v43, 0.0  ;;  %v3745_v39 = vsel %vm9178_vm7, %v3687_v30, %v3688_v47  ;;  %vm9179_vm5 = vmmov %vm9167_vm1  ;;  %vm9194_vm6 = vnez %v9193_v9  ;;  %vm9198_vm10 = vcmask 785408   ;;  %v4391_v9 = vld [vmem:[%s8681_s8 + $0x10] sm:$0x3] }
 0x43a   : > { %v3728_v62 = vsel %vm9179_vm5, %v3704_v29, %v3705_v56  ;;  %v5747_v23 = vpack.c.bf16 %v3752_v14, %v3752_v14  ;;  %v5746_v55 = vpack.c.bf16 %v3745_v39, %v3745_v39  ;;  %vm9182_vm2 = vmmov %vm9167_vm1  ;;  %5872 = vmatprep.mubr.msk.bf16.mxu0 %vm9198_vm10, %v8482_v15  ;;  %v9199_v60 = vrot.slane %v8011_v46, 1 }
 0x43b   : > { %v3768_v16 = vsel %vm9181_vm12, %v3728_v62, 0.0  ;;  %v3729_v52 = vsel %vm9182_vm2, %v3703_v3, %v3704_v29  ;;  %vm9183_vm15 = vmmov %vm9167_vm1  ;;  %vm9204_vm2 = vnez %v9203_v22  ;;  %v5774_v46 = vpack.c.bf16 %v8126_v11, %v8126_v11 }
 0x43c   : > { %4307 = vrot.lane.b32.xlu1 %v5767_v25, %s6263_s24  ;;  %v3746_v20 = vsel %vm9183_vm15, %v3686_v31, %v3687_v30  ;;  %v5763_v37 = vpack.c.bf16 %v3768_v16, %v3768_v16  ;;  %v5762_v36 = vpack.c.bf16 %v3729_v52, %v3729_v52  ;;  %vm9186_vm0 = vmmov %vm9167_vm1  ;;  %vm9189_vm1 = vnez %v9188_v17  ;;  %v4389_v17 = vld [vmem:[%s8681_s8] sm:$0xff] }
 0x43d   : > { %4305 = vrot.lane.b32.xlu0 %v5766_v6, %s6263_s24  ;;  %v3750_v19 = vsel %vm9185_vm3, %v3746_v20, 0.0  ;;  %v3747_v63 = vsel %vm9186_vm0, %v3685_v1, %v3686_v31  ;;  %vm9187_vm8 = vmmov %vm9186_vm0 }
 0x43e   : > { %v3730_v18 = vsel %vm9187_vm8, %v3702_v59, %v3703_v3  ;;  %v5745_v12 = vpack.c.bf16 %v3750_v19, %v3750_v19  ;;  %v5744_v45 = vpack.c.bf16 %v3747_v63, %v3747_v63  ;;  %vm9190_vm11 = vmmov %vm9186_vm0 }
 0x43f   : > { %v3766_v48 = vsel %vm9189_vm1, %v3730_v18, 0.0  ;;  %v3731_v8 = vsel %vm9190_vm11, %v3701_v54, %v3702_v59  ;;  %vm9192_vm13 = vmmov %vm9186_vm0 }
 0x440   : > { %4271 = vrot.lane.b32.xlu1 %v5749_v44, %s6263_s24  ;;  %v5761_v42 = vpack.c.bf16 %v3766_v48, %v3766_v48  ;;  %v5760_v27 = vpack.c.bf16 %v3731_v8, %v3731_v8  ;;  %v3732_v35 = vsel %vm9192_vm13, %v3700_v50, %v3701_v54  ;;  %vm9196_vm9 = vmmov %vm9186_vm0 }
 0x441   : > { %4269 = vrot.lane.b32.xlu0 %v5748_v38, %s6263_s24  ;;  %v3764_v7 = vsel %vm9194_vm6, %v3732_v35, 0.0  ;;  %v3733_v61 = vsel %vm9196_vm9, %v9195_v28, %v3700_v50  ;;  %vm9197_vm4 = vmmov %vm9191_vm14 }
 0x442   : > { %v5759_v58 = vpack.c.bf16 %v3764_v7, %v3764_v7  ;;  %v5758_v24 = vpack.c.bf16 %v3733_v61, %v3733_v61  ;;  %vm9200_vm7 = vmmov %vm9186_vm0 }
 0x443   : > { %v3748_v25 = vsel %vm9200_vm7, %v9199_v60, %v3685_v1  ;;  %vm9201_vm5 = vmmov %vm9197_vm4 }
 0x444   : > { %4303 = vrot.lane.b32.xlu1 %v5765_v32, %s6263_s24  ;;  %vm9202_vm12 = vmmov %vm9197_vm4  ;;  %v3780_v47 = vsel %vm9204_vm2, %v3748_v25, 0.0 }
 0x445   : > { %4301 = vrot.lane.b32.xlu0 %v5764_v57, %s6263_s24  ;;  %v5775_v44 = vpack.c.bf16 %v3780_v47, %v3780_v47  ;;  %vm9205_vm15 = vmmov %vm9197_vm4 }
 0x446   : > { %vm9206_vm3 = vmmov %vm9197_vm4 }
 0x447   : > { %vm9207_vm0 = vmmov %vm9206_vm3 }
 0x448   : > { %4267 = vrot.lane.b32.xlu1 %v5747_v23, %s6263_s24  ;;  %vm9208_vm8 = vmmov %vm9207_vm0 }
 0x449   : > { %4265 = vrot.lane.b32.xlu0 %v5746_v55, %s6263_s24  ;;  %vm9209_vm1 = vmmov %vm9207_vm0 }
 0x44a   : > { %v4064_v34 = vpop.permute.xlu1 %4063  ;;  %v4062_v5 = vpop.permute.xlu0 %4061  ;;  %vm9210_vm11 = vmmov %vm9207_vm0 }
 0x44b   : > { %4146 = vst.msk [vmem:[#allocation3 + $0x3c] sm:$0xf] %vm9191_vm14, %v4064_v34  ;;  %vm9211_vm14 = vmmov %vm9207_vm0 }
 0x44c   : > { %4299 = vrot.lane.b32.xlu1 %v5763_v37, %s6263_s24  ;;  %4145 = vst.msk [vmem:[#allocation3 + $0x38] sm:$0xf] %vm9197_vm4, %v4062_v5  ;;  %vm9212_vm13 = vmmov %vm9207_vm0 }
 0x44d   : > { %4297 = vrot.lane.b32.xlu0 %v5762_v36, %s6263_s24  ;;  %vm9213_vm6 = vmmov %vm9207_vm0  ;;  %v8537_v36 = vld [vmem:[%s8680_s7 + $0xc] sm:$0xff]  }
 0x44e   : > { %v4096_v6 = vpop.permute.xlu1 %4095  ;;  %v4094_v56 = vpop.permute.xlu0 %4093  ;;  %vm9214_vm9 = vmmov %vm9207_vm0 }
 0x44f   : > { %4162 = vst.msk [vmem:[#allocation3 + $0x7c] sm:$0xf] %vm9201_vm5, %v4096_v6  ;;  %vm9215_vm4 = vmmov %vm9207_vm0 }
 0x450   : > { %4263 = vrot.lane.b32.xlu1 %v5745_v12, %s6263_s24  ;;  %4161 = vst.msk [vmem:[#allocation3 + $0x78] sm:$0xf] %vm9202_vm12, %v4094_v56  ;;  %vm9216_vm10 = vmmov %vm9207_vm0 }
 0x451   : > { %4261 = vrot.lane.b32.xlu0 %v5744_v45, %s6263_s24  ;;  %vm9217_vm7 = vmmov %vm9207_vm0 }
 0x452   : > { %v4060_v2 = vpop.permute.xlu1 %4059  ;;  %v4058_v10 = vpop.permute.xlu0 %4057  ;;  %vm9218_vm5 = vmmov %vm9207_vm0 }
 0x453   : > { %4144 = vst.msk [vmem:[#allocation3 + $0x34] sm:$0xf] %vm9205_vm15, %v4060_v2  ;;  %vm9219_vm12 = vmmov %vm9207_vm0 }
 0x454   : > { %4295 = vrot.lane.b32.xlu1 %v5761_v42, %s6263_s24  ;;  %4143 = vst.msk [vmem:[#allocation3 + $0x30] sm:$0xf] %vm9206_vm3, %v4058_v10  ;;  %vm9220_vm2 = vmmov %vm9207_vm0 }
 0x455   : > { %4293 = vrot.lane.b32.xlu0 %v5760_v27, %s6263_s24  ;;  %vm9221_vm15 = vmmov %vm9207_vm0 }
 0x456   : > { %v4092_v13 = vpop.permute.xlu1 %4091  ;;  %v4090_v38 = vpop.permute.xlu0 %4089  ;;  %vm9222_vm3 = vmmov %vm9207_vm0 }
 0x457   : > { %4160 = vst.msk [vmem:[#allocation3 + $0x74] sm:$0xf] %vm9207_vm0, %v4092_v13 }
 0x458   : > { %4067 = vrot.lane.b32.xlu1 %v5727_v40, %s6262_s21  ;;  %4159 = vst.msk [vmem:[#allocation3 + $0x70] sm:$0xf] %vm9208_vm8, %v4090_v38  ;;  %vm9223_vm8 = vmmov %vm9207_vm0  ;;  %v4390_v40 = vld [vmem:[%s8681_s8 + $0x8] sm:$0xff] }
 0x459   : > { %4065 = vrot.lane.b32.xlu0 %v5726_v26, %s6262_s21 }
 0x45a   : > { %v4056_v30 = vpop.permute.xlu1 %4055  ;;  %v4054_v41 = vpop.permute.xlu0 %4053 }
 0x45b   : > { %4142 = vst.msk [vmem:[#allocation3 + $0x2c] sm:$0xf] %vm9209_vm1, %v4056_v30  ;;  %vm9224_vm1 = vmmov %vm9207_vm0 }
 0x45c   : > { %4291 = vrot.lane.b32.xlu1 %v5759_v58, %s6263_s24  ;;  %4141 = vst.msk [vmem:[#allocation3 + $0x28] sm:$0xf] %vm9210_vm11, %v4054_v41  ;;  %vm9225_vm11 = vmmov %vm9207_vm0 }
 0x45d   : > { %4289 = vrot.lane.b32.xlu0 %v5758_v24, %s6263_s24 }
 0x45e   : > { %v4088_v11 = vpop.permute.xlu1 %4087  ;;  %v4086_v49 = vpop.permute.xlu0 %4085 }
 0x45f   : > { %4158 = vst.msk [vmem:[#allocation3 + $0x6c] sm:$0xf] %vm9211_vm14, %v4088_v11  ;;  %vm9226_vm14 = vmmov %vm9207_vm0 }
 0x460   : > { %4099 = vrot.lane.b32.xlu1 %v5743_v21, %s6262_s21  ;;  %4157 = vst.msk [vmem:[#allocation3 + $0x68] sm:$0xf] %vm9212_vm13, %v4086_v49  ;;  %vm9227_vm13 = vmmov %vm9207_vm0 }
 0x461   : > { %4097 = vrot.lane.b32.xlu0 %v5742_v4, %s6262_s21  ;;  %s8662_s21 = scalar_lea.vmem %s8682_s9, %s6116_s15 }
 0x462   : > { %v4052_v51 = vpop.permute.xlu1 %4051  ;;  %v4050_v29 = vpop.permute.xlu0 %4049 }
 0x463   : > { %4140 = vst.msk [vmem:[#allocation3 + $0x24] sm:$0xf] %vm9213_vm6, %v4052_v51  ;;  %vm9228_vm6 = vcmask 781824  }
 0x464   : > { %4323 = vrot.lane.b32.xlu1 %v5775_v44, %s6263_s24  ;;  %4139 = vst.msk [vmem:[#allocation3 + $0x20] sm:$0xf] %vm9214_vm9, %v4050_v29  ;;  %vm9229_vm9 = vmmov %vm9228_vm6 }
 0x465   : > { %4321 = vrot.lane.b32.xlu0 %v5774_v46, %s6263_s24 }
 0x466   : > { %v4084_v43 = vpop.permute.xlu1 %4083  ;;  %v4082_v32 = vpop.permute.xlu0 %4081 }
 0x467   : > { %4156 = vst.msk [vmem:[#allocation3 + $0x64] sm:$0xf] %vm9215_vm4, %v4084_v43  ;;  %vm9230_vm4 = vmmov %vm9228_vm6 }
 0x468   : > { %4155 = vst.msk [vmem:[#allocation3 + $0x60] sm:$0xf] %vm9216_vm10, %v4082_v32  ;;  %vm9231_vm10 = vmmov %vm9230_vm4  ;;  %4399 = vperm.xlu1 %6131, %v4390_v40  }
 0x469   : > { %4394 = vperm.xlu0 %6130, %v4389_v17  }
 0x46a   : > { %v4048_v57 = vpop.permute.xlu1 %4047  ;;  %v4046_v3 = vpop.permute.xlu0 %4045 }
 0x46b   : > { %4138 = vst.msk [vmem:[#allocation3 + $0x1c] sm:$0xf] %vm9217_vm7, %v4048_v57  ;;  %vm9232_vm7 = vmmov %vm9230_vm4 }
 0x46c   : > { %4137 = vst.msk [vmem:[#allocation3 + $0x18] sm:$0xf] %vm9218_vm5, %v4046_v3  ;;  %vm9233_vm5 = vmmov %vm9230_vm4  ;;  %4404 = vperm.xlu1 %6131, %v4391_v9  }
 0x46e   : > { %v4080_v0 = vpop.permute.xlu1 %4079  ;;  %v4078_v14 = vpop.permute.xlu0 %4077 }
 0x46f   : > { %4154 = vst.msk [vmem:[#allocation3 + $0x5c] sm:$0xf] %vm9219_vm12, %v4080_v0  ;;  %vm9234_vm12 = vcmask 785408  }
 0x470   : > { %4153 = vst.msk [vmem:[#allocation3 + $0x58] sm:$0xf] %vm9220_vm2, %v4078_v14  ;;  %5892 = vmatprep.mubr.msk.bf16.mxu1 %vm9234_vm12, %v8537_v36  ;;  %vm9235_vm2 = vmmov %vm9230_vm4 }
 0x472   : > { %v4044_v39 = vpop.permute.xlu1 %4043  ;;  %v4042_v31 = vpop.permute.xlu0 %4041 }
 0x473   : > { %4136 = vst.msk [vmem:[#allocation3 + $0x14] sm:$0xf] %vm9221_vm15, %v4044_v39  ;;  %vm9236_vm15 = vmmov %vm9235_vm2 }
 0x474   : > { %4135 = vst.msk [vmem:[#allocation3 + $0x10] sm:$0xf] %vm9222_vm3, %v4042_v31  ;;  %vm9237_vm3 = vmmov %vm9234_vm12 }
 0x476   : > { %v4076_v62 = vpop.permute.xlu1 %4075  ;;  %v4074_v23 = vpop.permute.xlu0 %4073 }
 0x477   : > { %4152 = vst.msk [vmem:[#allocation3 + $0x54] sm:$0xf] %vm9207_vm0, %v4076_v62  ;;  %vm9238_vm0 = vmmov %vm9237_vm3 }
 0x478   : > { %4151 = vst.msk [vmem:[#allocation3 + $0x50] sm:$0xf] %vm9223_vm8, %v4074_v23  ;;  %vm9239_vm8 = vmmov %vm9235_vm2 }
 0x479   : > { %vm9250_vm12 = vmmov %vm9238_vm0 }
 0x47a   : > { %v4040_v55 = vpop.permute.xlu1 %4039  ;;  %v4038_v1 = vpop.permute.xlu0 %4037 }
 0x47b   : > { %4134 = vst.msk [vmem:[#allocation3 + $0xc] sm:$0xf] %vm9224_vm1, %v4040_v55  ;;  %vm9240_vm1 = vmmov %vm9235_vm2  ;;  %v6213_v55 = vld [vmem:[#allocation3] sm:$0xff]  }
 0x47c   : > { %4133 = vst.msk [vmem:[#allocation3 + $0x8] sm:$0xf] %vm9225_vm11, %v4038_v1  ;;  %vm9241_vm11 = vmmov %vm9240_vm1  ;;  %v6216_v1 = vld [vmem:[#allocation3 + $0x88] sm:$0xff]  }
 0x47e   : > { %v4072_v33 = vpop.permute.xlu1 %4071 }
 0x47f   : > { %4150 = vst.msk [vmem:[#allocation3 + $0x4c] sm:$0xf] %vm9226_vm14, %v4072_v33  ;;  %vm9242_vm14 = vmmov %vm9240_vm1 }
 0x482   : > { %v4288_v52 = vpop.permute.xlu1 %4287 }
 0x483   : > { %4370 = vst.msk [vmem:[#allocation3 + $0x3c] sm:$0xf] %vm9228_vm6, %v4288_v52  ;;  %vm9244_vm6 = vmmov %vm9238_vm0 }
 0x487   : > { %v4070_v16 = vpop.permute.xlu0 %4069 }
 0x488   : > { %4149 = vst.msk [vmem:[#allocation3 + $0x48] sm:$0xf] %vm9227_vm13, %v4070_v16  ;;  %vm9243_vm13 = vmmov %vm9238_vm0 }
 0x48b   : > { %v4286_v59 = vpop.permute.xlu0 %4285 }
 0x48c   : > { %4369 = vst.msk [vmem:[#allocation3 + $0x38] sm:$0xf] %vm9229_vm9, %v4286_v59  ;;  %vm9245_vm9 = vmmov %vm9240_vm1 }
 0x48f   : > { %v4318_v37 = vpop.permute.xlu0 %4317 }
 0x490   : > { %v4320_v20 = vpop.permute.xlu1 %4319  ;;  %4385 = vst.msk [vmem:[#allocation3 + $0x78] sm:$0xf] %vm9231_vm10, %v4318_v37  ;;  %vm9247_vm10 = vmmov %vm9240_vm1 }
 0x491   : > { %4386 = vst.msk [vmem:[#allocation3 + $0x7c] sm:$0xf] %vm9230_vm4, %v4320_v20  ;;  %vm9246_vm4 = vmmov %vm9240_vm1 }
 0x493   : > { %v4282_v53 = vpop.permute.xlu0 %4281  ;;  %v6199_v19 = vld [vmem:[#allocation3 + $0x38] sm:$0xff]  }
 0x494   : > { %v4284_v54 = vpop.permute.xlu1 %4283  ;;  %4367 = vst.msk [vmem:[#allocation3 + $0x30] sm:$0xf] %vm9233_vm5, %v4282_v53  ;;  %v4558_v45 = vsel %vm9238_vm0, %v6199_v19, 0  ;;  %vm9249_vm5 = vmmov %vm9238_vm0 }
 0x495   : > { %4368 = vst.msk [vmem:[#allocation3 + $0x34] sm:$0xf] %vm9232_vm7, %v4284_v54  ;;  %vm9248_vm7 = vmmov %vm9240_vm1  ;;  %v6243_v54 = vld [vmem:[%s8680_s7 + $0x8] ss:$0 sps:$4 sm:$0x11]  }
 0x496   : > { %vm9254_vm0 = vmmov %vm9240_vm1 }
 0x498   : > { %v6198_v12 = vld [vmem:[#allocation3 + $0x78] sm:$0xff]  }
 0x499   : > { %6092 = vmatprep.subr.msk.bf16.mxu0 %vm9237_vm3, %v6198_v12  ;;  %vm9253_vm3 = vmmov %vm9240_vm1 }
 0x49a   : > { %5857 = vmatpush3.bf16.xpose.msra.mxu0 %v4558_v45  ;;  %v6221_v45 = vld [vmem:[#allocation3 + $0x38] sm:$0xff]  }
 0x49b   : > { %v4316_v63 = vpop.permute.xlu1 %4315 }
 0x49c   : > { %4384 = vst.msk [vmem:[#allocation3 + $0x74] sm:$0xf] %vm9235_vm2, %v4316_v63  ;;  %v6201_v50 = vld [vmem:[#allocation3 + $0x30] sm:$0xff]   ;;  %vm9251_vm2 = vmmov %vm9240_vm1 }
 0x49d   : > { %v4555_v35 = vsel %vm9244_vm6, %v6201_v50, 0  ;;  %vm9260_vm6 = vmmov %vm9254_vm0 }
 0x49f   : > { %v4314_v18 = vpop.permute.xlu0 %4313 }
 0x4a0   : > { %4383 = vst.msk [vmem:[#allocation3 + $0x70] sm:$0xf] %vm9236_vm15, %v4314_v18  ;;  %vm9252_vm15 = vmmov %vm9240_vm1  ;;  %v6219_v18 = vld [vmem:[#allocation3 + $0x78] sm:$0xff]  }
 0x4a2   : > { %v4280_v48 = vpop.permute.xlu1 %4279 }
 0x4a3   : > { %v4278_v8 = vpop.permute.xlu0 %4277  ;;  %4366 = vst.msk [vmem:[#allocation3 + $0x2c] sm:$0xf] %vm9239_vm8, %v4280_v48  ;;  %vm9255_vm8 = vmmov %vm9249_vm5 }
 0x4a4   : > { %4365 = vst.msk [vmem:[#allocation3 + $0x28] sm:$0xf] %vm9240_vm1, %v4278_v8  ;;  %vm9256_vm1 = vmmov %vm9249_vm5 }
 0x4a6   : > { %v4312_v34 = vpop.permute.xlu1 %4311 }
 0x4a7   : > { %v4310_v42 = vpop.permute.xlu0 %4309  ;;  %v6200_v27 = vld [vmem:[#allocation3 + $0x70] sm:$0xff]   ;;  %4382 = vst.msk [vmem:[#allocation3 + $0x6c] sm:$0xf] %vm9241_vm11, %v4312_v34  ;;  %vm9257_vm11 = vmmov %vm9254_vm0  ;;  %v6224_v34 = vld [vmem:[#allocation3 + $0x78] sm:$0xff]  }
 0x4a8   : > { %4381 = vst.msk [vmem:[#allocation3 + $0x68] sm:$0xf] %vm9242_vm14, %v4310_v42  ;;  %6093 = vmatprep.subr.msk.bf16.mxu0 %vm9243_vm13, %v6200_v27  ;;  %vm9258_vm14 = vmmov %vm9254_vm0  ;;  %v6223_v50 = vld [vmem:[#allocation3 + $0x70] sm:$0xff]   ;;  %v6226_v27 = vld [vmem:[#allocation3 + $0x38] sm:$0xff]  }
 0x4a9   : > { %5859 = vmatpush3.bf16.xpose.msra.mxu0 %v4555_v35  ;;  %vm9259_vm13 = vmmov %vm9254_vm0  ;;  %v6225_v42 = vld [vmem:[#allocation3 + $0x30] sm:$0xff]  }
 0x4aa   : > { %v4276_v26 = vpop.permute.xlu1 %4275 }
 0x4ab   : > { %v4274_v5 = vpop.permute.xlu0 %4273  ;;  %4364 = vst.msk [vmem:[#allocation3 + $0x24] sm:$0xf] %vm9245_vm9, %v4276_v26  ;;  %v6203_v7 = vld [vmem:[#allocation3 + $0x28] sm:$0xff]   ;;  %vm9261_vm9 = vmmov %vm9256_vm1 }
 0x4ac   : > { %4363 = vst.msk [vmem:[#allocation3 + $0x20] sm:$0xf] %vm9246_vm4, %v4274_v5  ;;  %v4552_v24 = vsel %vm9250_vm12, %v6203_v7, 0  ;;  %vm9262_vm4 = vmmov %vm9256_vm1  ;;  %v6228_v5 = vld [vmem:[#allocation3 + $0x70] sm:$0xff]   ;;  %v6229_v9 = vld [vmem:[#allocation3 + $0x28] sm:$0xff]  }
 0x4ad   : > { %vm9266_vm12 = vmmov %vm9254_vm0  ;;  %v6230_v7 = vld [vmem:[#allocation3 + $0x30] sm:$0xff]  }
 0x4ae   : > { %v4308_v28 = vpop.permute.xlu1 %4307 }
 0x4af   : > { %v4306_v61 = vpop.permute.xlu0 %4305  ;;  %v6202_v58 = vld [vmem:[#allocation3 + $0x68] sm:$0xff]   ;;  %4380 = vst.msk [vmem:[#allocation3 + $0x64] sm:$0xf] %vm9247_vm10, %v4308_v28  ;;  %vm9263_vm10 = vmmov %vm9254_vm0 }
 0x4b0   : > { %4379 = vst.msk [vmem:[#allocation3 + $0x60] sm:$0xf] %vm9248_vm7, %v4306_v61  ;;  %6094 = vmatprep.subr.msk.bf16.mxu0 %vm9249_vm5, %v6202_v58  ;;  %vm9264_vm7 = vmmov %vm9254_vm0  ;;  %v6227_v26 = vld [vmem:[#allocation3 + $0x68] sm:$0xff]  }
 0x4b1   : > { %5861 = vmatpush3.bf16.xpose.msra.mxu0 %v4552_v24  ;;  %vm9265_vm5 = vmmov %vm9254_vm0  ;;  %v6232_v24 = vld [vmem:[#allocation3 + $0x68] sm:$0xff]  }
 0x4b2   : > { %v4272_v60 = vpop.permute.xlu1 %4271 }
 0x4b3   : > { %v4270_v25 = vpop.permute.xlu0 %4269  ;;  %4362 = vst.msk [vmem:[#allocation3 + $0x1c] sm:$0xf] %vm9251_vm2, %v4272_v60  ;;  %v6205_v6 = vld [vmem:[#allocation3 + $0x20] sm:$0xff]   ;;  %vm9267_vm2 = vmmov %vm9256_vm1 }
 0x4b4   : > { %4361 = vst.msk [vmem:[#allocation3 + $0x18] sm:$0xf] %vm9252_vm15, %v4270_v25  ;;  %v4549_v22 = vsel %vm9256_vm1, %v6205_v6, 0  ;;  %vm9268_vm15 = vmmov %vm9256_vm1  ;;  %v6233_v60 = vld [vmem:[#allocation3 + $0x20] sm:$0xff]   ;;  %v6234_v25 = vld [vmem:[#allocation3 + $0x28] sm:$0xff]  }
 0x4b5   : > { %vm9272_vm1 = vmmov %vm9265_vm5 }
 0x4b6   : > { %v4304_v56 = vpop.permute.xlu1 %4303 }
 0x4b7   : > { %v4302_v21 = vpop.permute.xlu0 %4301  ;;  %v6204_v4 = vld [vmem:[#allocation3 + $0x60] sm:$0xff]   ;;  %4378 = vst.msk [vmem:[#allocation3 + $0x5c] sm:$0xf] %vm9253_vm3, %v4304_v56  ;;  %vm9269_vm3 = vcmask 519424  }
 0x4b8   : > { %4377 = vst.msk [vmem:[#allocation3 + $0x58] sm:$0xf] %vm9254_vm0, %v4302_v21  ;;  %6095 = vmatprep.subr.msk.bf16.mxu0 %vm9255_vm8, %v6204_v4  ;;  %vm9270_vm0 = vmmov %vm9269_vm3  ;;  %v6231_v58 = vld [vmem:[#allocation3 + $0x60] sm:$0xff]  }
 0x4b9   : > { %5863 = vmatpush3.bf16.xpose.msra.mxu0 %v4549_v22  ;;  %vm9271_vm8 = vmmov %vm9265_vm5  ;;  %v6236_v4 = vld [vmem:[#allocation3 + $0x60] sm:$0xff]  }
 0x4ba   : > { %v4268_v47 = vpop.permute.xlu1 %4267 }
 0x4bb   : > { %v4266_v2 = vpop.permute.xlu0 %4265  ;;  %4360 = vst.msk [vmem:[#allocation3 + $0x14] sm:$0xf] %vm9257_vm11, %v4268_v47  ;;  %v6207_v10 = vld [vmem:[#allocation3 + $0x18] sm:$0xff]   ;;  %vm9273_vm11 = vmmov %vm9267_vm2  ;;  %v6238_v47 = vld [vmem:[#allocation3 + $0x20] sm:$0xff]  }
 0x4bc   : > { %4359 = vst.msk [vmem:[#allocation3 + $0x10] sm:$0xf] %vm9258_vm14, %v4266_v2  ;;  %v4546_v38 = vsel %vm9262_vm4, %v6207_v10, 0  ;;  %vm9274_vm14 = vmmov %vm9267_vm2  ;;  %v6237_v22 = vld [vmem:[#allocation3 + $0x18] sm:$0xff]  }
 0x4bd   : > { %vm9278_vm4 = vmmov %vm9272_vm1 }
 0x4be   : > { %v4300_v44 = vpop.permute.xlu1 %4299 }
 0x4bf   : > { %v4298_v46 = vpop.permute.xlu0 %4297  ;;  %v6206_v13 = vld [vmem:[#allocation3 + $0x58] sm:$0xff]   ;;  %4376 = vst.msk [vmem:[#allocation3 + $0x54] sm:$0xf] %vm9259_vm13, %v4300_v44  ;;  %vm9275_vm13 = vmmov %vm9270_vm0 }
 0x4c0   : > { %4375 = vst.msk [vmem:[#allocation3 + $0x50] sm:$0xf] %vm9260_vm6, %v4298_v46  ;;  %6096 = vmatprep.subr.msk.bf16.mxu0 %vm9261_vm9, %v6206_v13  ;;  %vm9276_vm6 = vmmov %vm9270_vm0  ;;  %v6235_v21 = vld [vmem:[#allocation3 + $0x58] sm:$0xff]  }
 0x4c1   : > { %5865 = vmatpush3.bf16.xpose.msra.mxu0 %v4546_v38  ;;  %vm9277_vm9 = vmmov %vm9267_vm2  ;;  %v6240_v46 = vld [vmem:[#allocation3 + $0x58] sm:$0xff]  }
 0x4c2   : > { %v4264_v30 = vpop.permute.xlu1 %4263  ;;  %v4537_v59 = vsel %vm9277_vm9, %v6213_v55, 0  ;;  %v6242_v38 = vld [vmem:[#allocation3 + $0x18] sm:$0xff]  }
 0x4c3   : > { %v4262_v41 = vpop.permute.xlu0 %4261  ;;  %4358 = vst.msk [vmem:[#allocation3 + $0xc] sm:$0xf] %vm9263_vm10, %v4264_v30  ;;  %v6209_v11 = vld [vmem:[#allocation3 + $0x10] sm:$0xff]   ;;  %vm9279_vm10 = vmmov %vm9272_vm1 }
 0x4c4   : > { %4357 = vst.msk [vmem:[#allocation3 + $0x8] sm:$0xf] %vm9264_vm7, %v4262_v41  ;;  %v4543_v43 = vsel %vm9268_vm15, %v6209_v11, 0  ;;  %vm9280_vm7 = vmmov %vm9267_vm2  ;;  %v6241_v13 = vld [vmem:[#allocation3 + $0x10] sm:$0xff]  }
 0x4c5   : > { %vm9283_vm15 = vmmov %vm9267_vm2 }
 0x4c6   : > { %v4296_v49 = vpop.permute.xlu1 %4295 }
 0x4c7   : > { %v4294_v51 = vpop.permute.xlu0 %4293  ;;  %v6208_v29 = vld [vmem:[#allocation3 + $0x50] sm:$0xff]   ;;  %4374 = vst.msk [vmem:[#allocation3 + $0x4c] sm:$0xf] %vm9265_vm5, %v4296_v49  ;;  %vm9281_vm5 = vmmov %vm9267_vm2 }
 0x4c8   : > { %4373 = vst.msk [vmem:[#allocation3 + $0x48] sm:$0xf] %vm9266_vm12, %v4294_v51  ;;  %6097 = vmatprep.subr.msk.bf16.mxu0 %vm9267_vm2, %v6208_v29  ;;  %vm9282_vm12 = vmmov %vm9267_vm2  ;;  %v6239_v44 = vld [vmem:[#allocation3 + $0x50] sm:$0xff]  }
 0x4c9   : > { %5867 = vmatpush3.bf16.xpose.msra.mxu0 %v4543_v43  ;;  %v6245_v49 = vld [vmem:[#allocation3 + $0x50] sm:$0xff]  }
 0x4ca   : > { %v4068_v32 = vpop.permute.xlu1 %4067  ;;  %v6247_v29 = vld [vmem:[#allocation3 + $0x10] sm:$0xff]  }
 0x4cb   : > { %v4066_v57 = vpop.permute.xlu0 %4065  ;;  %4148 = vst.msk [vmem:[#allocation3 + $0x44] sm:$0xf] %vm9269_vm3, %v4068_v32  ;;  %v6211_v3 = vld [vmem:[#allocation3 + $0x8] sm:$0xff]   ;;  %vm9284_vm3 = vmmov %vm9267_vm2 }
 0x4cc   : > { %4147 = vst.msk [vmem:[#allocation3 + $0x40] sm:$0xf] %vm9270_vm0, %v4066_v57  ;;  %v4540_v31 = vsel %vm9274_vm14, %v6211_v3, 0  ;;  %vm9285_vm0 = vmmov %vm9267_vm2  ;;  %v6246_v51 = vld [vmem:[#allocation3 + $0x8] sm:$0xff]  }
 0x4cd   : > { %vm9289_vm14 = vmmov %vm9285_vm0  ;;  %v6250_v57 = vld [vmem:[%s8680_s7 + $0x14] ss:$0 sps:$4 sm:$0x11]   ;;  %v6251_v3 = vld [vmem:[%s8680_s7 + $0x20] ss:$0 sps:$4 sm:$0x11]  }
 0x4ce   : > { %v4292_v0 = vpop.permute.xlu1 %4291  ;;  %vm9292_vm9 = vmmov %vm9285_vm0 }
 0x4cf   : > { %v4290_v14 = vpop.permute.xlu0 %4289  ;;  %v6210_v39 = vld [vmem:[#allocation3 + $0x48] sm:$0xff]   ;;  %4372 = vst.msk [vmem:[#allocation3 + $0x44] sm:$0xf] %vm9271_vm8, %v4292_v0  ;;  %vm9286_vm8 = vmmov %vm9285_vm0 }
 0x4d0   : > { %4371 = vst.msk [vmem:[#allocation3 + $0x40] sm:$0xf] %vm9272_vm1, %v4290_v14  ;;  %6098 = vmatprep.subr.msk.bf16.mxu0 %vm9273_vm11, %v6210_v39  ;;  %v6218_v37 = vld [vmem:[#allocation3 + $0x48] sm:$0xff]   ;;  %vm9287_vm1 = vmmov %vm9285_vm0 }
 0x4d1   : > { %5869 = vmatpush3.bf16.xpose.msra.mxu0 %v4540_v31  ;;  %v5028_v63 = vsel %vm9284_vm3, %v6218_v37, 0  ;;  %vm9288_vm11 = vmmov %vm9285_vm0  ;;  %v6244_v11 = vld [vmem:[#allocation3 + $0x48] sm:$0xff]  }
 0x4d2   : > { %v4100_v62 = vpop.permute.xlu1 %4099  ;;  %v4790_v48 = vsel %vm9288_vm11, %v6221_v45, 0  ;;  %vm9300_vm3 = vmmov %vm9285_vm0 }
 0x4d3   : > { %v4098_v23 = vpop.permute.xlu0 %4097  ;;  %4164 = vst.msk [vmem:[#allocation3 + $0x84] sm:$0xf] %vm9275_vm13, %v4100_v62  ;;  %vm9290_vm13 = vmmov %vm9285_vm0 }
 0x4d4   : > { %4163 = vst.msk [vmem:[#allocation3 + $0x80] sm:$0xf] %vm9276_vm6, %v4098_v23  ;;  %vm9291_vm6 = vmmov %vm9285_vm0 }
 0x4d5   : > { %vm9303_vm11 = vmmov %vm9285_vm0 }
 0x4d6   : > { %v4324_v33 = vpop.permute.xlu1 %4323 }
 0x4d7   : > { %v4322_v16 = vpop.permute.xlu0 %4321  ;;  %v6212_v52 = vld [vmem:[#allocation3 + $0x40] sm:$0xff]   ;;  %4388 = vst.msk [vmem:[#allocation3 + $0x84] sm:$0xf] %vm9278_vm4, %v4324_v33  ;;  %vm9293_vm4 = vmmov %vm9285_vm0 }
 0x4d8   : > { %4387 = vst.msk [vmem:[#allocation3 + $0x80] sm:$0xf] %vm9279_vm10, %v4322_v16  ;;  %6099 = vmatprep.subr.msk.bf16.mxu0 %vm9280_vm7, %v6212_v52  ;;  %v6217_v20 = vld [vmem:[#allocation3 + $0x40] sm:$0xff]   ;;  %vm9294_vm10 = vmmov %vm9285_vm0 }
 0x4d9   : > { %5871 = vmatpush3.bf16.xpose.msra.mxu0 %v4537_v59  ;;  %v4793_v19 = vsel %vm9283_vm15, %v6217_v20, 0  ;;  %v6222_v17 = vld [vmem:[#allocation3 + $0x40] sm:$0xff]   ;;  %v4787_v35 = vsel %vm9294_vm10, %v6225_v42, 0  ;;  %vm9295_vm7 = vmmov %vm9285_vm0 }
 0x4da   : > { %6108 = vmatprep.subr.msk.bf16.mxu0 %vm9281_vm5, %v6216_v1  ;;  %v5025_v8 = vsel %vm9289_vm14, %v6222_v17, 0  ;;  %v5022_v40 = vsel %vm9295_vm7, %v6226_v27, 0  ;;  %vm9296_vm5 = vmmov %vm9285_vm0 }
 0x4db   : > { %vm9299_vm15 = vmmov %vm9285_vm0 }
 0x4dc   : > { %v5019_v61 = vsel %vm9299_vm15, %v6230_v7, 0  ;;  %vm9304_vm14 = vmmov %vm9285_vm0 }
 0x4dd   : > { %vm9309_vm10 = vmmov %vm9285_vm0 }
 0x4de   : > { %v4775_v30 = vsel %vm9309_vm10, %v6241_v13, 0  ;;  %vm9310_vm7 = vmmov %vm9285_vm0 }
 0x4df   : > { %v6215_v53 = vld [vmem:[#allocation3 + $0x80] sm:$0xff]   ;;  %v5010_v41 = vsel %vm9310_vm7, %v6242_v38, 0  ;;  %vm9314_vm15 = vmmov %vm9285_vm0 }
 0x4e0   : > { %5873 = vmatmul.mubr.msk.bf16.vlgmr.msra.gmra.mxu0 %vm9282_vm12, %v8482_v15  ;;  %6100 = vmatprep.subr.msk.bf16.mxu1 %vm9267_vm2, %v6215_v53  ;;  %v6220_v12 = vld [vmem:[#allocation3 + $0x80] sm:$0xff]   ;;  %v8613_v15 = vld [vmem:[%s8680_s7 + $0x18] sm:$0xff]   ;;  %vm9297_vm12 = vmmov %vm9285_vm0  ;;  %v5007_v32 = vsel %vm9314_vm15, %v6247_v29, 0 }
 0x4e1   : > { %5877 = vmatpush3.bf16.xpose.msra.mxu1 %v4793_v19  ;;  %5897 = vmatpush3.bf16.xpose.msra.mxu0 %v5028_v63  ;;  %vm9298_vm2 = vmmov %vm9285_vm0 }
 0x4e2   : > { %6101 = vmatprep.subr.msk.bf16.mxu1 %vm9285_vm0, %v6219_v18  ;;  %6109 = vmatprep.subr.msk.bf16.mxu0 %vm9286_vm8, %v6220_v12  ;;  %v4784_v28 = vsel %vm9298_vm2, %v6229_v9, 0  ;;  %vm9301_vm8 = vmmov %vm9285_vm0 }
 0x4e3   : > { %5874 = vmatprep.mubr.msk.bf16.mxu0 %vm9287_vm1, %v6243_v54  ;;  %v4781_v6 = vsel %vm9301_vm8, %v6233_v60, 0  ;;  %vm9302_vm1 = vmmov %vm9285_vm0  ;;  %v4400_v16 = vpop.permute.xlu1 %4399 }
 0x4e4   : > { %v5016_v56 = vsel %vm9302_vm1, %v6234_v25, 0  ;;  %vm9313_vm2 = vmmov %vm9285_vm0 }
 0x4e5   : > { %v4772_v43 = vsel %vm9313_vm2, %v6246_v51, 0  ;;  %vm9316_vm8 = vmmov %vm9285_vm0 }
 0x4e6   : > { %vm9317_vm1 = vmmov %vm9285_vm0 }
 0x4e7   : > { %v4405_v63 = vpop.permute.xlu1 %4404 }
 0x4e8   : > { %5875 = vmatmul.mubr.msk.bf16.gmra.mxu0 %vm9290_vm13, %v6243_v54  ;;  %vm9305_vm13 = vmmov %vm9285_vm0 }
 0x4e9   : > { %5879 = vmatpush3.bf16.xpose.msra.mxu1 %v4790_v48  ;;  %5899 = vmatpush3.bf16.xpose.msra.mxu0 %v5025_v8  ;;  %v4778_v2 = vsel %vm9305_vm13, %v6237_v22, 0 }
 0x4ea   : > { %6102 = vmatprep.subr.msk.bf16.mxu1 %vm9291_vm6, %v6223_v50  ;;  %6110 = vmatprep.subr.msk.bf16.mxu0 %vm9292_vm9, %v6224_v34  ;;  %vm9306_vm6 = vmmov %vm9285_vm0 }
 0x4eb   : > { %5912 = vmatprep.mubr.msk.bf16.mxu0 %vm9293_vm4, %v8613_v15  ;;  %v5013_v10 = vsel %vm9306_vm6, %v6238_v47, 0  ;;  %vm9307_vm9 = vmmov %vm9285_vm0 }
 0x4ec   : > { %vm9308_vm4 = vmmov %vm9285_vm0 }
 0x4f1   : > { %5881 = vmatpush3.bf16.xpose.msra.mxu1 %v4787_v35  ;;  %5901 = vmatpush3.bf16.xpose.msra.mxu0 %v5022_v40 }
 0x4f2   : > { %6103 = vmatprep.subr.msk.bf16.mxu1 %vm9296_vm5, %v6227_v26  ;;  %6111 = vmatprep.subr.msk.bf16.mxu0 %vm9297_vm12, %v6228_v5  ;;  %vm9311_vm5 = vmmov %vm9285_vm0 }
 0x4f3   : > { %vm9312_vm12 = vmmov %vm9285_vm0 }
 0x4f9   : > { %5883 = vmatpush3.bf16.xpose.msra.mxu1 %v4784_v28  ;;  %5903 = vmatpush3.bf16.xpose.msra.mxu0 %v5019_v61 }
 0x4fa   : > { %6104 = vmatprep.subr.msk.bf16.mxu1 %vm9300_vm3, %v6231_v58  ;;  %6112 = vmatprep.subr.msk.bf16.mxu0 %vm9285_vm0, %v6232_v24  ;;  %vm9315_vm3 = vmmov %vm9285_vm0 }
 0x501   : > { %5885 = vmatpush3.bf16.xpose.msra.mxu1 %v4781_v6  ;;  %5905 = vmatpush3.bf16.xpose.msra.mxu0 %v5016_v56 }
 0x502   : > { %6105 = vmatprep.subr.msk.bf16.mxu1 %vm9303_vm11, %v6235_v21  ;;  %6113 = vmatprep.subr.msk.bf16.mxu0 %vm9304_vm14, %v6236_v4  ;;  %vm9318_vm11 = vmmov %vm9285_vm0 }
 0x503   : > { %vm9319_vm14 = vmmov %vm9285_vm0 }
 0x509   : > { %5887 = vmatpush3.bf16.xpose.msra.mxu1 %v4778_v2  ;;  %5907 = vmatpush3.bf16.xpose.msra.mxu0 %v5013_v10 }
 0x50a   : > { %6106 = vmatprep.subr.msk.bf16.mxu1 %vm9307_vm9, %v6239_v44  ;;  %6114 = vmatprep.subr.msk.bf16.mxu0 %vm9308_vm4, %v6240_v46 }
 0x511   : > { %5889 = vmatpush3.bf16.xpose.msra.mxu1 %v4775_v30  ;;  %5909 = vmatpush3.bf16.xpose.msra.mxu0 %v5010_v41 }
 0x512   : > { %6107 = vmatprep.subr.msk.bf16.mxu1 %vm9311_vm5, %v6244_v11  ;;  %6115 = vmatprep.subr.msk.bf16.mxu0 %vm9312_vm12, %v6245_v49 }
 0x519   : > { %5891 = vmatpush3.bf16.xpose.msra.mxu1 %v4772_v43  ;;  %5911 = vmatpush3.bf16.xpose.msra.mxu0 %v5007_v32 }
 0x520   : > { %5893 = vmatmul.mubr.msk.bf16.vlgmr.msra.gmra.mxu1 %vm9315_vm3, %v8537_v36  ;;  %5913 = vmatmul.mubr.msk.bf16.vlgmr.msra.gmra.mxu0 %vm9285_vm0, %v8613_v15  ;;  %v4395_v36 = vpop.permute.xlu0 %4394 }
 0x521   : > { %5894 = vmatprep.mubr.msk.bf16.mxu1 %vm9316_vm8, %v6250_v57  ;;  %5914 = vmatprep.mubr.msk.bf16.mxu0 %vm9317_vm1, %v6251_v3 }
 0x528   : > { %5895 = vmatmul.mubr.msk.bf16.gmra.mxu1 %vm9318_vm11, %v6250_v57  ;;  %5915 = vmatmul.mubr.msk.bf16.gmra.mxu0 %vm9319_vm14, %v6251_v3 }
 0x5a0   : > { %v4618_v0 = vpop.f32.mrf.mxu0 }
 0x5a1   : > { %v4635_v33 = vadd.f32 %v4618_v0, %v4395_v36 }
 0x5a2   : > { %v4620_v14 = vpop.f32.mrf.mxu0 }
 0x5a3   : > { %v4636_v20 = vadd.f32 %v4620_v14, %v4395_v36 }
 0x5a4   : > { %v4622_v39 = vpop.f32.mrf.mxu0 }
 0x5a5   : > { %v4637_v19 = vadd.f32 %v4622_v39, %v4400_v16 }
 0x5a6   : > { %v4624_v31 = vpop.f32.mrf.mxu0 }
 0x5a7   : > { %v4638_v15 = vadd.f32 %v4624_v31, %v4400_v16 }
 0x5a8   : > { %v4628_v62 = vpop.f32.mrf.mxu0 }
 0x5a9   : > { %v4639_v42 = vadd.f32 %v4628_v62, %v4405_v63 }
 0x5aa   : > { %v4630_v23 = vpop.f32.mrf.mxu0 }
 0x5ab   : > { %v4640_v5 = vadd.f32 %v4630_v23, %v4405_v63 }
 0x5ac   : > { %v4632_v55 = vpop.f32.mrf.mxu0 }
 0x5ae   : > { %v4633_v1 = vpop.f32.mrf.mxu0 }
 0x5e0   : > { %v4853_v52 = vpop.f32.mrf.mxu1  ;;  %v5088_v59 = vpop.f32.mrf.mxu0 }
 0x5e1   : > { %v4870_v37 = vadd.f32 %v4853_v52, %v4635_v33 }
 0x5e2   : > { %v4855_v54 = vpop.f32.mrf.mxu1  ;;  %v5090_v53 = vpop.f32.mrf.mxu0 }
 0x5e3   : > { %v5105_v18 = vadd.f32 %v5088_v59, %v4870_v37  ;;  %v4871_v12 = vadd.f32 %v4855_v54, %v4636_v20 }
 0x5e4   : > { %v4857_v45 = vpop.f32.mrf.mxu1  ;;  %v5092_v17 = vpop.f32.mrf.mxu0 }
 0x5e5   : > { %5111 = vst [vmem:[%s8662_s21] sm:$0xff] %v5105_v18  ;;  %v5106_v48 = vadd.f32 %v5090_v53, %v4871_v12  ;;  %v4872_v8 = vadd.f32 %v4857_v45, %v4637_v19 }
 0x5e6   : > { %v4859_v50 = vpop.f32.mrf.mxu1  ;;  %v5094_v34 = vpop.f32.mrf.mxu0 }
 0x5e7   : > { %5112 = vst [vmem:[%s8662_s21 + $0x8] sm:$0xff] %v5106_v48  ;;  %v5107_v27 = vadd.f32 %v5092_v17, %v4872_v8  ;;  %v4873_v35 = vadd.f32 %v4859_v50, %v4638_v15 }
 0x5e8   : > { %v4863_v40 = vpop.f32.mrf.mxu1  ;;  %v5098_v26 = vpop.f32.mrf.mxu0 }
 0x5e9   : > { %5113 = vst [vmem:[%s8662_s21 + $0x10] sm:$0xff] %v5107_v27  ;;  %v5108_v9 = vadd.f32 %v5094_v34, %v4873_v35  ;;  %v4874_v7 = vadd.f32 %v4863_v40, %v4639_v42 }
 0x5ea   : > { %v4865_v28 = vpop.f32.mrf.mxu1  ;;  %v5100_v61 = vpop.f32.mrf.mxu0 }
 0x5eb   : > { %5114 = vst [vmem:[%s8662_s21 + $0x18] sm:$0xff] %v5108_v9  ;;  %v5109_v58 = vadd.f32 %v5098_v26, %v4874_v7  ;;  %v4875_v24 = vadd.f32 %v4865_v28, %v4640_v5 }
 0x5ec   : > { %v4867_v60 = vpop.f32.mrf.mxu1  ;;  %v5102_v25 = vpop.f32.mrf.mxu0 }
 0x5ed   : > { %5115 = vst [vmem:[%s8662_s21 + $0x20] sm:$0x3] %v5109_v58  ;;  %v5110_v6 = vadd.f32 %v5100_v61, %v4875_v24 }
 0x5ee   : > { %v4868_v56 = vpop.f32.mrf.mxu1  ;;  %v5103_v21 = vpop.f32.mrf.mxu0 }
 0x5ef   : > { %5116 = vst [vmem:[%s8662_s21 + $0x28] sm:$0x3] %v5110_v6 }
 0x5f0 PF: > { %s19_s30 = sadd.s32 1, %s6260_s30  }
 0x5f1   : > { %p16_p4 = scmp.ge.s32.totalorder %s19_s30, 4  }
 0x5f3   :  { %18 = sbr.rel (!%p16_p4) target bundleno = 1 (0x1), region = 90 }

</bundles_post_ra>
